<compile_context>
chip_gen: v5e
topology: v5e:2x2
jax: 0.10.0
libtpu: 0.0.40
codegen_flags: <defaults>
</compile_context>

<pallas_src>
import functools
import math

import jax
import jax.numpy as jnp
from jax.experimental import pallas as pl
from jax.experimental.pallas import tpu as pltpu

NEG_INF = -1e9
LN_EPS = 1e-6                       # TRAR's custom LayerNorm eps
MXU_DTYPE = jnp.bfloat16            # MXU operand dtype; accumulation is f32
VMEM_LIMIT = 48 * 1024 * 1024       # fits v7x 64 MiB with headroom


def _choose_row_tile(rows, target=256):
    """Largest row tile <= target that divides rows (multiple of 8)."""
    if rows <= target:
        return rows
    for t in range(target, 7, -8):
        if rows % t == 0:
            return t
    return rows


def _layernorm(z, g, b, ddof_den):
    # TRAR LayerNorm: a_2 * (z - mean) / (std + eps) + b_2, torch std unbiased.
    mu = jnp.mean(z, axis=-1, keepdims=True)
    d = z - mu
    var = jnp.sum(d * d, axis=-1, keepdims=True) / ddof_den
    return g * d / (jnp.sqrt(var) + LN_EPS) + b


# ----------------------------- Pallas kernels ------------------------------

def _routing_alpha_kernel(x_ref, w1_ref, w2_ref, b2_ref, a_ref):
    # SoftRoutingBlock, pooling='avg': mean over seq -> 2-layer MLP -> softmax.
    pooled = jnp.mean(x_ref[...], axis=1)                      # (B, H)
    h = jnp.maximum(jnp.dot(pooled, w1_ref[...],
                            preferred_element_type=jnp.float32), 0.0)
    logits = jnp.dot(h, w2_ref[...],
                     preferred_element_type=jnp.float32) + b2_ref[...]
    m = jnp.max(logits, axis=-1, keepdims=True)
    e = jnp.exp(logits - m)
    a_ref[...] = e / jnp.sum(e, axis=-1, keepdims=True)


def _tiled_linear_kernel(x_ref, w_ref, b_ref, o_ref):
    # Row-tiled Linear with fused (concatenated) weights; bf16 MXU operands.
    o_ref[...] = jnp.dot(x_ref[...].astype(w_ref.dtype), w_ref[...],
                         preferred_element_type=jnp.float32) + b_ref[...]


def _routed_attention_kernel(alpha_ref, qkv_ref, m_ref, o_ref,
                             *, heads, orders, scale, H):
    # SARoutingBlock.routing_att + einsum('bl,blcnm->bcnm') + matmul with v.
    # One batch element per grid step; heads are static lane slices of qkv.
    b = pl.program_id(0)
    dh = H // heads
    qkv = qkv_ref[0]                                           # (Sq, 3H) f32
    # Per-order keep masks (1.0 = keep, 0.0 = masked); shared across heads.
    keeps = [jnp.where(m_ref[0, o] > 0.5, 0.0, 1.0) for o in range(orders)]
    alphas = [alpha_ref[b, o] for o in range(orders)]          # SMEM scalars
    head_outs = []
    for h in range(heads):                                     # static unroll
        q = qkv[:, h * dh:(h + 1) * dh].astype(MXU_DTYPE)
        k = qkv[:, H + h * dh:H + (h + 1) * dh].astype(MXU_DTYPE)
        v = qkv[:, 2 * H + h * dh:2 * H + (h + 1) * dh].astype(MXU_DTYPE)
        s = jax.lax.dot_general(q, k, (((1,), (1,)), ((), ())),
                                preferred_element_type=jnp.float32) * scale
        # One exp per head; each order's masked softmax is a renormalization.
        # Equivalent to masked_fill(-1e9) softmax (softmax is shift invariant).
        p = jnp.exp(s - jnp.max(s, axis=-1, keepdims=True))
        acc = jnp.zeros_like(s)
        for o in range(orders):
            pm = p * keeps[o]
            inv = pl.reciprocal(jnp.sum(pm, axis=-1, keepdims=True), approx=True)
            acc = acc + alphas[o] * (pm * inv)
        head_outs.append(
            jax.lax.dot_general(acc.astype(MXU_DTYPE), v, (((1,), (0,)), ((), ())),
                                preferred_element_type=jnp.float32))
    o_ref[0] = jnp.concatenate(head_outs, axis=-1)             # (Sq, H) lane-dense


def _mh_attention_kernel(q_ref, kv_ref, m_ref, o_ref, *, heads, scale, H):
    # MHAtt.att : scaled dot-product attention with padding mask.
    dh = H // heads
    qf = q_ref[0]                                              # (Sq, H)
    kv = kv_ref[0]                                             # (Sk, 2H)
    bias = jnp.where(m_ref[0, 0] > 0.5, NEG_INF, 0.0)          # (1, Sk)
    head_outs = []
    for h in range(heads):                                     # static unroll
        q = qf[:, h * dh:(h + 1) * dh].astype(MXU_DTYPE)
        k = kv[:, h * dh:(h + 1) * dh].astype(MXU_DTYPE)
        v = kv[:, H + h * dh:H + (h + 1) * dh].astype(MXU_DTYPE)
        s = jax.lax.dot_general(q, k, (((1,), (1,)), ((), ())),
                                preferred_element_type=jnp.float32) * scale + bias
        p = jnp.exp(s - jnp.max(s, axis=-1, keepdims=True))
        att = p * pl.reciprocal(jnp.sum(p, axis=-1, keepdims=True), approx=True)
        head_outs.append(
            jax.lax.dot_general(att.astype(MXU_DTYPE), v, (((1,), (0,)), ((), ())),
                                preferred_element_type=jnp.float32))
    o_ref[0] = jnp.concatenate(head_outs, axis=-1)


def _merge_ln_q_kernel(att_ref, res_ref, wm_ref, bm_ref, g_ref, be_ref,
                       wq_ref, bq_ref, x_out_ref, q_out_ref, *, ddof_den):
    # linear_merge + residual + LayerNorm1, fused with mhatt2's Q projection.
    merged = jnp.dot(att_ref[...].astype(wm_ref.dtype), wm_ref[...],
                     preferred_element_type=jnp.float32) + bm_ref[...]
    xn = _layernorm(res_ref[...] + merged, g_ref[...], be_ref[...], ddof_den)
    x_out_ref[...] = xn
    q_out_ref[...] = jnp.dot(xn.astype(wq_ref.dtype), wq_ref[...],
                             preferred_element_type=jnp.float32) + bq_ref[...]


def _merge_ln_ffn_ln_kernel(att_ref, res_ref, wm_ref, bm_ref, g2_ref, be2_ref,
                            w1_ref, b1_ref, w2_ref, b2_ref, g3_ref, be3_ref,
                            o_ref, *, ddof_den):
    # linear_merge + residual + LN2 + FFN (Linear->ReLU->Linear) + residual + LN3.
    merged = jnp.dot(att_ref[...].astype(wm_ref.dtype), wm_ref[...],
                     preferred_element_type=jnp.float32) + bm_ref[...]
    xn = _layernorm(res_ref[...] + merged, g2_ref[...], be2_ref[...], ddof_den)
    h = jnp.maximum(jnp.dot(xn.astype(w1_ref.dtype), w1_ref[...],
                            preferred_element_type=jnp.float32) + b1_ref[...], 0.0)
    ff = jnp.dot(h.astype(w2_ref.dtype), w2_ref[...],
                 preferred_element_type=jnp.float32) + b2_ref[...]
    o_ref[...] = _layernorm(xn + ff, g3_ref[...], be3_ref[...], ddof_den)


# ----------------------------- wrappers -------------------------------------

def _row_params():
    return pltpu.CompilerParams(dimension_semantics=("parallel",),
                                vmem_limit_bytes=VMEM_LIMIT)


def routing_alpha(x, w1, w2, b2, orders):
    B = x.shape[0]
    return pl.pallas_call(
        _routing_alpha_kernel,
        out_shape=jax.ShapeDtypeStruct((B, orders), jnp.float32),
    )(x, w1, w2, b2)


def tiled_linear(x, w, b):
    R, K = x.shape
    N = w.shape[1]
    tile = _choose_row_tile(R)
    return pl.pallas_call(
        _tiled_linear_kernel,
        out_shape=jax.ShapeDtypeStruct((R, N), jnp.float32),
        grid=(R // tile,),
        in_specs=[
            pl.BlockSpec((tile, K), lambda i: (i, 0)),
            pl.BlockSpec((K, N), lambda i: (0, 0)),
            pl.BlockSpec((1, N), lambda i: (0, 0)),
        ],
        out_specs=pl.BlockSpec((tile, N), lambda i: (i, 0)),
        compiler_params=_row_params(),
    )(x, w, b)


def routed_attention(alpha, qkv, masks, *, heads):
    B, Sq, threeH = qkv.shape
    H = threeH // 3
    orders, Sk = masks.shape[1], masks.shape[-1]
    return pl.pallas_call(
        functools.partial(_routed_attention_kernel, heads=heads, orders=orders,
                          scale=1.0 / math.sqrt(H // heads), H=H),
        out_shape=jax.ShapeDtypeStruct((B, Sq, H), jnp.float32),
        grid=(B,),
        in_specs=[
            pl.BlockSpec(memory_space=pltpu.MemorySpace.SMEM),            # alpha
            pl.BlockSpec((1, Sq, threeH), lambda b: (b, 0, 0)),           # qkv
            pl.BlockSpec((1, orders, Sq, Sk), lambda b: (b, 0, 0, 0)),    # masks
        ],
        out_specs=pl.BlockSpec((1, Sq, H), lambda b: (b, 0, 0)),
        compiler_params=pltpu.CompilerParams(dimension_semantics=("parallel",),
                                             vmem_limit_bytes=VMEM_LIMIT),
    )(alpha, qkv, masks)


def mh_attention(q, kv, mask, *, heads):
    B, Sq, H = q.shape
    Sk = kv.shape[1]
    return pl.pallas_call(
        functools.partial(_mh_attention_kernel, heads=heads,
                          scale=1.0 / math.sqrt(H // heads), H=H),
        out_shape=jax.ShapeDtypeStruct((B, Sq, H), jnp.float32),
        grid=(B,),
        in_specs=[
            pl.BlockSpec((1, Sq, H), lambda b: (b, 0, 0)),
            pl.BlockSpec((1, Sk, 2 * H), lambda b: (b, 0, 0)),
            pl.BlockSpec((1, 1, 1, Sk), lambda b: (b, 0, 0, 0)),
        ],
        out_specs=pl.BlockSpec((1, Sq, H), lambda b: (b, 0, 0)),
        compiler_params=pltpu.CompilerParams(dimension_semantics=("parallel",),
                                             vmem_limit_bytes=VMEM_LIMIT),
    )(q, kv, mask)


def merge_ln_q(att, res, wm, bm, g, be, wq, bq):
    R, H = att.shape
    tile = _choose_row_tile(R)
    row = pl.BlockSpec((tile, H), lambda i: (i, 0))
    w_full = pl.BlockSpec((H, H), lambda i: (0, 0))
    b_full = pl.BlockSpec((1, H), lambda i: (0, 0))
    return pl.pallas_call(
        functools.partial(_merge_ln_q_kernel, ddof_den=float(H - 1)),
        out_shape=(jax.ShapeDtypeStruct((R, H), jnp.float32),
                   jax.ShapeDtypeStruct((R, H), jnp.float32)),
        grid=(R // tile,),
        in_specs=[row, row, w_full, b_full, b_full, b_full, w_full, b_full],
        out_specs=(row, row),
        compiler_params=_row_params(),
    )(att, res, wm, bm, g, be, wq, bq)


def merge_ln_ffn_ln(att, res, wm, bm, g2, be2, w1, b1, w2, b2, g3, be3):
    R, H = att.shape
    F = w1.shape[1]
    tile = _choose_row_tile(R)
    row = pl.BlockSpec((tile, H), lambda i: (i, 0))
    w_hh = pl.BlockSpec((H, H), lambda i: (0, 0))
    b_h = pl.BlockSpec((1, H), lambda i: (0, 0))
    w_hf = pl.BlockSpec((H, F), lambda i: (0, 0))
    b_f = pl.BlockSpec((1, F), lambda i: (0, 0))
    w_fh = pl.BlockSpec((F, H), lambda i: (0, 0))
    return pl.pallas_call(
        functools.partial(_merge_ln_ffn_ln_kernel, ddof_den=float(H - 1)),
        out_shape=jax.ShapeDtypeStruct((R, H), jnp.float32),
        grid=(R // tile,),
        in_specs=[row, row, w_hh, b_h, b_h, b_h, w_hf, b_f, w_fh, b_h, b_h, b_h],
        out_specs=row,
        compiler_params=_row_params(),
    )(att, res, wm, bm, g2, be2, w1, b1, w2, b2, g3, be3)


# ----------------------------- TRAR forward ---------------------------------

def trar_forward(params, x, y, x_masks, y_mask, heads):
    B, Sx, H = x.shape
    Sy = y.shape[1]
    Rx, Ry = B * Sx, B * Sy
    orders = x_masks.shape[1]
    cast = lambda w: w.astype(MXU_DTYPE)     # pre-cast weights (halves DMA bytes)

    # ---- mhatt1: SARoutingBlock (self-attention routed over x_masks) ----
    alpha = routing_alpha(x, params['r_w1'], params['r_w2'], params['r_b2'],
                          orders)
    wqkv = cast(jnp.concatenate(
        [params['sa_wq'], params['sa_wk'], params['sa_wv']], axis=1))
    bqkv = jnp.concatenate(
        [params['sa_bq'], params['sa_bk'], params['sa_bv']], axis=1)
    xf = x.reshape(Rx, H)
    qkv1 = tiled_linear(xf, wqkv, bqkv).reshape(B, Sx, 3 * H)
    att1 = routed_attention(alpha, qkv1, x_masks, heads=heads)

    # merge proj + residual + LayerNorm1, fused with mhatt2's Q projection
    x1, q2 = merge_ln_q(att1.reshape(Rx, H), xf,
                        cast(params['sa_wm']), params['sa_bm'],
                        params['g1'], params['be1'],
                        cast(params['mh_wq']), params['mh_bq'])

    # ---- mhatt2: standard multi-head cross attention with y ----
    wkv = cast(jnp.concatenate([params['mh_wk'], params['mh_wv']], axis=1))
    bkv = jnp.concatenate([params['mh_bk'], params['mh_bv']], axis=1)
    kv2 = tiled_linear(y.reshape(Ry, H), wkv, bkv).reshape(B, Sy, 2 * H)
    att2 = mh_attention(q2.reshape(B, Sx, H), kv2, y_mask, heads=heads)

    # merge proj + residual + LN2 + FFN + residual + LN3, all fused
    out = merge_ln_ffn_ln(att2.reshape(Rx, H), x1,
                          cast(params['mh_wm']), params['mh_bm'],
                          params['g2'], params['be2'],
                          cast(params['f_w1']), params['f_b1'],
                          cast(params['f_w2']), params['f_b2'],
                          params['g3'], params['be3'])
    return out.reshape(B, Sx, H)


# TODO(synk): HardRoutingBlock's gumbel sampling and argmax_binarize are not
# exercised (routing='soft', BINARIZE=False); dropout layers are identity.

if __name__ == "__main__":
    B, Sx, Sy, H, HEADS, FFN_SIZE, ORDERS = 2, 16, 8, 32, 4, 64, 2
    key = jax.random.PRNGKey(0)
    keys = jax.random.split(key, 16)

    def init_linear(k, fin, fout, bias=True):
        kw, kb = jax.random.split(k)
        lim = 1.0 / math.sqrt(fin)
        w = jax.random.uniform(kw, (fin, fout), jnp.float32, -lim, lim)
        if not bias:
            return w
        b = jax.random.uniform(kb, (1, fout), jnp.float32, -lim, lim)
        return w, b

    params = {}
    params['sa_wq'], params['sa_bq'] = init_linear(keys[0], H, H)
    params['sa_wk'], params['sa_bk'] = init_linear(keys[1], H, H)
    params['sa_wv'], params['sa_bv'] = init_linear(keys[2], H, H)
    params['sa_wm'], params['sa_bm'] = init_linear(keys[3], H, H)
    params['r_w1'] = init_linear(keys[4], H, H // 2, bias=False)
    params['r_w2'], params['r_b2'] = init_linear(keys[5], H // 2, ORDERS)
    params['mh_wq'], params['mh_bq'] = init_linear(keys[6], H, H)
    params['mh_wk'], params['mh_bk'] = init_linear(keys[7], H, H)
    params['mh_wv'], params['mh_bv'] = init_linear(keys[8], H, H)
    params['mh_wm'], params['mh_bm'] = init_linear(keys[9], H, H)
    params['f_w1'], params['f_b1'] = init_linear(keys[10], H, FFN_SIZE)
    params['f_w2'], params['f_b2'] = init_linear(keys[11], FFN_SIZE, H)
    for n in ('1', '2', '3'):
        params['g' + n] = jnp.ones((1, H), jnp.float32)
        params['be' + n] = jnp.zeros((1, H), jnp.float32)

    x = jax.random.normal(keys[12], (B, Sx, H), jnp.float32)
    y = jax.random.normal(keys[13], (B, Sy, H), jnp.float32)

    # routing masks: order 0 = global (no masking), order 1 = local window (|i-j|<=2)
    idx = jnp.arange(Sx)
    global_mask = jnp.zeros((Sx, Sx), jnp.float32)
    local_mask = (jnp.abs(idx[:, None] - idx[None, :]) > 2).astype(jnp.float32)
    x_masks = jnp.broadcast_to(jnp.stack([global_mask, local_mask])[None],
                               (B, ORDERS, Sx, Sx)).astype(jnp.float32)
    # y padding mask: batch 1 has its last 2 tokens padded
    y_mask = jnp.zeros((B, 1, 1, Sy), jnp.float32).at[1, 0, 0, Sy - 2:].set(1.0)

    fwd = jax.jit(trar_forward, static_argnames=('heads',))
    out = fwd(params, x, y, x_masks, y_mask, heads=HEADS)
    jax.block_until_ready(out)
    assert out.shape == (B, Sx, H)
    assert bool(jnp.all(jnp.isfinite(out)))
    print("KERNEL_OK")
</pallas_src>

<mosaic_0001>
module attributes {stable_mosaic.version = 11 : i64} {
  func.func @_routing_alpha_kernel(%arg0: memref<2x16x32xf32, #tpu.memory_space<vmem>>, %arg1: memref<32x16xf32, #tpu.memory_space<vmem>>, %arg2: memref<16x2xf32, #tpu.memory_space<vmem>>, %arg3: memref<1x2xf32, #tpu.memory_space<vmem>>, %arg4: memref<2x2xf32, #tpu.memory_space<vmem>>) attributes {dimension_semantics = [], scalar_prefetch = 0 : i64, scratch_operands = 0 : i64, tpu.core_type = #tpu.core_type<tc>} {
    %c0 = arith.constant 0 : index
    %c0_0 = arith.constant 0 : index
    %c0_1 = arith.constant 0 : index
    %0 = vector.load %arg0[%c0, %c0_0, %c0_1] : memref<2x16x32xf32, #tpu.memory_space<vmem>>, vector<2x16x32xf32>
    %cst = arith.constant dense<0.000000e+00> : vector<2x32xf32>
    %1 = vector.multi_reduction <add>, %0, %cst [1] : vector<2x16x32xf32> to vector<2x32xf32>
    %cst_2 = arith.constant 1.600000e+01 : f32
    %2 = vector.broadcast %cst_2 : f32 to vector<2x32xf32>
    %3 = arith.divf %1, %2 : vector<2x32xf32>
    %c0_3 = arith.constant 0 : index
    %c0_4 = arith.constant 0 : index
    %4 = vector.load %arg1[%c0_3, %c0_4] : memref<32x16xf32, #tpu.memory_space<vmem>>, vector<32x16xf32>
    %cst_5 = arith.constant dense<0.000000e+00> : vector<2x16xf32>
    %5 = tpu.matmul %3, %4, %cst_5 {dimension_numbers = #tpu.dot_dimension_numbers<[1], [0], [0], [1], [0, 0, 1, 1], [], []>} : vector<2x32xf32>, vector<32x16xf32>, vector<2x16xf32> -> vector<2x16xf32>
    %cst_6 = arith.constant 0.000000e+00 : f32
    %6 = vector.broadcast %cst_6 : f32 to vector<2x16xf32>
    %7 = arith.maximumf %5, %6 : vector<2x16xf32>
    %c0_7 = arith.constant 0 : index
    %c0_8 = arith.constant 0 : index
    %8 = vector.load %arg2[%c0_7, %c0_8] : memref<16x2xf32, #tpu.memory_space<vmem>>, vector<16x2xf32>
    %cst_9 = arith.constant dense<0.000000e+00> : vector<2x2xf32>
    %9 = tpu.matmul %7, %8, %cst_9 {dimension_numbers = #tpu.dot_dimension_numbers<[1], [0], [0], [1], [0, 0, 1, 1], [], []>} : vector<2x16xf32>, vector<16x2xf32>, vector<2x2xf32> -> vector<2x2xf32>
    %c0_10 = arith.constant 0 : index
    %c0_11 = arith.constant 0 : index
    %10 = vector.load %arg3[%c0_10, %c0_11] : memref<1x2xf32, #tpu.memory_space<vmem>>, vector<1x2xf32>
    %11 = vector.broadcast %10 : vector<1x2xf32> to vector<2x2xf32>
    %12 = arith.addf %9, %11 : vector<2x2xf32>
    %cst_12 = arith.constant dense<0xFF800000> : vector<2xf32>
    %13 = vector.multi_reduction <maximumf>, %12, %cst_12 [1] : vector<2x2xf32> to vector<2xf32>
    %14 = vector.shape_cast %13 : vector<2xf32> to vector<2x1xf32>
    %15 = vector.broadcast %14 : vector<2x1xf32> to vector<2x2xf32>
    %16 = arith.subf %12, %15 : vector<2x2xf32>
    %17 = math.exp %16 : vector<2x2xf32>
    %cst_13 = arith.constant dense<0.000000e+00> : vector<2xf32>
    %18 = vector.multi_reduction <add>, %17, %cst_13 [1] : vector<2x2xf32> to vector<2xf32>
    %19 = vector.shape_cast %18 : vector<2xf32> to vector<2x1xf32>
    %20 = vector.broadcast %19 : vector<2x1xf32> to vector<2x2xf32>
    %21 = arith.divf %17, %20 : vector<2x2xf32>
    %c0_14 = arith.constant 0 : index
    %c0_15 = arith.constant 0 : index
    %22 = vector.load %arg4[%c0_14, %c0_15] : memref<2x2xf32, #tpu.memory_space<vmem>>, vector<2x2xf32>
    tpu.vector_store %arg4[%c0_14, %c0_15], %21 {strides = array<i32>} : memref<2x2xf32, #tpu.memory_space<vmem>>, vector<2x2xf32>,
    return
  }
}

module attributes {stable_mosaic.version = 11 : i64} {
  func.func @_tiled_linear_kernel(%arg0: i32, %arg1: memref<32x32xf32, #tpu.memory_space<vmem>>, %arg2: memref<32x96xbf16, #tpu.memory_space<vmem>>, %arg3: memref<1x96xf32, #tpu.memory_space<vmem>>, %arg4: memref<32x96xf32, #tpu.memory_space<vmem>>) attributes {dimension_semantics = [#tpu.dimension_semantics<parallel>], iteration_bounds = array<i64: 1>, scalar_prefetch = 0 : i64, scratch_operands = 0 : i64, tpu.core_type = #tpu.core_type<tc>, window_params = [{transform_indices = @transform_0, window_bounds = array<i64: 32, 32>}, {pipeline_mode = #tpu.pipeline_mode<synchronous>, transform_indices = @transform_1, window_bounds = array<i64: 32, 96>}, {pipeline_mode = #tpu.pipeline_mode<synchronous>, transform_indices = @transform_2, window_bounds = array<i64: 1, 96>}, {transform_indices = @transform_3, window_bounds = array<i64: 32, 96>}]} {
    %c0 = arith.constant 0 : index
    %c0_0 = arith.constant 0 : index
    %0 = vector.load %arg1[%c0, %c0_0] : memref<32x32xf32, #tpu.memory_space<vmem>>, vector<32x32xf32>
    %1 = arith.truncf %0 : vector<32x32xf32> to vector<32x32xbf16>
    %c0_1 = arith.constant 0 : index
    %c0_2 = arith.constant 0 : index
    %2 = vector.load %arg2[%c0_1, %c0_2] : memref<32x96xbf16, #tpu.memory_space<vmem>>, vector<32x96xbf16>
    %cst = arith.constant dense<0.000000e+00> : vector<32x96xf32>
    %3 = tpu.matmul %1, %2, %cst {dimension_numbers = #tpu.dot_dimension_numbers<[1], [0], [0], [1], [0, 0, 1, 1], [], []>} : vector<32x32xbf16>, vector<32x96xbf16>, vector<32x96xf32> -> vector<32x96xf32>
    %c0_3 = arith.constant 0 : index
    %c0_4 = arith.constant 0 : index
    %4 = vector.load %arg3[%c0_3, %c0_4] : memref<1x96xf32, #tpu.memory_space<vmem>>, vector<1x96xf32>
    %5 = vector.broadcast %4 : vector<1x96xf32> to vector<32x96xf32>
    %6 = arith.addf %3, %5 : vector<32x96xf32>
    %c0_5 = arith.constant 0 : index
    %c0_6 = arith.constant 0 : index
    %7 = vector.load %arg4[%c0_5, %c0_6] : memref<32x96xf32, #tpu.memory_space<vmem>>, vector<32x96xf32>
    tpu.vector_store %arg4[%c0_5, %c0_6], %6 {strides = array<i32>} : memref<32x96xf32, #tpu.memory_space<vmem>>, vector<32x96xf32>,
    return
  }
  func.func @transform_0(%arg0: i32) -> (i32, i32) {
    %c0_i32 = arith.constant 0 : i32
    %c0_i32_0 = arith.constant 0 : i32
    return %arg0, %c0_i32 : i32, i32
  }
  func.func @transform_1(%arg0: i32) -> (i32, i32) {
    %c0_i32 = arith.constant 0 : i32
    %c0_i32_0 = arith.constant 0 : i32
    %c0_i32_1 = arith.constant 0 : i32
    return %c0_i32, %c0_i32_0 : i32, i32
  }
  func.func @transform_2(%arg0: i32) -> (i32, i32) {
    %c0_i32 = arith.constant 0 : i32
    %c0_i32_0 = arith.constant 0 : i32
    %c0_i32_1 = arith.constant 0 : i32
    return %c0_i32, %c0_i32_0 : i32, i32
  }
  func.func @transform_3(%arg0: i32) -> (i32, i32) {
    %c0_i32 = arith.constant 0 : i32
    %c0_i32_0 = arith.constant 0 : i32
    return %arg0, %c0_i32 : i32, i32
  }
}

module attributes {stable_mosaic.version = 11 : i64} {
  func.func @_routed_attention_kernel(%arg0: i32, %arg1: memref<2x2xf32, #tpu.memory_space<smem>>, %arg2: memref<1x16x96xf32, #tpu.memory_space<vmem>>, %arg3: memref<1x2x16x16xf32, #tpu.memory_space<vmem>>, %arg4: memref<1x16x32xf32, #tpu.memory_space<vmem>>) attributes {dimension_semantics = [#tpu.dimension_semantics<parallel>], iteration_bounds = array<i64: 2>, scalar_prefetch = 0 : i64, scratch_operands = 0 : i64, tpu.core_type = #tpu.core_type<tc>, window_params = [{transform_indices = @transform_0, window_bounds = array<i64: 2, 2>}, {transform_indices = @transform_1, window_bounds = array<i64: 1, 16, 96>}, {transform_indices = @transform_2, window_bounds = array<i64: 1, 2, 16, 16>}, {transform_indices = @transform_3, window_bounds = array<i64: 1, 16, 32>}]} {
    %c0 = arith.constant 0 : index
    %c0_0 = arith.constant 0 : index
    %c0_1 = arith.constant 0 : index
    %0 = vector.load %arg2[%c0, %c0_0, %c0_1] : memref<1x16x96xf32, #tpu.memory_space<vmem>>, vector<1x16x96xf32>
    %1 = vector.shape_cast %0 : vector<1x16x96xf32> to vector<16x96xf32>
    %c0_2 = arith.constant 0 : index
    %c0_3 = arith.constant 0 : index
    %c0_4 = arith.constant 0 : index
    %c0_5 = arith.constant 0 : index
    %2 = vector.load %arg3[%c0_2, %c0_3, %c0_4, %c0_5] : memref<1x2x16x16xf32, #tpu.memory_space<vmem>>, vector<1x1x16x16xf32>
    %3 = vector.shape_cast %2 : vector<1x1x16x16xf32> to vector<16x16xf32>
    %cst = arith.constant 5.000000e-01 : f32
    %4 = vector.broadcast %cst : f32 to vector<16x16xf32>
    %5 = arith.cmpf ogt, %3, %4 : vector<16x16xf32>
    %cst_6 = arith.constant 0.000000e+00 : f32
    %cst_7 = arith.constant 1.000000e+00 : f32
    %6 = vector.broadcast %cst_6 : f32 to vector<16x16xf32>
    %7 = vector.broadcast %cst_7 : f32 to vector<16x16xf32>
    %8 = arith.select %5, %6, %7 : vector<16x16xi1>, vector<16x16xf32>
    %c0_8 = arith.constant 0 : index
    %c1 = arith.constant 1 : index
    %c0_9 = arith.constant 0 : index
    %c0_10 = arith.constant 0 : index
    %9 = vector.load %arg3[%c0_8, %c1, %c0_9, %c0_10] : memref<1x2x16x16xf32, #tpu.memory_space<vmem>>, vector<1x1x16x16xf32>
    %10 = vector.shape_cast %9 : vector<1x1x16x16xf32> to vector<16x16xf32>
    %cst_11 = arith.constant 5.000000e-01 : f32
    %11 = vector.broadcast %cst_11 : f32 to vector<16x16xf32>
    %12 = arith.cmpf ogt, %10, %11 : vector<16x16xf32>
    %cst_12 = arith.constant 0.000000e+00 : f32
    %cst_13 = arith.constant 1.000000e+00 : f32
    %13 = vector.broadcast %cst_12 : f32 to vector<16x16xf32>
    %14 = vector.broadcast %cst_13 : f32 to vector<16x16xf32>
    %15 = arith.select %12, %13, %14 : vector<16x16xi1>, vector<16x16xf32>
    %16 = arith.index_cast %arg0 : i32 to index
    %c0_14 = arith.constant 0 : index
    %17 = memref.load %arg1[%16, %c0_14] : memref<2x2xf32, #tpu.memory_space<smem>>
    %18 = arith.index_cast %arg0 : i32 to index
    %c1_15 = arith.constant 1 : index
    %19 = memref.load %arg1[%18, %c1_15] : memref<2x2xf32, #tpu.memory_space<smem>>
    %20 = vector.extract_strided_slice %1 {offsets = [0, 0], sizes = [16, 8], strides = [1, 1]} : vector<16x96xf32> to vector<16x8xf32>
    %21 = arith.truncf %20 : vector<16x8xf32> to vector<16x8xbf16>
    %22 = vector.extract_strided_slice %1 {offsets = [0, 32], sizes = [16, 8], strides = [1, 1]} : vector<16x96xf32> to vector<16x8xf32>
    %23 = arith.truncf %22 : vector<16x8xf32> to vector<16x8xbf16>
    %24 = vector.extract_strided_slice %1 {offsets = [0, 64], sizes = [16, 8], strides = [1, 1]} : vector<16x96xf32> to vector<16x8xf32>
    %25 = arith.truncf %24 : vector<16x8xf32> to vector<16x8xbf16>
    %cst_16 = arith.constant dense<0.000000e+00> : vector<16x16xf32>
    %26 = tpu.matmul %21, %23, %cst_16 {dimension_numbers = #tpu.dot_dimension_numbers<[1], [1], [0], [0], [0, 0, 1, 0], [], []>} : vector<16x8xbf16>, vector<16x8xbf16>, vector<16x16xf32> -> vector<16x16xf32>
    %cst_17 = arith.constant 0.353553385 : f32
    %27 = vector.broadcast %cst_17 : f32 to vector<16x16xf32>
    %28 = arith.mulf %26, %27 : vector<16x16xf32>
    %cst_18 = arith.constant dense<0xFF800000> : vector<16xf32>
    %29 = vector.multi_reduction <maximumf>, %28, %cst_18 [1] : vector<16x16xf32> to vector<16xf32>
    %30 = vector.shape_cast %29 : vector<16xf32> to vector<16x1xf32>
    %31 = vector.broadcast %30 : vector<16x1xf32> to vector<16x16xf32>
    %32 = arith.subf %28, %31 : vector<16x16xf32>
    %33 = math.exp %32 : vector<16x16xf32>
    %cst_19 = arith.constant 0.000000e+00 : f32
    %34 = vector.broadcast %cst_19 : f32 to vector<16x16xf32>
    %35 = arith.mulf %33, %8 : vector<16x16xf32>
    %cst_20 = arith.constant dense<0.000000e+00> : vector<16xf32>
    %36 = vector.multi_reduction <add>, %35, %cst_20 [1] : vector<16x16xf32> to vector<16xf32>
    %37 = vector.shape_cast %36 : vector<16xf32> to vector<16x1xf32>
    %38 = tpu.reciprocal %37 {approx = true} : vector<16x1xf32> -> vector<16x1xf32>
    %39 = vector.broadcast %38 : vector<16x1xf32> to vector<16x16xf32>
    %40 = arith.mulf %35, %39 : vector<16x16xf32>
    %41 = vector.broadcast %17 : f32 to vector<16x16xf32>
    %42 = arith.mulf %41, %40 : vector<16x16xf32>
    %43 = arith.addf %34, %42 : vector<16x16xf32>
    %44 = arith.mulf %33, %15 : vector<16x16xf32>
    %cst_21 = arith.constant dense<0.000000e+00> : vector<16xf32>
    %45 = vector.multi_reduction <add>, %44, %cst_21 [1] : vector<16x16xf32> to vector<16xf32>
    %46 = vector.shape_cast %45 : vector<16xf32> to vector<16x1xf32>
    %47 = tpu.reciprocal %46 {approx = true} : vector<16x1xf32> -> vector<16x1xf32>
    %48 = vector.broadcast %47 : vector<16x1xf32> to vector<16x16xf32>
    %49 = arith.mulf %44, %48 : vector<16x16xf32>
    %50 = vector.broadcast %19 : f32 to vector<16x16xf32>
    %51 = arith.mulf %50, %49 : vector<16x16xf32>
    %52 = arith.addf %43, %51 : vector<16x16xf32>
    %53 = arith.truncf %52 : vector<16x16xf32> to vector<16x16xbf16>
    %cst_22 = arith.constant dense<0.000000e+00> : vector<16x8xf32>
    %54 = tpu.matmul %53, %25, %cst_22 {dimension_numbers = #tpu.dot_dimension_numbers<[1], [0], [0], [1], [0, 0, 1, 1], [], []>} : vector<16x16xbf16>, vector<16x8xbf16>, vector<16x8xf32> -> vector<16x8xf32>
    %55 = vector.extract_strided_slice %1 {offsets = [0, 8], sizes = [16, 8], strides = [1, 1]} : vector<16x96xf32> to vector<16x8xf32>
    %56 = arith.truncf %55 : vector<16x8xf32> to vector<16x8xbf16>
    %57 = vector.extract_strided_slice %1 {offsets = [0, 40], sizes = [16, 8], strides = [1, 1]} : vector<16x96xf32> to vector<16x8xf32>
    %58 = arith.truncf %57 : vector<16x8xf32> to vector<16x8xbf16>
    %59 = vector.extract_strided_slice %1 {offsets = [0, 72], sizes = [16, 8], strides = [1, 1]} : vector<16x96xf32> to vector<16x8xf32>
    %60 = arith.truncf %59 : vector<16x8xf32> to vector<16x8xbf16>
    %cst_23 = arith.constant dense<0.000000e+00> : vector<16x16xf32>
    %61 = tpu.matmul %56, %58, %cst_23 {dimension_numbers = #tpu.dot_dimension_numbers<[1], [1], [0], [0], [0, 0, 1, 0], [], []>} : vector<16x8xbf16>, vector<16x8xbf16>, vector<16x16xf32> -> vector<16x16xf32>
    %cst_24 = arith.constant 0.353553385 : f32
    %62 = vector.broadcast %cst_24 : f32 to vector<16x16xf32>
    %63 = arith.mulf %61, %62 : vector<16x16xf32>
    %cst_25 = arith.constant dense<0xFF800000> : vector<16xf32>
    %64 = vector.multi_reduction <maximumf>, %63, %cst_25 [1] : vector<16x16xf32> to vector<16xf32>
    %65 = vector.shape_cast %64 : vector<16xf32> to vector<16x1xf32>
    %66 = vector.broadcast %65 : vector<16x1xf32> to vector<16x16xf32>
    %67 = arith.subf %63, %66 : vector<16x16xf32>
    %68 = math.exp %67 : vector<16x16xf32>
    %cst_26 = arith.constant 0.000000e+00 : f32
    %69 = vector.broadcast %cst_26 : f32 to vector<16x16xf32>
    %70 = arith.mulf %68, %8 : vector<16x16xf32>
    %cst_27 = arith.constant dense<0.000000e+00> : vector<16xf32>
    %71 = vector.multi_reduction <add>, %70, %cst_27 [1] : vector<16x16xf32> to vector<16xf32>
    %72 = vector.shape_cast %71 : vector<16xf32> to vector<16x1xf32>
    %73 = tpu.reciprocal %72 {approx = true} : vector<16x1xf32> -> vector<16x1xf32>
    %74 = vector.broadcast %73 : vector<16x1xf32> to vector<16x16xf32>
    %75 = arith.mulf %70, %74 : vector<16x16xf32>
    %76 = vector.broadcast %17 : f32 to vector<16x16xf32>
    %77 = arith.mulf %76, %75 : vector<16x16xf32>
    %78 = arith.addf %69, %77 : vector<16x16xf32>
    %79 = arith.mulf %68, %15 : vector<16x16xf32>
    %cst_28 = arith.constant dense<0.000000e+00> : vector<16xf32>
    %80 = vector.multi_reduction <add>, %79, %cst_28 [1] : vector<16x16xf32> to vector<16xf32>
    %81 = vector.shape_cast %80 : vector<16xf32> to vector<16x1xf32>
    %82 = tpu.reciprocal %81 {approx = true} : vector<16x1xf32> -> vector<16x1xf32>
    %83 = vector.broadcast %82 : vector<16x1xf32> to vector<16x16xf32>
    %84 = arith.mulf %79, %83 : vector<16x16xf32>
    %85 = vector.broadcast %19 : f32 to vector<16x16xf32>
    %86 = arith.mulf %85, %84 : vector<16x16xf32>
    %87 = arith.addf %78, %86 : vector<16x16xf32>
    %88 = arith.truncf %87 : vector<16x16xf32> to vector<16x16xbf16>
    %cst_29 = arith.constant dense<0.000000e+00> : vector<16x8xf32>
    %89 = tpu.matmul %88, %60, %cst_29 {dimension_numbers = #tpu.dot_dimension_numbers<[1], [0], [0], [1], [0, 0, 1, 1], [], []>} : vector<16x16xbf16>, vector<16x8xbf16>, vector<16x8xf32> -> vector<16x8xf32>
    %90 = vector.extract_strided_slice %1 {offsets = [0, 16], sizes = [16, 8], strides = [1, 1]} : vector<16x96xf32> to vector<16x8xf32>
    %91 = arith.truncf %90 : vector<16x8xf32> to vector<16x8xbf16>
    %92 = vector.extract_strided_slice %1 {offsets = [0, 48], sizes = [16, 8], strides = [1, 1]} : vector<16x96xf32> to vector<16x8xf32>
    %93 = arith.truncf %92 : vector<16x8xf32> to vector<16x8xbf16>
    %94 = vector.extract_strided_slice %1 {offsets = [0, 80], sizes = [16, 8], strides = [1, 1]} : vector<16x96xf32> to vector<16x8xf32>
    %95 = arith.truncf %94 : vector<16x8xf32> to vector<16x8xbf16>
    %cst_30 = arith.constant dense<0.000000e+00> : vector<16x16xf32>
    %96 = tpu.matmul %91, %93, %cst_30 {dimension_numbers = #tpu.dot_dimension_numbers<[1], [1], [0], [0], [0, 0, 1, 0], [], []>} : vector<16x8xbf16>, vector<16x8xbf16>, vector<16x16xf32> -> vector<16x16xf32>
    %cst_31 = arith.constant 0.353553385 : f32
    %97 = vector.broadcast %cst_31 : f32 to vector<16x16xf32>
    %98 = arith.mulf %96, %97 : vector<16x16xf32>
    %cst_32 = arith.constant dense<0xFF800000> : vector<16xf32>
    %99 = vector.multi_reduction <maximumf>, %98, %cst_32 [1] : vector<16x16xf32> to vector<16xf32>
    %100 = vector.shape_cast %99 : vector<16xf32> to vector<16x1xf32>
    %101 = vector.broadcast %100 : vector<16x1xf32> to vector<16x16xf32>
    %102 = arith.subf %98, %101 : vector<16x16xf32>
    %103 = math.exp %102 : vector<16x16xf32>
    %cst_33 = arith.constant 0.000000e+00 : f32
    %104 = vector.broadcast %cst_33 : f32 to vector<16x16xf32>
    %105 = arith.mulf %103, %8 : vector<16x16xf32>
    %cst_34 = arith.constant dense<0.000000e+00> : vector<16xf32>
    %106 = vector.multi_reduction <add>, %105, %cst_34 [1] : vector<16x16xf32> to vector<16xf32>
    %107 = vector.shape_cast %106 : vector<16xf32> to vector<16x1xf32>
    %108 = tpu.reciprocal %107 {approx = true} : vector<16x1xf32> -> vector<16x1xf32>
    %109 = vector.broadcast %108 : vector<16x1xf32> to vector<16x16xf32>
    %110 = arith.mulf %105, %109 : vector<16x16xf32>
    %111 = vector.broadcast %17 : f32 to vector<16x16xf32>
    %112 = arith.mulf %111, %110 : vector<16x16xf32>
    %113 = arith.addf %104, %112 : vector<16x16xf32>
    %114 = arith.mulf %103, %15 : vector<16x16xf32>
    %cst_35 = arith.constant dense<0.000000e+00> : vector<16xf32>
    %115 = vector.multi_reduction <add>, %114, %cst_35 [1] : vector<16x16xf32> to vector<16xf32>
    %116 = vector.shape_cast %115 : vector<16xf32> to vector<16x1xf32>
    %117 = tpu.reciprocal %116 {approx = true} : vector<16x1xf32> -> vector<16x1xf32>
    %118 = vector.broadcast %117 : vector<16x1xf32> to vector<16x16xf32>
    %119 = arith.mulf %114, %118 : vector<16x16xf32>
    %120 = vector.broadcast %19 : f32 to vector<16x16xf32>
    %121 = arith.mulf %120, %119 : vector<16x16xf32>
    %122 = arith.addf %113, %121 : vector<16x16xf32>
    %123 = arith.truncf %122 : vector<16x16xf32> to vector<16x16xbf16>
    %cst_36 = arith.constant dense<0.000000e+00> : vector<16x8xf32>
    %124 = tpu.matmul %123, %95, %cst_36 {dimension_numbers = #tpu.dot_dimension_numbers<[1], [0], [0], [1], [0, 0, 1, 1], [], []>} : vector<16x16xbf16>, vector<16x8xbf16>, vector<16x8xf32> -> vector<16x8xf32>
    %125 = vector.extract_strided_slice %1 {offsets = [0, 24], sizes = [16, 8], strides = [1, 1]} : vector<16x96xf32> to vector<16x8xf32>
    %126 = arith.truncf %125 : vector<16x8xf32> to vector<16x8xbf16>
    %127 = vector.extract_strided_slice %1 {offsets = [0, 56], sizes = [16, 8], strides = [1, 1]} : vector<16x96xf32> to vector<16x8xf32>
    %128 = arith.truncf %127 : vector<16x8xf32> to vector<16x8xbf16>
    %129 = vector.extract_strided_slice %1 {offsets = [0, 88], sizes = [16, 8], strides = [1, 1]} : vector<16x96xf32> to vector<16x8xf32>
    %130 = arith.truncf %129 : vector<16x8xf32> to vector<16x8xbf16>
    %cst_37 = arith.constant dense<0.000000e+00> : vector<16x16xf32>
    %131 = tpu.matmul %126, %128, %cst_37 {dimension_numbers = #tpu.dot_dimension_numbers<[1], [1], [0], [0], [0, 0, 1, 0], [], []>} : vector<16x8xbf16>, vector<16x8xbf16>, vector<16x16xf32> -> vector<16x16xf32>
    %cst_38 = arith.constant 0.353553385 : f32
    %132 = vector.broadcast %cst_38 : f32 to vector<16x16xf32>
    %133 = arith.mulf %131, %132 : vector<16x16xf32>
    %cst_39 = arith.constant dense<0xFF800000> : vector<16xf32>
    %134 = vector.multi_reduction <maximumf>, %133, %cst_39 [1] : vector<16x16xf32> to vector<16xf32>
    %135 = vector.shape_cast %134 : vector<16xf32> to vector<16x1xf32>
    %136 = vector.broadcast %135 : vector<16x1xf32> to vector<16x16xf32>
    %137 = arith.subf %133, %136 : vector<16x16xf32>
    %138 = math.exp %137 : vector<16x16xf32>
    %cst_40 = arith.constant 0.000000e+00 : f32
    %139 = vector.broadcast %cst_40 : f32 to vector<16x16xf32>
    %140 = arith.mulf %138, %8 : vector<16x16xf32>
    %cst_41 = arith.constant dense<0.000000e+00> : vector<16xf32>
    %141 = vector.multi_reduction <add>, %140, %cst_41 [1] : vector<16x16xf32> to vector<16xf32>
    %142 = vector.shape_cast %141 : vector<16xf32> to vector<16x1xf32>
    %143 = tpu.reciprocal %142 {approx = true} : vector<16x1xf32> -> vector<16x1xf32>
    %144 = vector.broadcast %143 : vector<16x1xf32> to vector<16x16xf32>
    %145 = arith.mulf %140, %144 : vector<16x16xf32>
    %146 = vector.broadcast %17 : f32 to vector<16x16xf32>
    %147 = arith.mulf %146, %145 : vector<16x16xf32>
    %148 = arith.addf %139, %147 : vector<16x16xf32>
    %149 = arith.mulf %138, %15 : vector<16x16xf32>
    %cst_42 = arith.constant dense<0.000000e+00> : vector<16xf32>
    %150 = vector.multi_reduction <add>, %149, %cst_42 [1] : vector<16x16xf32> to vector<16xf32>
    %151 = vector.shape_cast %150 : vector<16xf32> to vector<16x1xf32>
    %152 = tpu.reciprocal %151 {approx = true} : vector<16x1xf32> -> vector<16x1xf32>
    %153 = vector.broadcast %152 : vector<16x1xf32> to vector<16x16xf32>
    %154 = arith.mulf %149, %153 : vector<16x16xf32>
    %155 = vector.broadcast %19 : f32 to vector<16x16xf32>
    %156 = arith.mulf %155, %154 : vector<16x16xf32>
    %157 = arith.addf %148, %156 : vector<16x16xf32>
    %158 = arith.truncf %157 : vector<16x16xf32> to vector<16x16xbf16>
    %cst_43 = arith.constant dense<0.000000e+00> : vector<16x8xf32>
    %159 = tpu.matmul %158, %130, %cst_43 {dimension_numbers = #tpu.dot_dimension_numbers<[1], [0], [0], [1], [0, 0, 1, 1], [], []>} : vector<16x16xbf16>, vector<16x8xbf16>, vector<16x8xf32> -> vector<16x8xf32>
    %160 = tpu.concatenate %54, %89, %124, %159 in 1 : vector<16x8xf32>, vector<16x8xf32>, vector<16x8xf32>, vector<16x8xf32> -> vector<16x32xf32>
    %c0_44 = arith.constant 0 : index
    %c0_45 = arith.constant 0 : index
    %c0_46 = arith.constant 0 : index
    %161 = vector.load %arg4[%c0_44, %c0_45, %c0_46] : memref<1x16x32xf32, #tpu.memory_space<vmem>>, vector<1x16x32xf32>
    %162 = vector.shape_cast %161 : vector<1x16x32xf32> to vector<16x32xf32>
    %163 = vector.shape_cast %160 : vector<16x32xf32> to vector<1x16x32xf32>
    tpu.vector_store %arg4[%c0_44, %c0_45, %c0_46], %163 {strides = array<i32>} : memref<1x16x32xf32, #tpu.memory_space<vmem>>, vector<1x16x32xf32>,
    return
  }
  func.func @transform_0(%arg0: i32) -> (i32, i32) {
    %c0_i32 = arith.constant 0 : i32
    %c0_i32_0 = arith.constant 0 : i32
    %c0_i32_1 = arith.constant 0 : i32
    return %c0_i32, %c0_i32_0 : i32, i32
  }
  func.func @transform_1(%arg0: i32) -> (i32, i32, i32) {
    %c0_i32 = arith.constant 0 : i32
    %c0_i32_0 = arith.constant 0 : i32
    %c0_i32_1 = arith.constant 0 : i32
    return %arg0, %c0_i32, %c0_i32_0 : i32, i32, i32
  }
  func.func @transform_2(%arg0: i32) -> (i32, i32, i32, i32) {
    %c0_i32 = arith.constant 0 : i32
    %c0_i32_0 = arith.constant 0 : i32
    %c0_i32_1 = arith.constant 0 : i32
    %c0_i32_2 = arith.constant 0 : i32
    return %arg0, %c0_i32, %c0_i32_0, %c0_i32_1 : i32, i32, i32, i32
  }
  func.func @transform_3(%arg0: i32) -> (i32, i32, i32) {
    %c0_i32 = arith.constant 0 : i32
    %c0_i32_0 = arith.constant 0 : i32
    %c0_i32_1 = arith.constant 0 : i32
    return %arg0, %c0_i32, %c0_i32_0 : i32, i32, i32
  }
}

module attributes {stable_mosaic.version = 11 : i64} {
  func.func @_merge_ln_q_kernel(%arg0: i32, %arg1: memref<32x32xf32, #tpu.memory_space<vmem>>, %arg2: memref<32x32xf32, #tpu.memory_space<vmem>>, %arg3: memref<32x32xbf16, #tpu.memory_space<vmem>>, %arg4: memref<1x32xf32, #tpu.memory_space<vmem>>, %arg5: memref<1x32xf32, #tpu.memory_space<vmem>>, %arg6: memref<1x32xf32, #tpu.memory_space<vmem>>, %arg7: memref<32x32xbf16, #tpu.memory_space<vmem>>, %arg8: memref<1x32xf32, #tpu.memory_space<vmem>>, %arg9: memref<32x32xf32, #tpu.memory_space<vmem>>, %arg10: memref<32x32xf32, #tpu.memory_space<vmem>>) attributes {dimension_semantics = [#tpu.dimension_semantics<parallel>], iteration_bounds = array<i64: 1>, scalar_prefetch = 0 : i64, scratch_operands = 0 : i64, tpu.core_type = #tpu.core_type<tc>, window_params = [{transform_indices = @transform_0, window_bounds = array<i64: 32, 32>}, {transform_indices = @transform_1, window_bounds = array<i64: 32, 32>}, {pipeline_mode = #tpu.pipeline_mode<synchronous>, transform_indices = @transform_2, window_bounds = array<i64: 32, 32>}, {pipeline_mode = #tpu.pipeline_mode<synchronous>, transform_indices = @transform_3, window_bounds = array<i64: 1, 32>}, {pipeline_mode = #tpu.pipeline_mode<synchronous>, transform_indices = @transform_4, window_bounds = array<i64: 1, 32>}, {pipeline_mode = #tpu.pipeline_mode<synchronous>, transform_indices = @transform_5, window_bounds = array<i64: 1, 32>}, {pipeline_mode = #tpu.pipeline_mode<synchronous>, transform_indices = @transform_6, window_bounds = array<i64: 32, 32>}, {pipeline_mode = #tpu.pipeline_mode<synchronous>, transform_indices = @transform_7, window_bounds = array<i64: 1, 32>}, {transform_indices = @transform_8, window_bounds = array<i64: 32, 32>}, {transform_indices = @transform_9, window_bounds = array<i64: 32, 32>}]} {
    %c0 = arith.constant 0 : index
    %c0_0 = arith.constant 0 : index
    %0 = vector.load %arg1[%c0, %c0_0] : memref<32x32xf32, #tpu.memory_space<vmem>>, vector<32x32xf32>
    %1 = arith.truncf %0 : vector<32x32xf32> to vector<32x32xbf16>
    %c0_1 = arith.constant 0 : index
    %c0_2 = arith.constant 0 : index
    %2 = vector.load %arg3[%c0_1, %c0_2] : memref<32x32xbf16, #tpu.memory_space<vmem>>, vector<32x32xbf16>
    %cst = arith.constant dense<0.000000e+00> : vector<32x32xf32>
    %3 = tpu.matmul %1, %2, %cst {dimension_numbers = #tpu.dot_dimension_numbers<[1], [0], [0], [1], [0, 0, 1, 1], [], []>} : vector<32x32xbf16>, vector<32x32xbf16>, vector<32x32xf32> -> vector<32x32xf32>
    %c0_3 = arith.constant 0 : index
    %c0_4 = arith.constant 0 : index
    %4 = vector.load %arg4[%c0_3, %c0_4] : memref<1x32xf32, #tpu.memory_space<vmem>>, vector<1x32xf32>
    %5 = vector.broadcast %4 : vector<1x32xf32> to vector<32x32xf32>
    %6 = arith.addf %3, %5 : vector<32x32xf32>
    %c0_5 = arith.constant 0 : index
    %c0_6 = arith.constant 0 : index
    %7 = vector.load %arg2[%c0_5, %c0_6] : memref<32x32xf32, #tpu.memory_space<vmem>>, vector<32x32xf32>
    %8 = arith.addf %7, %6 : vector<32x32xf32>
    %c0_7 = arith.constant 0 : index
    %c0_8 = arith.constant 0 : index
    %9 = vector.load %arg5[%c0_7, %c0_8] : memref<1x32xf32, #tpu.memory_space<vmem>>, vector<1x32xf32>
    %c0_9 = arith.constant 0 : index
    %c0_10 = arith.constant 0 : index
    %10 = vector.load %arg6[%c0_9, %c0_10] : memref<1x32xf32, #tpu.memory_space<vmem>>, vector<1x32xf32>
    %cst_11 = arith.constant dense<0.000000e+00> : vector<32xf32>
    %11 = vector.multi_reduction <add>, %8, %cst_11 [1] : vector<32x32xf32> to vector<32xf32>
    %12 = vector.shape_cast %11 : vector<32xf32> to vector<32x1xf32>
    %cst_12 = arith.constant 3.200000e+01 : f32
    %13 = vector.broadcast %cst_12 : f32 to vector<32x1xf32>
    %14 = arith.divf %12, %13 : vector<32x1xf32>
    %15 = vector.broadcast %14 : vector<32x1xf32> to vector<32x32xf32>
    %16 = arith.subf %8, %15 : vector<32x32xf32>
    %17 = arith.mulf %16, %16 : vector<32x32xf32>
    %cst_13 = arith.constant dense<0.000000e+00> : vector<32xf32>
    %18 = vector.multi_reduction <add>, %17, %cst_13 [1] : vector<32x32xf32> to vector<32xf32>
    %19 = vector.shape_cast %18 : vector<32xf32> to vector<32x1xf32>
    %cst_14 = arith.constant 3.100000e+01 : f32
    %20 = vector.broadcast %cst_14 : f32 to vector<32x1xf32>
    %21 = arith.divf %19, %20 : vector<32x1xf32>
    %22 = vector.broadcast %9 : vector<1x32xf32> to vector<32x32xf32>
    %23 = arith.mulf %22, %16 : vector<32x32xf32>
    %24 = math.sqrt %21 : vector<32x1xf32>
    %cst_15 = arith.constant 9.99999997E-7 : f32
    %25 = vector.broadcast %cst_15 : f32 to vector<32x1xf32>
    %26 = arith.addf %24, %25 : vector<32x1xf32>
    %27 = vector.broadcast %26 : vector<32x1xf32> to vector<32x32xf32>
    %28 = arith.divf %23, %27 : vector<32x32xf32>
    %29 = vector.broadcast %10 : vector<1x32xf32> to vector<32x32xf32>
    %30 = arith.addf %28, %29 : vector<32x32xf32>
    %c0_16 = arith.constant 0 : index
    %c0_17 = arith.constant 0 : index
    %31 = vector.load %arg9[%c0_16, %c0_17] : memref<32x32xf32, #tpu.memory_space<vmem>>, vector<32x32xf32>
    tpu.vector_store %arg9[%c0_16, %c0_17], %30 {strides = array<i32>} : memref<32x32xf32, #tpu.memory_space<vmem>>, vector<32x32xf32>,
    %32 = arith.truncf %30 : vector<32x32xf32> to vector<32x32xbf16>
    %c0_18 = arith.constant 0 : index
    %c0_19 = arith.constant 0 : index
    %33 = vector.load %arg7[%c0_18, %c0_19] : memref<32x32xbf16, #tpu.memory_space<vmem>>, vector<32x32xbf16>
    %cst_20 = arith.constant dense<0.000000e+00> : vector<32x32xf32>
    %34 = tpu.matmul %32, %33, %cst_20 {dimension_numbers = #tpu.dot_dimension_numbers<[1], [0], [0], [1], [0, 0, 1, 1], [], []>} : vector<32x32xbf16>, vector<32x32xbf16>, vector<32x32xf32> -> vector<32x32xf32>
    %c0_21 = arith.constant 0 : index
    %c0_22 = arith.constant 0 : index
    %35 = vector.load %arg8[%c0_21, %c0_22] : memref<1x32xf32, #tpu.memory_space<vmem>>, vector<1x32xf32>
    %36 = vector.broadcast %35 : vector<1x32xf32> to vector<32x32xf32>
    %37 = arith.addf %34, %36 : vector<32x32xf32>
    %c0_23 = arith.constant 0 : index
    %c0_24 = arith.constant 0 : index
    %38 = vector.load %arg10[%c0_23, %c0_24] : memref<32x32xf32, #tpu.memory_space<vmem>>, vector<32x32xf32>
    tpu.vector_store %arg10[%c0_23, %c0_24], %37 {strides = array<i32>} : memref<32x32xf32, #tpu.memory_space<vmem>>, vector<32x32xf32>,
    return
  }
  func.func @transform_0(%arg0: i32) -> (i32, i32) {
    %c0_i32 = arith.constant 0 : i32
    %c0_i32_0 = arith.constant 0 : i32
    return %arg0, %c0_i32 : i32, i32
  }
  func.func @transform_1(%arg0: i32) -> (i32, i32) {
    %c0_i32 = arith.constant 0 : i32
    %c0_i32_0 = arith.constant 0 : i32
    return %arg0, %c0_i32 : i32, i32
  }
  func.func @transform_2(%arg0: i32) -> (i32, i32) {
    %c0_i32 = arith.constant 0 : i32
    %c0_i32_0 = arith.constant 0 : i32
    %c0_i32_1 = arith.constant 0 : i32
    return %c0_i32, %c0_i32_0 : i32, i32
  }
  func.func @transform_3(%arg0: i32) -> (i32, i32) {
    %c0_i32 = arith.constant 0 : i32
    %c0_i32_0 = arith.constant 0 : i32
    %c0_i32_1 = arith.constant 0 : i32
    return %c0_i32, %c0_i32_0 : i32, i32
  }
  func.func @transform_4(%arg0: i32) -> (i32, i32) {
    %c0_i32 = arith.constant 0 : i32
    %c0_i32_0 = arith.constant 0 : i32
    %c0_i32_1 = arith.constant 0 : i32
    return %c0_i32, %c0_i32_0 : i32, i32
  }
  func.func @transform_5(%arg0: i32) -> (i32, i32) {
    %c0_i32 = arith.constant 0 : i32
    %c0_i32_0 = arith.constant 0 : i32
    %c0_i32_1 = arith.constant 0 : i32
    return %c0_i32, %c0_i32_0 : i32, i32
  }
  func.func @transform_6(%arg0: i32) -> (i32, i32) {
    %c0_i32 = arith.constant 0 : i32
    %c0_i32_0 = arith.constant 0 : i32
    %c0_i32_1 = arith.constant 0 : i32
    return %c0_i32, %c0_i32_0 : i32, i32
  }
  func.func @transform_7(%arg0: i32) -> (i32, i32) {
    %c0_i32 = arith.constant 0 : i32
    %c0_i32_0 = arith.constant 0 : i32
    %c0_i32_1 = arith.constant 0 : i32
    return %c0_i32, %c0_i32_0 : i32, i32
  }
  func.func @transform_8(%arg0: i32) -> (i32, i32) {
    %c0_i32 = arith.constant 0 : i32
    %c0_i32_0 = arith.constant 0 : i32
    return %arg0, %c0_i32 : i32, i32
  }
  func.func @transform_9(%arg0: i32) -> (i32, i32) {
    %c0_i32 = arith.constant 0 : i32
    %c0_i32_0 = arith.constant 0 : i32
    return %arg0, %c0_i32 : i32, i32
  }
}

module attributes {stable_mosaic.version = 11 : i64} {
  func.func @_tiled_linear_kernel(%arg0: i32, %arg1: memref<16x32xf32, #tpu.memory_space<vmem>>, %arg2: memref<32x64xbf16, #tpu.memory_space<vmem>>, %arg3: memref<1x64xf32, #tpu.memory_space<vmem>>, %arg4: memref<16x64xf32, #tpu.memory_space<vmem>>) attributes {dimension_semantics = [#tpu.dimension_semantics<parallel>], iteration_bounds = array<i64: 1>, scalar_prefetch = 0 : i64, scratch_operands = 0 : i64, tpu.core_type = #tpu.core_type<tc>, window_params = [{transform_indices = @transform_0, window_bounds = array<i64: 16, 32>}, {pipeline_mode = #tpu.pipeline_mode<synchronous>, transform_indices = @transform_1, window_bounds = array<i64: 32, 64>}, {pipeline_mode = #tpu.pipeline_mode<synchronous>, transform_indices = @transform_2, window_bounds = array<i64: 1, 64>}, {transform_indices = @transform_3, window_bounds = array<i64: 16, 64>}]} {
    %c0 = arith.constant 0 : index
    %c0_0 = arith.constant 0 : index
    %0 = vector.load %arg1[%c0, %c0_0] : memref<16x32xf32, #tpu.memory_space<vmem>>, vector<16x32xf32>
    %1 = arith.truncf %0 : vector<16x32xf32> to vector<16x32xbf16>
    %c0_1 = arith.constant 0 : index
    %c0_2 = arith.constant 0 : index
    %2 = vector.load %arg2[%c0_1, %c0_2] : memref<32x64xbf16, #tpu.memory_space<vmem>>, vector<32x64xbf16>
    %cst = arith.constant dense<0.000000e+00> : vector<16x64xf32>
    %3 = tpu.matmul %1, %2, %cst {dimension_numbers = #tpu.dot_dimension_numbers<[1], [0], [0], [1], [0, 0, 1, 1], [], []>} : vector<16x32xbf16>, vector<32x64xbf16>, vector<16x64xf32> -> vector<16x64xf32>
    %c0_3 = arith.constant 0 : index
    %c0_4 = arith.constant 0 : index
    %4 = vector.load %arg3[%c0_3, %c0_4] : memref<1x64xf32, #tpu.memory_space<vmem>>, vector<1x64xf32>
    %5 = vector.broadcast %4 : vector<1x64xf32> to vector<16x64xf32>
    %6 = arith.addf %3, %5 : vector<16x64xf32>
    %c0_5 = arith.constant 0 : index
    %c0_6 = arith.constant 0 : index
    %7 = vector.load %arg4[%c0_5, %c0_6] : memref<16x64xf32, #tpu.memory_space<vmem>>, vector<16x64xf32>
    tpu.vector_store %arg4[%c0_5, %c0_6], %6 {strides = array<i32>} : memref<16x64xf32, #tpu.memory_space<vmem>>, vector<16x64xf32>,
    return
  }
  func.func @transform_0(%arg0: i32) -> (i32, i32) {
    %c0_i32 = arith.constant 0 : i32
    %c0_i32_0 = arith.constant 0 : i32
    return %arg0, %c0_i32 : i32, i32
  }
  func.func @transform_1(%arg0: i32) -> (i32, i32) {
    %c0_i32 = arith.constant 0 : i32
    %c0_i32_0 = arith.constant 0 : i32
    %c0_i32_1 = arith.constant 0 : i32
    return %c0_i32, %c0_i32_0 : i32, i32
  }
  func.func @transform_2(%arg0: i32) -> (i32, i32) {
    %c0_i32 = arith.constant 0 : i32
    %c0_i32_0 = arith.constant 0 : i32
    %c0_i32_1 = arith.constant 0 : i32
    return %c0_i32, %c0_i32_0 : i32, i32
  }
  func.func @transform_3(%arg0: i32) -> (i32, i32) {
    %c0_i32 = arith.constant 0 : i32
    %c0_i32_0 = arith.constant 0 : i32
    return %arg0, %c0_i32 : i32, i32
  }
}

module attributes {stable_mosaic.version = 11 : i64} {
  func.func @_mh_attention_kernel(%arg0: i32, %arg1: memref<1x16x32xf32, #tpu.memory_space<vmem>>, %arg2: memref<1x8x64xf32, #tpu.memory_space<vmem>>, %arg3: memref<1x1x1x8xf32, #tpu.memory_space<vmem>>, %arg4: memref<1x16x32xf32, #tpu.memory_space<vmem>>) attributes {dimension_semantics = [#tpu.dimension_semantics<parallel>], iteration_bounds = array<i64: 2>, scalar_prefetch = 0 : i64, scratch_operands = 0 : i64, tpu.core_type = #tpu.core_type<tc>, window_params = [{transform_indices = @transform_0, window_bounds = array<i64: 1, 16, 32>}, {transform_indices = @transform_1, window_bounds = array<i64: 1, 8, 64>}, {transform_indices = @transform_2, window_bounds = array<i64: 1, 1, 1, 8>}, {transform_indices = @transform_3, window_bounds = array<i64: 1, 16, 32>}]} {
    %c0 = arith.constant 0 : index
    %c0_0 = arith.constant 0 : index
    %c0_1 = arith.constant 0 : index
    %0 = vector.load %arg1[%c0, %c0_0, %c0_1] : memref<1x16x32xf32, #tpu.memory_space<vmem>>, vector<1x16x32xf32>
    %1 = vector.shape_cast %0 : vector<1x16x32xf32> to vector<16x32xf32>
    %c0_2 = arith.constant 0 : index
    %c0_3 = arith.constant 0 : index
    %c0_4 = arith.constant 0 : index
    %2 = vector.load %arg2[%c0_2, %c0_3, %c0_4] : memref<1x8x64xf32, #tpu.memory_space<vmem>>, vector<1x8x64xf32>
    %3 = vector.shape_cast %2 : vector<1x8x64xf32> to vector<8x64xf32>
    %c0_5 = arith.constant 0 : index
    %c0_6 = arith.constant 0 : index
    %c0_7 = arith.constant 0 : index
    %c0_8 = arith.constant 0 : index
    %4 = vector.load %arg3[%c0_5, %c0_6, %c0_7, %c0_8] : memref<1x1x1x8xf32, #tpu.memory_space<vmem>>, vector<1x1x1x8xf32>
    %5 = vector.shape_cast %4 : vector<1x1x1x8xf32> to vector<1x8xf32>
    %cst = arith.constant 5.000000e-01 : f32
    %6 = vector.broadcast %cst : f32 to vector<1x8xf32>
    %7 = arith.cmpf ogt, %5, %6 : vector<1x8xf32>
    %cst_9 = arith.constant -1.000000e+09 : f32
    %cst_10 = arith.constant 0.000000e+00 : f32
    %8 = vector.broadcast %cst_9 : f32 to vector<1x8xf32>
    %9 = vector.broadcast %cst_10 : f32 to vector<1x8xf32>
    %10 = arith.select %7, %8, %9 : vector<1x8xi1>, vector<1x8xf32>
    %11 = vector.extract_strided_slice %1 {offsets = [0, 0], sizes = [16, 8], strides = [1, 1]} : vector<16x32xf32> to vector<16x8xf32>
    %12 = arith.truncf %11 : vector<16x8xf32> to vector<16x8xbf16>
    %13 = vector.extract_strided_slice %3 {offsets = [0, 0], sizes = [8, 8], strides = [1, 1]} : vector<8x64xf32> to vector<8x8xf32>
    %14 = arith.truncf %13 : vector<8x8xf32> to vector<8x8xbf16>
    %15 = vector.extract_strided_slice %3 {offsets = [0, 32], sizes = [8, 8], strides = [1, 1]} : vector<8x64xf32> to vector<8x8xf32>
    %16 = arith.truncf %15 : vector<8x8xf32> to vector<8x8xbf16>
    %cst_11 = arith.constant dense<0.000000e+00> : vector<16x8xf32>
    %17 = tpu.matmul %12, %14, %cst_11 {dimension_numbers = #tpu.dot_dimension_numbers<[1], [1], [0], [0], [0, 0, 1, 0], [], []>} : vector<16x8xbf16>, vector<8x8xbf16>, vector<16x8xf32> -> vector<16x8xf32>
    %cst_12 = arith.constant 0.353553385 : f32
    %18 = vector.broadcast %cst_12 : f32 to vector<16x8xf32>
    %19 = arith.mulf %17, %18 : vector<16x8xf32>
    %20 = vector.broadcast %10 : vector<1x8xf32> to vector<16x8xf32>
    %21 = arith.addf %19, %20 : vector<16x8xf32>
    %cst_13 = arith.constant dense<0xFF800000> : vector<16xf32>
    %22 = vector.multi_reduction <maximumf>, %21, %cst_13 [1] : vector<16x8xf32> to vector<16xf32>
    %23 = vector.shape_cast %22 : vector<16xf32> to vector<16x1xf32>
    %24 = vector.broadcast %23 : vector<16x1xf32> to vector<16x8xf32>
    %25 = arith.subf %21, %24 : vector<16x8xf32>
    %26 = math.exp %25 : vector<16x8xf32>
    %cst_14 = arith.constant dense<0.000000e+00> : vector<16xf32>
    %27 = vector.multi_reduction <add>, %26, %cst_14 [1] : vector<16x8xf32> to vector<16xf32>
    %28 = vector.shape_cast %27 : vector<16xf32> to vector<16x1xf32>
    %29 = tpu.reciprocal %28 {approx = true} : vector<16x1xf32> -> vector<16x1xf32>
    %30 = vector.broadcast %29 : vector<16x1xf32> to vector<16x8xf32>
    %31 = arith.mulf %26, %30 : vector<16x8xf32>
    %32 = arith.truncf %31 : vector<16x8xf32> to vector<16x8xbf16>
    %cst_15 = arith.constant dense<0.000000e+00> : vector<16x8xf32>
    %33 = tpu.matmul %32, %16, %cst_15 {dimension_numbers = #tpu.dot_dimension_numbers<[1], [0], [0], [1], [0, 0, 1, 1], [], []>} : vector<16x8xbf16>, vector<8x8xbf16>, vector<16x8xf32> -> vector<16x8xf32>
    %34 = vector.extract_strided_slice %1 {offsets = [0, 8], sizes = [16, 8], strides = [1, 1]} : vector<16x32xf32> to vector<16x8xf32>
    %35 = arith.truncf %34 : vector<16x8xf32> to vector<16x8xbf16>
    %36 = vector.extract_strided_slice %3 {offsets = [0, 8], sizes = [8, 8], strides = [1, 1]} : vector<8x64xf32> to vector<8x8xf32>
    %37 = arith.truncf %36 : vector<8x8xf32> to vector<8x8xbf16>
    %38 = vector.extract_strided_slice %3 {offsets = [0, 40], sizes = [8, 8], strides = [1, 1]} : vector<8x64xf32> to vector<8x8xf32>
    %39 = arith.truncf %38 : vector<8x8xf32> to vector<8x8xbf16>
    %cst_16 = arith.constant dense<0.000000e+00> : vector<16x8xf32>
    %40 = tpu.matmul %35, %37, %cst_16 {dimension_numbers = #tpu.dot_dimension_numbers<[1], [1], [0], [0], [0, 0, 1, 0], [], []>} : vector<16x8xbf16>, vector<8x8xbf16>, vector<16x8xf32> -> vector<16x8xf32>
    %cst_17 = arith.constant 0.353553385 : f32
    %41 = vector.broadcast %cst_17 : f32 to vector<16x8xf32>
    %42 = arith.mulf %40, %41 : vector<16x8xf32>
    %43 = vector.broadcast %10 : vector<1x8xf32> to vector<16x8xf32>
    %44 = arith.addf %42, %43 : vector<16x8xf32>
    %cst_18 = arith.constant dense<0xFF800000> : vector<16xf32>
    %45 = vector.multi_reduction <maximumf>, %44, %cst_18 [1] : vector<16x8xf32> to vector<16xf32>
    %46 = vector.shape_cast %45 : vector<16xf32> to vector<16x1xf32>
    %47 = vector.broadcast %46 : vector<16x1xf32> to vector<16x8xf32>
    %48 = arith.subf %44, %47 : vector<16x8xf32>
    %49 = math.exp %48 : vector<16x8xf32>
    %cst_19 = arith.constant dense<0.000000e+00> : vector<16xf32>
    %50 = vector.multi_reduction <add>, %49, %cst_19 [1] : vector<16x8xf32> to vector<16xf32>
    %51 = vector.shape_cast %50 : vector<16xf32> to vector<16x1xf32>
    %52 = tpu.reciprocal %51 {approx = true} : vector<16x1xf32> -> vector<16x1xf32>
    %53 = vector.broadcast %52 : vector<16x1xf32> to vector<16x8xf32>
    %54 = arith.mulf %49, %53 : vector<16x8xf32>
    %55 = arith.truncf %54 : vector<16x8xf32> to vector<16x8xbf16>
    %cst_20 = arith.constant dense<0.000000e+00> : vector<16x8xf32>
    %56 = tpu.matmul %55, %39, %cst_20 {dimension_numbers = #tpu.dot_dimension_numbers<[1], [0], [0], [1], [0, 0, 1, 1], [], []>} : vector<16x8xbf16>, vector<8x8xbf16>, vector<16x8xf32> -> vector<16x8xf32>
    %57 = vector.extract_strided_slice %1 {offsets = [0, 16], sizes = [16, 8], strides = [1, 1]} : vector<16x32xf32> to vector<16x8xf32>
    %58 = arith.truncf %57 : vector<16x8xf32> to vector<16x8xbf16>
    %59 = vector.extract_strided_slice %3 {offsets = [0, 16], sizes = [8, 8], strides = [1, 1]} : vector<8x64xf32> to vector<8x8xf32>
    %60 = arith.truncf %59 : vector<8x8xf32> to vector<8x8xbf16>
    %61 = vector.extract_strided_slice %3 {offsets = [0, 48], sizes = [8, 8], strides = [1, 1]} : vector<8x64xf32> to vector<8x8xf32>
    %62 = arith.truncf %61 : vector<8x8xf32> to vector<8x8xbf16>
    %cst_21 = arith.constant dense<0.000000e+00> : vector<16x8xf32>
    %63 = tpu.matmul %58, %60, %cst_21 {dimension_numbers = #tpu.dot_dimension_numbers<[1], [1], [0], [0], [0, 0, 1, 0], [], []>} : vector<16x8xbf16>, vector<8x8xbf16>, vector<16x8xf32> -> vector<16x8xf32>
    %cst_22 = arith.constant 0.353553385 : f32
    %64 = vector.broadcast %cst_22 : f32 to vector<16x8xf32>
    %65 = arith.mulf %63, %64 : vector<16x8xf32>
    %66 = vector.broadcast %10 : vector<1x8xf32> to vector<16x8xf32>
    %67 = arith.addf %65, %66 : vector<16x8xf32>
    %cst_23 = arith.constant dense<0xFF800000> : vector<16xf32>
    %68 = vector.multi_reduction <maximumf>, %67, %cst_23 [1] : vector<16x8xf32> to vector<16xf32>
    %69 = vector.shape_cast %68 : vector<16xf32> to vector<16x1xf32>
    %70 = vector.broadcast %69 : vector<16x1xf32> to vector<16x8xf32>
    %71 = arith.subf %67, %70 : vector<16x8xf32>
    %72 = math.exp %71 : vector<16x8xf32>
    %cst_24 = arith.constant dense<0.000000e+00> : vector<16xf32>
    %73 = vector.multi_reduction <add>, %72, %cst_24 [1] : vector<16x8xf32> to vector<16xf32>
    %74 = vector.shape_cast %73 : vector<16xf32> to vector<16x1xf32>
    %75 = tpu.reciprocal %74 {approx = true} : vector<16x1xf32> -> vector<16x1xf32>
    %76 = vector.broadcast %75 : vector<16x1xf32> to vector<16x8xf32>
    %77 = arith.mulf %72, %76 : vector<16x8xf32>
    %78 = arith.truncf %77 : vector<16x8xf32> to vector<16x8xbf16>
    %cst_25 = arith.constant dense<0.000000e+00> : vector<16x8xf32>
    %79 = tpu.matmul %78, %62, %cst_25 {dimension_numbers = #tpu.dot_dimension_numbers<[1], [0], [0], [1], [0, 0, 1, 1], [], []>} : vector<16x8xbf16>, vector<8x8xbf16>, vector<16x8xf32> -> vector<16x8xf32>
    %80 = vector.extract_strided_slice %1 {offsets = [0, 24], sizes = [16, 8], strides = [1, 1]} : vector<16x32xf32> to vector<16x8xf32>
    %81 = arith.truncf %80 : vector<16x8xf32> to vector<16x8xbf16>
    %82 = vector.extract_strided_slice %3 {offsets = [0, 24], sizes = [8, 8], strides = [1, 1]} : vector<8x64xf32> to vector<8x8xf32>
    %83 = arith.truncf %82 : vector<8x8xf32> to vector<8x8xbf16>
    %84 = vector.extract_strided_slice %3 {offsets = [0, 56], sizes = [8, 8], strides = [1, 1]} : vector<8x64xf32> to vector<8x8xf32>
    %85 = arith.truncf %84 : vector<8x8xf32> to vector<8x8xbf16>
    %cst_26 = arith.constant dense<0.000000e+00> : vector<16x8xf32>
    %86 = tpu.matmul %81, %83, %cst_26 {dimension_numbers = #tpu.dot_dimension_numbers<[1], [1], [0], [0], [0, 0, 1, 0], [], []>} : vector<16x8xbf16>, vector<8x8xbf16>, vector<16x8xf32> -> vector<16x8xf32>
    %cst_27 = arith.constant 0.353553385 : f32
    %87 = vector.broadcast %cst_27 : f32 to vector<16x8xf32>
    %88 = arith.mulf %86, %87 : vector<16x8xf32>
    %89 = vector.broadcast %10 : vector<1x8xf32> to vector<16x8xf32>
    %90 = arith.addf %88, %89 : vector<16x8xf32>
    %cst_28 = arith.constant dense<0xFF800000> : vector<16xf32>
    %91 = vector.multi_reduction <maximumf>, %90, %cst_28 [1] : vector<16x8xf32> to vector<16xf32>
    %92 = vector.shape_cast %91 : vector<16xf32> to vector<16x1xf32>
    %93 = vector.broadcast %92 : vector<16x1xf32> to vector<16x8xf32>
    %94 = arith.subf %90, %93 : vector<16x8xf32>
    %95 = math.exp %94 : vector<16x8xf32>
    %cst_29 = arith.constant dense<0.000000e+00> : vector<16xf32>
    %96 = vector.multi_reduction <add>, %95, %cst_29 [1] : vector<16x8xf32> to vector<16xf32>
    %97 = vector.shape_cast %96 : vector<16xf32> to vector<16x1xf32>
    %98 = tpu.reciprocal %97 {approx = true} : vector<16x1xf32> -> vector<16x1xf32>
    %99 = vector.broadcast %98 : vector<16x1xf32> to vector<16x8xf32>
    %100 = arith.mulf %95, %99 : vector<16x8xf32>
    %101 = arith.truncf %100 : vector<16x8xf32> to vector<16x8xbf16>
    %cst_30 = arith.constant dense<0.000000e+00> : vector<16x8xf32>
    %102 = tpu.matmul %101, %85, %cst_30 {dimension_numbers = #tpu.dot_dimension_numbers<[1], [0], [0], [1], [0, 0, 1, 1], [], []>} : vector<16x8xbf16>, vector<8x8xbf16>, vector<16x8xf32> -> vector<16x8xf32>
    %103 = tpu.concatenate %33, %56, %79, %102 in 1 : vector<16x8xf32>, vector<16x8xf32>, vector<16x8xf32>, vector<16x8xf32> -> vector<16x32xf32>
    %c0_31 = arith.constant 0 : index
    %c0_32 = arith.constant 0 : index
    %c0_33 = arith.constant 0 : index
    %104 = vector.load %arg4[%c0_31, %c0_32, %c0_33] : memref<1x16x32xf32, #tpu.memory_space<vmem>>, vector<1x16x32xf32>
    %105 = vector.shape_cast %104 : vector<1x16x32xf32> to vector<16x32xf32>
    %106 = vector.shape_cast %103 : vector<16x32xf32> to vector<1x16x32xf32>
    tpu.vector_store %arg4[%c0_31, %c0_32, %c0_33], %106 {strides = array<i32>} : memref<1x16x32xf32, #tpu.memory_space<vmem>>, vector<1x16x32xf32>,
    return
  }
  func.func @transform_0(%arg0: i32) -> (i32, i32, i32) {
    %c0_i32 = arith.constant 0 : i32
    %c0_i32_0 = arith.constant 0 : i32
    %c0_i32_1 = arith.constant 0 : i32
    return %arg0, %c0_i32, %c0_i32_0 : i32, i32, i32
  }
  func.func @transform_1(%arg0: i32) -> (i32, i32, i32) {
    %c0_i32 = arith.constant 0 : i32
    %c0_i32_0 = arith.constant 0 : i32
    %c0_i32_1 = arith.constant 0 : i32
    return %arg0, %c0_i32, %c0_i32_0 : i32, i32, i32
  }
  func.func @transform_2(%arg0: i32) -> (i32, i32, i32, i32) {
    %c0_i32 = arith.constant 0 : i32
    %c0_i32_0 = arith.constant 0 : i32
    %c0_i32_1 = arith.constant 0 : i32
    %c0_i32_2 = arith.constant 0 : i32
    return %arg0, %c0_i32, %c0_i32_0, %c0_i32_1 : i32, i32, i32, i32
  }
  func.func @transform_3(%arg0: i32) -> (i32, i32, i32) {
    %c0_i32 = arith.constant 0 : i32
    %c0_i32_0 = arith.constant 0 : i32
    %c0_i32_1 = arith.constant 0 : i32
    return %arg0, %c0_i32, %c0_i32_0 : i32, i32, i32
  }
}

module attributes {stable_mosaic.version = 11 : i64} {
  func.func @_merge_ln_ffn_ln_kernel(%arg0: i32, %arg1: memref<32x32xf32, #tpu.memory_space<vmem>>, %arg2: memref<32x32xf32, #tpu.memory_space<vmem>>, %arg3: memref<32x32xbf16, #tpu.memory_space<vmem>>, %arg4: memref<1x32xf32, #tpu.memory_space<vmem>>, %arg5: memref<1x32xf32, #tpu.memory_space<vmem>>, %arg6: memref<1x32xf32, #tpu.memory_space<vmem>>, %arg7: memref<32x64xbf16, #tpu.memory_space<vmem>>, %arg8: memref<1x64xf32, #tpu.memory_space<vmem>>, %arg9: memref<64x32xbf16, #tpu.memory_space<vmem>>, %arg10: memref<1x32xf32, #tpu.memory_space<vmem>>, %arg11: memref<1x32xf32, #tpu.memory_space<vmem>>, %arg12: memref<1x32xf32, #tpu.memory_space<vmem>>, %arg13: memref<32x32xf32, #tpu.memory_space<vmem>>) attributes {dimension_semantics = [#tpu.dimension_semantics<parallel>], iteration_bounds = array<i64: 1>, scalar_prefetch = 0 : i64, scratch_operands = 0 : i64, tpu.core_type = #tpu.core_type<tc>, window_params = [{transform_indices = @transform_0, window_bounds = array<i64: 32, 32>}, {transform_indices = @transform_1, window_bounds = array<i64: 32, 32>}, {pipeline_mode = #tpu.pipeline_mode<synchronous>, transform_indices = @transform_2, window_bounds = array<i64: 32, 32>}, {pipeline_mode = #tpu.pipeline_mode<synchronous>, transform_indices = @transform_3, window_bounds = array<i64: 1, 32>}, {pipeline_mode = #tpu.pipeline_mode<synchronous>, transform_indices = @transform_4, window_bounds = array<i64: 1, 32>}, {pipeline_mode = #tpu.pipeline_mode<synchronous>, transform_indices = @transform_5, window_bounds = array<i64: 1, 32>}, {pipeline_mode = #tpu.pipeline_mode<synchronous>, transform_indices = @transform_6, window_bounds = array<i64: 32, 64>}, {pipeline_mode = #tpu.pipeline_mode<synchronous>, transform_indices = @transform_7, window_bounds = array<i64: 1, 64>}, {pipeline_mode = #tpu.pipeline_mode<synchronous>, transform_indices = @transform_8, window_bounds = array<i64: 64, 32>}, {pipeline_mode = #tpu.pipeline_mode<synchronous>, transform_indices = @transform_9, window_bounds = array<i64: 1, 32>}, {pipeline_mode = #tpu.pipeline_mode<synchronous>, transform_indices = @transform_10, window_bounds = array<i64: 1, 32>}, {pipeline_mode = #tpu.pipeline_mode<synchronous>, transform_indices = @transform_11, window_bounds = array<i64: 1, 32>}, {transform_indices = @transform_12, window_bounds = array<i64: 32, 32>}]} {
    %c0 = arith.constant 0 : index
    %c0_0 = arith.constant 0 : index
    %0 = vector.load %arg1[%c0, %c0_0] : memref<32x32xf32, #tpu.memory_space<vmem>>, vector<32x32xf32>
    %1 = arith.truncf %0 : vector<32x32xf32> to vector<32x32xbf16>
    %c0_1 = arith.constant 0 : index
    %c0_2 = arith.constant 0 : index
    %2 = vector.load %arg3[%c0_1, %c0_2] : memref<32x32xbf16, #tpu.memory_space<vmem>>, vector<32x32xbf16>
    %cst = arith.constant dense<0.000000e+00> : vector<32x32xf32>
    %3 = tpu.matmul %1, %2, %cst {dimension_numbers = #tpu.dot_dimension_numbers<[1], [0], [0], [1], [0, 0, 1, 1], [], []>} : vector<32x32xbf16>, vector<32x32xbf16>, vector<32x32xf32> -> vector<32x32xf32>
    %c0_3 = arith.constant 0 : index
    %c0_4 = arith.constant 0 : index
    %4 = vector.load %arg4[%c0_3, %c0_4] : memref<1x32xf32, #tpu.memory_space<vmem>>, vector<1x32xf32>
    %5 = vector.broadcast %4 : vector<1x32xf32> to vector<32x32xf32>
    %6 = arith.addf %3, %5 : vector<32x32xf32>
    %c0_5 = arith.constant 0 : index
    %c0_6 = arith.constant 0 : index
    %7 = vector.load %arg2[%c0_5, %c0_6] : memref<32x32xf32, #tpu.memory_space<vmem>>, vector<32x32xf32>
    %8 = arith.addf %7, %6 : vector<32x32xf32>
    %c0_7 = arith.constant 0 : index
    %c0_8 = arith.constant 0 : index
    %9 = vector.load %arg5[%c0_7, %c0_8] : memref<1x32xf32, #tpu.memory_space<vmem>>, vector<1x32xf32>
    %c0_9 = arith.constant 0 : index
    %c0_10 = arith.constant 0 : index
    %10 = vector.load %arg6[%c0_9, %c0_10] : memref<1x32xf32, #tpu.memory_space<vmem>>, vector<1x32xf32>
    %cst_11 = arith.constant dense<0.000000e+00> : vector<32xf32>
    %11 = vector.multi_reduction <add>, %8, %cst_11 [1] : vector<32x32xf32> to vector<32xf32>
    %12 = vector.shape_cast %11 : vector<32xf32> to vector<32x1xf32>
    %cst_12 = arith.constant 3.200000e+01 : f32
    %13 = vector.broadcast %cst_12 : f32 to vector<32x1xf32>
    %14 = arith.divf %12, %13 : vector<32x1xf32>
    %15 = vector.broadcast %14 : vector<32x1xf32> to vector<32x32xf32>
    %16 = arith.subf %8, %15 : vector<32x32xf32>
    %17 = arith.mulf %16, %16 : vector<32x32xf32>
    %cst_13 = arith.constant dense<0.000000e+00> : vector<32xf32>
    %18 = vector.multi_reduction <add>, %17, %cst_13 [1] : vector<32x32xf32> to vector<32xf32>
    %19 = vector.shape_cast %18 : vector<32xf32> to vector<32x1xf32>
    %cst_14 = arith.constant 3.100000e+01 : f32
    %20 = vector.broadcast %cst_14 : f32 to vector<32x1xf32>
    %21 = arith.divf %19, %20 : vector<32x1xf32>
    %22 = vector.broadcast %9 : vector<1x32xf32> to vector<32x32xf32>
    %23 = arith.mulf %22, %16 : vector<32x32xf32>
    %24 = math.sqrt %21 : vector<32x1xf32>
    %cst_15 = arith.constant 9.99999997E-7 : f32
    %25 = vector.broadcast %cst_15 : f32 to vector<32x1xf32>
    %26 = arith.addf %24, %25 : vector<32x1xf32>
    %27 = vector.broadcast %26 : vector<32x1xf32> to vector<32x32xf32>
    %28 = arith.divf %23, %27 : vector<32x32xf32>
    %29 = vector.broadcast %10 : vector<1x32xf32> to vector<32x32xf32>
    %30 = arith.addf %28, %29 : vector<32x32xf32>
    %31 = arith.truncf %30 : vector<32x32xf32> to vector<32x32xbf16>
    %c0_16 = arith.constant 0 : index
    %c0_17 = arith.constant 0 : index
    %32 = vector.load %arg7[%c0_16, %c0_17] : memref<32x64xbf16, #tpu.memory_space<vmem>>, vector<32x64xbf16>
    %cst_18 = arith.constant dense<0.000000e+00> : vector<32x64xf32>
    %33 = tpu.matmul %31, %32, %cst_18 {dimension_numbers = #tpu.dot_dimension_numbers<[1], [0], [0], [1], [0, 0, 1, 1], [], []>} : vector<32x32xbf16>, vector<32x64xbf16>, vector<32x64xf32> -> vector<32x64xf32>
    %c0_19 = arith.constant 0 : index
    %c0_20 = arith.constant 0 : index
    %34 = vector.load %arg8[%c0_19, %c0_20] : memref<1x64xf32, #tpu.memory_space<vmem>>, vector<1x64xf32>
    %35 = vector.broadcast %34 : vector<1x64xf32> to vector<32x64xf32>
    %36 = arith.addf %33, %35 : vector<32x64xf32>
    %cst_21 = arith.constant 0.000000e+00 : f32
    %37 = vector.broadcast %cst_21 : f32 to vector<32x64xf32>
    %38 = arith.maximumf %36, %37 : vector<32x64xf32>
    %39 = arith.truncf %38 : vector<32x64xf32> to vector<32x64xbf16>
    %c0_22 = arith.constant 0 : index
    %c0_23 = arith.constant 0 : index
    %40 = vector.load %arg9[%c0_22, %c0_23] : memref<64x32xbf16, #tpu.memory_space<vmem>>, vector<64x32xbf16>
    %cst_24 = arith.constant dense<0.000000e+00> : vector<32x32xf32>
    %41 = tpu.matmul %39, %40, %cst_24 {dimension_numbers = #tpu.dot_dimension_numbers<[1], [0], [0], [1], [0, 0, 1, 1], [], []>} : vector<32x64xbf16>, vector<64x32xbf16>, vector<32x32xf32> -> vector<32x32xf32>
    %c0_25 = arith.constant 0 : index
    %c0_26 = arith.constant 0 : index
    %42 = vector.load %arg10[%c0_25, %c0_26] : memref<1x32xf32, #tpu.memory_space<vmem>>, vector<1x32xf32>
    %43 = vector.broadcast %42 : vector<1x32xf32> to vector<32x32xf32>
    %44 = arith.addf %41, %43 : vector<32x32xf32>
    %45 = arith.addf %30, %44 : vector<32x32xf32>
    %c0_27 = arith.constant 0 : index
    %c0_28 = arith.constant 0 : index
    %46 = vector.load %arg11[%c0_27, %c0_28] : memref<1x32xf32, #tpu.memory_space<vmem>>, vector<1x32xf32>
    %c0_29 = arith.constant 0 : index
    %c0_30 = arith.constant 0 : index
    %47 = vector.load %arg12[%c0_29, %c0_30] : memref<1x32xf32, #tpu.memory_space<vmem>>, vector<1x32xf32>
    %cst_31 = arith.constant dense<0.000000e+00> : vector<32xf32>
    %48 = vector.multi_reduction <add>, %45, %cst_31 [1] : vector<32x32xf32> to vector<32xf32>
    %49 = vector.shape_cast %48 : vector<32xf32> to vector<32x1xf32>
    %cst_32 = arith.constant 3.200000e+01 : f32
    %50 = vector.broadcast %cst_32 : f32 to vector<32x1xf32>
    %51 = arith.divf %49, %50 : vector<32x1xf32>
    %52 = vector.broadcast %51 : vector<32x1xf32> to vector<32x32xf32>
    %53 = arith.subf %45, %52 : vector<32x32xf32>
    %54 = arith.mulf %53, %53 : vector<32x32xf32>
    %cst_33 = arith.constant dense<0.000000e+00> : vector<32xf32>
    %55 = vector.multi_reduction <add>, %54, %cst_33 [1] : vector<32x32xf32> to vector<32xf32>
    %56 = vector.shape_cast %55 : vector<32xf32> to vector<32x1xf32>
    %cst_34 = arith.constant 3.100000e+01 : f32
    %57 = vector.broadcast %cst_34 : f32 to vector<32x1xf32>
    %58 = arith.divf %56, %57 : vector<32x1xf32>
    %59 = vector.broadcast %46 : vector<1x32xf32> to vector<32x32xf32>
    %60 = arith.mulf %59, %53 : vector<32x32xf32>
    %61 = math.sqrt %58 : vector<32x1xf32>
    %cst_35 = arith.constant 9.99999997E-7 : f32
    %62 = vector.broadcast %cst_35 : f32 to vector<32x1xf32>
    %63 = arith.addf %61, %62 : vector<32x1xf32>
    %64 = vector.broadcast %63 : vector<32x1xf32> to vector<32x32xf32>
    %65 = arith.divf %60, %64 : vector<32x32xf32>
    %66 = vector.broadcast %47 : vector<1x32xf32> to vector<32x32xf32>
    %67 = arith.addf %65, %66 : vector<32x32xf32>
    %c0_36 = arith.constant 0 : index
    %c0_37 = arith.constant 0 : index
    %68 = vector.load %arg13[%c0_36, %c0_37] : memref<32x32xf32, #tpu.memory_space<vmem>>, vector<32x32xf32>
    tpu.vector_store %arg13[%c0_36, %c0_37], %67 {strides = array<i32>} : memref<32x32xf32, #tpu.memory_space<vmem>>, vector<32x32xf32>,
    return
  }
  func.func @transform_0(%arg0: i32) -> (i32, i32) {
    %c0_i32 = arith.constant 0 : i32
    %c0_i32_0 = arith.constant 0 : i32
    return %arg0, %c0_i32 : i32, i32
  }
  func.func @transform_1(%arg0: i32) -> (i32, i32) {
    %c0_i32 = arith.constant 0 : i32
    %c0_i32_0 = arith.constant 0 : i32
    return %arg0, %c0_i32 : i32, i32
  }
  func.func @transform_2(%arg0: i32) -> (i32, i32) {
    %c0_i32 = arith.constant 0 : i32
    %c0_i32_0 = arith.constant 0 : i32
    %c0_i32_1 = arith.constant 0 : i32
    return %c0_i32, %c0_i32_0 : i32, i32
  }
  func.func @transform_3(%arg0: i32) -> (i32, i32) {
    %c0_i32 = arith.constant 0 : i32
    %c0_i32_0 = arith.constant 0 : i32
    %c0_i32_1 = arith.constant 0 : i32
    return %c0_i32, %c0_i32_0 : i32, i32
  }
  func.func @transform_4(%arg0: i32) -> (i32, i32) {
    %c0_i32 = arith.constant 0 : i32
    %c0_i32_0 = arith.constant 0 : i32
    %c0_i32_1 = arith.constant 0 : i32
    return %c0_i32, %c0_i32_0 : i32, i32
  }
  func.func @transform_5(%arg0: i32) -> (i32, i32) {
    %c0_i32 = arith.constant 0 : i32
    %c0_i32_0 = arith.constant 0 : i32
    %c0_i32_1 = arith.constant 0 : i32
    return %c0_i32, %c0_i32_0 : i32, i32
  }
  func.func @transform_6(%arg0: i32) -> (i32, i32) {
    %c0_i32 = arith.constant 0 : i32
    %c0_i32_0 = arith.constant 0 : i32
    %c0_i32_1 = arith.constant 0 : i32
    return %c0_i32, %c0_i32_0 : i32, i32
  }
  func.func @transform_7(%arg0: i32) -> (i32, i32) {
    %c0_i32 = arith.constant 0 : i32
    %c0_i32_0 = arith.constant 0 : i32
    %c0_i32_1 = arith.constant 0 : i32
    return %c0_i32, %c0_i32_0 : i32, i32
  }
  func.func @transform_8(%arg0: i32) -> (i32, i32) {
    %c0_i32 = arith.constant 0 : i32
    %c0_i32_0 = arith.constant 0 : i32
    %c0_i32_1 = arith.constant 0 : i32
    return %c0_i32, %c0_i32_0 : i32, i32
  }
  func.func @transform_9(%arg0: i32) -> (i32, i32) {
    %c0_i32 = arith.constant 0 : i32
    %c0_i32_0 = arith.constant 0 : i32
    %c0_i32_1 = arith.constant 0 : i32
    return %c0_i32, %c0_i32_0 : i32, i32
  }
  func.func @transform_10(%arg0: i32) -> (i32, i32) {
    %c0_i32 = arith.constant 0 : i32
    %c0_i32_0 = arith.constant 0 : i32
    %c0_i32_1 = arith.constant 0 : i32
    return %c0_i32, %c0_i32_0 : i32, i32
  }
  func.func @transform_11(%arg0: i32) -> (i32, i32) {
    %c0_i32 = arith.constant 0 : i32
    %c0_i32_0 = arith.constant 0 : i32
    %c0_i32_1 = arith.constant 0 : i32
    return %c0_i32, %c0_i32_0 : i32, i32
  }
  func.func @transform_12(%arg0: i32) -> (i32, i32) {
    %c0_i32 = arith.constant 0 : i32
    %c0_i32_0 = arith.constant 0 : i32
    return %arg0, %c0_i32 : i32, i32
  }
}

</mosaic_0001>

<bundles_post_ra>
// kernel: trar_forward.7
= control target key start
LH: loop header
LB: loop body
LE: loop exit
PB: predicated region body
PF: predicated region fallthrough
CT: control target
= control target key end

     0   :  { %vm21_vm0 = vcmask 261120   ;;  %v150_v2 = vmov 16.0   ;;  %vm55_vm2 = vcmask 1041409   ;;  %vm86_vm3 = vcmask 130048   ;;  %s220_s1 = inlined_call_operand.vmem [shape: f32[32,16], index: 1, kind: input, shape index: {}]   ;;  %s221_s0 = inlined_call_operand.vmem [shape: f32[2,16,32], index: 0, kind: input, shape index: {}]   ;;  %s222_s3 = inlined_call_operand.vmem [shape: f32[1,2], index: 3, kind: input, shape index: {}]   ;;  %s223_s2 = inlined_call_operand.vmem [shape: f32[16,2], index: 2, kind: input, shape index: {}]   ;;  %s224_s4 = inlined_call_operand.vmem [shape: f32[2,2], index: 4, kind: output, shape index: {}]  }
   0x1   :  { %v52_v0 = vld [vmem:[%s220_s1 + $0x18] sm:$0xff]  ;;  %v51_v1 = vld [vmem:[%s220_s1 + $0x10] sm:$0xff]  ;;  %144 = vrcp.f32 %v150_v2  ;;  %v17_v3 = vld [vmem:[%s221_s0] sm:$0xff]  ;;  %vm110_vm4 = vcmask 9216  }
   0x2   :  { %71 = vmatpush.msra.mxu0 %v52_v0  ;;  %v18_v4 = vld [vmem:[%s221_s0 + $0x8] sm:$0xff]  ;;  %v19_v6 = vld [vmem:[%s221_s0 + $0x10] sm:$0xff]  ;;  %v20_v7 = vld [vmem:[%s221_s0 + $0x18] sm:$0xff]  ;;  %v22_v8 = vsel %vm21_vm0, %v17_v3, 0.0 }
   0x3   :  { %v50_v5 = vld [vmem:[%s220_s1 + $0x8] sm:$0xff]  ;;  %v23_v9 = vsel %vm21_vm0, %v18_v4, 0.0  ;;  %v31_v11 = vsel %vm21_vm0, %v19_v6, 0.0  ;;  %v32_v12 = vsel %vm21_vm0, %v20_v7, 0.0  ;;  %v49_v13 = vld [vmem:[%s220_s1] sm:$0xff] }
   0x4   :  { %72 = vmatpush.msra.mxu0 %v51_v1  ;;  %v24_v10 = vadd.f32 %v23_v9, %v22_v8  ;;  %v33_v14 = vadd.f32 %v32_v12, %v31_v11  ;;  %v81_v36 = vld [vmem:[%s223_s2 + $0x8] sm:$0xff]  ;;  %v80_v37 = vld [vmem:[%s223_s2] sm:$0xff] }
   0x5   :  { %104 = vmatpush.msra.mxu1 %v81_v36  ;;  %v143_v40 = vld [vmem:[%s222_s3] ss:$0 sm:$0xff] }
   0x6   :  { %73 = vmatpush.msra.mxu0 %v50_v5  ;;  %v25_v15 = vrot.slane %v24_v10, 4  ;;  %v34_v17 = vrot.slane %v33_v14, 4 }
   0x7   :  { %v145_v16 = vpop.eup %144  ;;  %105 = vmatpush.msra.mxu1 %v80_v37 }
   0x8   :  { %74 = vmatpush.msra.mxu0 %v49_v13  ;;  %v26_v18 = vadd.f32 %v25_v15, %v24_v10  ;;  %v41_v19 = vmul.f32 16.0, %v145_v16  ;;  %v35_v20 = vadd.f32 %v34_v17, %v33_v14  ;;  %vm45_vm1 = vweird.f32 %v145_v16 }
   0xa   :  { %v27_v21 = vrot.slane %v26_v18, 2  ;;  %v42_v22 = vsub.f32 1.0, %v41_v19  ;;  %v36_v23 = vrot.slane %v35_v20, 2 }
   0xc   :  { %v28_v24 = vadd.f32 %v27_v21, %v26_v18  ;;  %v43_v25 = vmul.f32 %v145_v16, %v42_v22  ;;  %v37_v26 = vadd.f32 %v36_v23, %v35_v20 }
   0xe   :  { %v29_v27 = vrot.slane %v28_v24, 1  ;;  %v44_v28 = vadd.f32 %v145_v16, %v43_v25  ;;  %v38_v29 = vrot.slane %v37_v26, 1 }
  0x10   :  { %v30_v30 = vadd.f32 %v29_v27, %v28_v24  ;;  %v46_v31 = vsel %vm45_vm1, %v145_v16, %v44_v28  ;;  %v39_v32 = vadd.f32 %v38_v29, %v37_v26 }
  0x12   :  { %v47_v33 = vmul.f32 %v46_v31, %v30_v30  ;;  %v48_v34 = vmul.f32 %v46_v31, %v39_v32 }
  0x14   :  { %v56_v35 = vsel %vm55_vm2, %v48_v34, %v47_v33 }
  0x15   :  { %140 = vmatmul.msk.f32.vlgmr.msra.gmra.mxu0 %vm21_vm0, %v56_v35 }
  0x92   :  { %v76_v38 = vpop.f32.mrf.mxu0 }
  0x93   :  { %v79_v39 = vmax.f32 %v76_v38, 0.0 }
  0x95   :  { %141 = vmatmul.msk.f32.vlgmr.msra.gmra.mxu1 %vm86_vm3, %v79_v39 }
 0x112   :  { %v107_v41 = vpop.f32.mrf.mxu1 }
 0x113   :  { %v108_v42 = vadd.f32 %v143_v40, %v107_v41 }
 0x115   :  { %v111_v43 = vsel %vm110_vm4, %v108_v42, -inf }
 0x116   :  { %112 = vmax.xlane.f32.xlu0 %v111_v43 }
 0x189   :  { %v113_v44 = vpop.xlane.xlu0 %112 }
 0x18a   :  { %v114_v45 = vsub.f32 %v108_v42, %v113_v44 }
 0x18c   :  { %v115_v46 = vmul.f32 1.442695, %v114_v45 }
 0x18e   :  { %146 = vpow2.f32 %v115_v46 }
 0x194   :  { %v147_v47 = vpop.eup %146 }
 0x195   :  { %v117_v48 = vsel %vm110_vm4, %v147_v47, 0.0 }
 0x196   :  { %118 = vadd.xlane.f32.xlu0 %v117_v48 }
 0x209   :  { %v119_v49 = vpop.xlane.xlu0 %118 }
 0x20a   :  { %148 = vrcp.f32 %v119_v49  ;;  %v131_v53 = vand.u32 2147483648, %v119_v49  ;;  %v129_v55 = vand.u32 2147483647, %v119_v49  ;;  %vm125_vm6 = vweird.f32 %v119_v49 }
 0x20c   :  { %v132_v57 = vor.u32 1.1754944e-38, %v131_v53  ;;  %vm130_vm8 = vcmp.eq.f32.partialorder %v129_v55, 8.507059e+37 }
 0x210   :  { %v149_v50 = vpop.eup %148 }
 0x211   :  { %v121_v51 = vmul.f32 %v149_v50, %v119_v49  ;;  %vm126_vm5 = vweird.f32 %v149_v50 }
 0x212   :  { %vm127_vm7 = vmor %vm125_vm6, %vm126_vm5 }
 0x213   :  { %v122_v52 = vsub.f32 1.0, %v121_v51 }
 0x215   :  { %v123_v54 = vmul.f32 %v149_v50, %v122_v52 }
 0x217   :  { %v124_v56 = vadd.f32 %v149_v50, %v123_v54 }
 0x219   :  { %v128_v58 = vsel %vm127_vm7, %v149_v50, %v124_v56 }
 0x21a   :  { %v133_v59 = vsel %vm130_vm8, %v132_v57, %v128_v58 }
 0x21b   :  { %v134_v60 = vmul.f32 %v147_v47, %v133_v59 }
 0x21d   :  { %135 = vst.msk [vmem:[%s224_s4] sm:$0x3] %vm110_vm4, %v134_v60 }

// kernel: trar_forward.8
= control target key start
LH: loop header
LB: loop body
LE: loop exit
PB: predicated region body
PF: predicated region fallthrough
CT: control target
= control target key end

     0   :  { %vm41_vm0 = vcmask 261120   ;;  %vm67_vm1 = vcmask 785408   ;;  %s144_s1 = inlined_call_operand.vmem [shape: bf16[32,96], index: 1, kind: input, shape index: {}]   ;;  %s145_s0 = inlined_call_operand.vmem [shape: f32[32,32], index: 0, kind: input, shape index: {}]   ;;  %s146_s2 = inlined_call_operand.vmem [shape: f32[1,96], index: 2, kind: input, shape index: {}]   ;;  %s147_s3 = inlined_call_operand.vmem [shape: f32[32,96], index: 3, kind: output, shape index: {}]  }
   0x1   :  { %v87_v0 = vld [vmem:[%s144_s1 + $0x8] sm:$0xff]  ;;  %v86_v1 = vld [vmem:[%s144_s1] sm:$0xff]  ;;  %v17_v4 = vld [vmem:[%s145_s0 + $0x10] sm:$0xff] }
   0x2   :  { %v15_v2 = vld [vmem:[%s145_s0] sm:$0xff]  ;;  %v16_v3 = vld [vmem:[%s145_s0 + $0x8] sm:$0xff]  ;;  %54 = vmatpush.bf16.msra.mxu0 %v87_v0  ;;  %88 = vmatpush.bf16.msra.mxu1 %v87_v0  ;;  %v18_v5 = vld [vmem:[%s145_s0 + $0x18] sm:$0xff] }
   0x3   :  { %v19_v6 = vpack.c.bf16 %v16_v3, %v15_v2  ;;  %v20_v7 = vpack.c.bf16 %v18_v5, %v17_v4  ;;  %v90_v8 = vld [vmem:[%s146_s2] ss:$0 sm:$0xff] }
   0x6   :  { %55 = vmatpush.bf16.msra.mxu0 %v86_v1  ;;  %89 = vmatpush.bf16.msra.mxu1 %v86_v1 }
   0x9   :  { %84 = vmatmul.msk.bf16.vlgmr.msra.gmra.mxu0 %vm41_vm0, %v19_v6  ;;  %85 = vmatmul.msk.bf16.vlgmr.msra.gmra.mxu1 %vm41_vm0, %v20_v7 }
  0x86   :  { %v57_v9 = vpop.f32.mrf.mxu0  ;;  %v62_v10 = vpop.f32.mrf.mxu1 }
  0x87   :  { %v58_v11 = vadd.f32 %v90_v8, %v57_v9  ;;  %v63_v12 = vadd.f32 %v90_v8, %v62_v10 }
  0x89   :  { %68 = vst.msk [vmem:[%s147_s3] sm:$0xff] %vm67_vm1, %v58_v11 }
  0x8a   :  { %70 = vst.msk [vmem:[%s147_s3 + $0x10] sm:$0xff] %vm67_vm1, %v63_v12 }
  0x8e   :  { %v59_v13 = vpop.f32.mrf.mxu0  ;;  %v64_v14 = vpop.f32.mrf.mxu1 }
  0x8f   :  { %v60_v15 = vadd.f32 %v90_v8, %v59_v13  ;;  %v65_v16 = vadd.f32 %v90_v8, %v64_v14 }
  0x91   :  { %69 = vst.msk [vmem:[%s147_s3 + $0x8] sm:$0xff] %vm67_vm1, %v60_v15 }
  0x92   :  { %71 = vst.msk [vmem:[%s147_s3 + $0x18] sm:$0xff] %vm67_vm1, %v65_v16 }

// kernel: trar_forward.10
= control target key start
LH: loop header
LB: loop body
LE: loop exit
PB: predicated region body
PF: predicated region fallthrough
CT: control target
= control target key end

     0   :  { %vm58_vm0 = vcmask 261120   ;;  %v391_v29 = vmov 32.0   ;;  %v392_v56 = vmov 31.0   ;;  %s575_s2 = inlined_call_operand.vmem [shape: bf16[32,32], index: 2, kind: input, shape index: {}]   ;;  %s576_s0 = inlined_call_operand.vmem [shape: f32[32,32], index: 0, kind: input, shape index: {}]   ;;  %s577_s3 = inlined_call_operand.vmem [shape: f32[1,32], index: 3, kind: input, shape index: {}]   ;;  %s578_s4 = inlined_call_operand.vmem [shape: f32[1,32], index: 4, kind: input, shape index: {}]   ;;  %s579_s1 = inlined_call_operand.vmem [shape: f32[32,32], index: 1, kind: input, shape index: {}]   ;;  %s580_s5 = inlined_call_operand.vmem [shape: f32[1,32], index: 5, kind: input, shape index: {}]   ;;  %s581_s7 = inlined_call_operand.vmem [shape: f32[1,32], index: 7, kind: input, shape index: {}]   ;;  %s582_s6 = inlined_call_operand.vmem [shape: bf16[32,32], index: 6, kind: input, shape index: {}]   ;;  %s583_s8 = inlined_call_operand.vmem [shape: f32[32,32], index: 8, kind: output, shape index: {0}]   ;;  %s584_s9 = inlined_call_operand.vmem [shape: f32[32,32], index: 9, kind: output, shape index: {1}]  }
   0x1   :  { %v358_v0 = vld [vmem:[%s575_s2 + $0x8] sm:$0xff]  ;;  %v357_v1 = vld [vmem:[%s575_s2] sm:$0xff]  ;;  %v34_v4 = vld [vmem:[%s576_s0 + $0x10] sm:$0xff]  ;;  %371 = vrcp.f32 %v391_v29 }
   0x2   :  { %v32_v2 = vld [vmem:[%s576_s0] sm:$0xff]  ;;  %v33_v3 = vld [vmem:[%s576_s0 + $0x8] sm:$0xff]  ;;  %71 = vmatpush.bf16.msra.mxu0 %v358_v0  ;;  %361 = vmatpush.bf16.msra.mxu2 %v358_v0  ;;  %v35_v5 = vld [vmem:[%s576_s0 + $0x18] sm:$0xff]  ;;  %373 = vrcp.f32 %v392_v56 }
   0x3   :  { %v36_v6 = vpack.c.bf16 %v33_v3, %v32_v2  ;;  %v37_v7 = vpack.c.bf16 %v35_v5, %v34_v4  ;;  %v367_v8 = vld [vmem:[%s577_s3] ss:$0 sm:$0xff]  ;;  %v86_v15 = vld [vmem:[%s579_s1 + $0x10] sm:$0xff]  ;;  %v85_v18 = vld [vmem:[%s579_s1 + $0x8] sm:$0xff] }
   0x4   :  { %v84_v10 = vld [vmem:[%s579_s1] sm:$0xff]  ;;  %v87_v25 = vld [vmem:[%s579_s1 + $0x18] sm:$0xff] }
   0x5   :  { %v359_v3 = vld [vmem:[%s582_s6] sm:$0xff] }
   0x6   :  { %72 = vmatpush.bf16.msra.mxu0 %v357_v1  ;;  %362 = vmatpush.bf16.msra.mxu2 %v357_v1  ;;  %v360_v1 = vld [vmem:[%s582_s6 + $0x8] sm:$0xff] }
   0x7   :  { %v372_v30 = vpop.eup %371  ;;  %312 = vmatpush.bf16.msra.mxu1 %v360_v1  ;;  %363 = vmatpush.bf16.msra.mxu3 %v360_v1 }
   0x8   :  { %v107_v31 = vmul.f32 32.0, %v372_v30  ;;  %vm111_vm1 = vweird.f32 %v372_v30  ;;  %v374_v57 = vpop.eup %373 }
   0x9   :  { %345 = vmatmul.msk.bf16.vlgmr.msra.gmra.mxu0 %vm58_vm0, %v36_v6  ;;  %346 = vmatmul.msk.bf16.vlgmr.msra.gmra.mxu2 %vm58_vm0, %v37_v7  ;;  %v138_v58 = vmul.f32 31.0, %v374_v57  ;;  %vm142_vm2 = vweird.f32 %v374_v57 }
   0xa   :  { %v108_v32 = vsub.f32 1.0, %v107_v31 }
   0xb   :  { %v139_v59 = vsub.f32 1.0, %v138_v58  ;;  %313 = vmatpush.bf16.msra.mxu1 %v359_v3  ;;  %364 = vmatpush.bf16.msra.mxu3 %v359_v3 }
   0xc   :  { %v109_v33 = vmul.f32 %v372_v30, %v108_v32 }
   0xd   :  { %v140_v60 = vmul.f32 %v374_v57, %v139_v59  ;;  %v514_v59 = vld [vmem:[%s578_s4] ss:$0 sm:$0xff] }
   0xe   :  { %v110_v34 = vadd.f32 %v372_v30, %v109_v33 }
   0xf   :  { %v141_v61 = vadd.f32 %v374_v57, %v140_v60 }
  0x10   :  { %v112_v35 = vsel %vm111_vm1, %v372_v30, %v110_v34 }
  0x11   :  { %v143_v62 = vsel %vm142_vm2, %v374_v57, %v141_v61 }
  0x86   :  { %v74_v9 = vpop.f32.mrf.mxu0 }
  0x87   :  { %v75_v11 = vadd.f32 %v367_v8, %v74_v9 }
  0x89   :  { %v88_v12 = vadd.f32 %v84_v10, %v75_v11 }
  0x8b   :  { %v94_v13 = vsel %vm58_vm0, %v88_v12, 0.0 }
  0x8c   :  { %v79_v14 = vpop.f32.mrf.mxu2  ;;  %95 = vadd.xlane.f32.xlu1 %v94_v13 }
  0x8d   :  { %v80_v16 = vadd.f32 %v367_v8, %v79_v14 }
  0x8e   :  { %v76_v17 = vpop.f32.mrf.mxu0 }
  0x8f   :  { %v77_v19 = vadd.f32 %v367_v8, %v76_v17  ;;  %v90_v20 = vadd.f32 %v86_v15, %v80_v16 }
  0x91   :  { %v100_v21 = vsel %vm58_vm0, %v90_v20, 0.0  ;;  %v89_v22 = vadd.f32 %v85_v18, %v77_v19 }
  0x92   :  { %101 = vadd.xlane.f32.xlu0 %v100_v21 }
  0x93   :  { %v97_v23 = vsel %vm58_vm0, %v89_v22, 0.0 }
  0x94   :  { %v81_v24 = vpop.f32.mrf.mxu2  ;;  %98 = vadd.xlane.f32.xlu1 %v97_v23 }
  0x95   :  { %v82_v26 = vadd.f32 %v367_v8, %v81_v24 }
  0x97   :  { %v91_v27 = vadd.f32 %v87_v25, %v82_v26 }
  0x99   :  { %v103_v28 = vsel %vm58_vm0, %v91_v27, 0.0 }
  0x9a   :  { %104 = vadd.xlane.f32.xlu0 %v103_v28 }
  0xff   :  { %v96_v36 = vpop.xlane.xlu1 %95 }
 0x100   :  { %v113_v37 = vmul.f32 %v112_v35, %v96_v36 }
 0x102   :  { %v482_v38 = vsub.f32 %v88_v12, %v113_v37 }
 0x104   :  { %v121_v39 = vmul.f32 %v482_v38, %v482_v38 }
 0x105   :  { %v102_v40 = vpop.xlane.xlu0 %101 }
 0x106   :  { %v115_v41 = vmul.f32 %v112_v35, %v102_v40  ;;  %v125_v42 = vsel %vm58_vm0, %v121_v39, 0.0 }
 0x107   :  { %126 = vadd.xlane.f32.xlu0 %v125_v42  ;;  %v99_v43 = vpop.xlane.xlu1 %98 }
 0x108   :  { %v487_v44 = vsub.f32 %v90_v20, %v115_v41  ;;  %v114_v45 = vmul.f32 %v112_v35, %v99_v43 }
 0x10a   :  { %v489_v46 = vsub.f32 %v89_v22, %v114_v45  ;;  %v123_v47 = vmul.f32 %v487_v44, %v487_v44 }
 0x10c   :  { %v131_v48 = vsel %vm58_vm0, %v123_v47, 0.0  ;;  %v122_v49 = vmul.f32 %v489_v46, %v489_v46 }
 0x10d   :  { %132 = vadd.xlane.f32.xlu2 %v131_v48  ;;  %v105_v50 = vpop.xlane.xlu0 %104 }
 0x10e   :  { %v116_v51 = vmul.f32 %v112_v35, %v105_v50  ;;  %v128_v52 = vsel %vm58_vm0, %v122_v49, 0.0 }
 0x10f   :  { %129 = vadd.xlane.f32.xlu1 %v128_v52 }
 0x110   :  { %v497_v53 = vsub.f32 %v91_v27, %v116_v51 }
 0x112   :  { %v124_v54 = vmul.f32 %v497_v53, %v497_v53 }
 0x114   :  { %v134_v55 = vsel %vm58_vm0, %v124_v54, 0.0 }
 0x115   :  { %135 = vadd.xlane.f32.xlu2 %v134_v55 }
 0x17a   :  { %v127_v63 = vpop.xlane.xlu0 %126 }
 0x17b   :  { %v144_v0 = vmul.f32 %v143_v62, %v127_v63 }
 0x17d   :  { %375 = vrsqrt.f32 %v144_v0  ;;  %vm162_vm3 = vcmp.eq.f32.partialorder %v144_v0, inf  ;;  %v165_v22 = vand.u32 2147483648, %v144_v0  ;;  %vm164_vm4 = vcmp.eq.f32.partialorder %v144_v0, 0.0 }
 0x180   :  { %v133_v2 = vpop.xlane.xlu2 %132 }
 0x181   :  { %v146_v4 = vmul.f32 %v143_v62, %v133_v2 }
 0x182   :  { %v130_v5 = vpop.xlane.xlu1 %129 }
 0x183   :  { %v376_v6 = vpop.eup %375  ;;  %377 = vrsqrt.f32 %v146_v4  ;;  %v145_v8 = vmul.f32 %v143_v62, %v130_v5  ;;  %vm186_vm5 = vcmp.eq.f32.partialorder %v146_v4, inf  ;;  %v189_v35 = vand.u32 2147483648, %v146_v4 }
 0x184   :  { %v156_v7 = vmul.f32 %v376_v6, %v144_v0  ;;  %vm188_vm6 = vcmp.eq.f32.partialorder %v146_v4, 0.0  ;;  %v151_v5 = vmul.f32 %v514_v59, %v482_v38 }
 0x185   :  { %379 = vrsqrt.f32 %v145_v8  ;;  %vm174_vm7 = vcmp.eq.f32.partialorder %v145_v8, inf  ;;  %v177_v42 = vand.u32 2147483648, %v145_v8  ;;  %vm176_vm8 = vcmp.eq.f32.partialorder %v145_v8, 0.0 }
 0x186   :  { %v157_v9 = vmul.f32 %v376_v6, %v156_v7  ;;  %v369_v7 = vld [vmem:[%s580_s5] ss:$0 sm:$0xff] }
 0x188   :  { %v158_v10 = vmul.f32 0.5, %v157_v9  ;;  %v136_v11 = vpop.xlane.xlu2 %135 }
 0x189   :  { %v378_v12 = vpop.eup %377  ;;  %v147_v13 = vmul.f32 %v143_v62, %v136_v11 }
 0x18a   :  { %v159_v14 = vsub.f32 1.5, %v158_v10  ;;  %v180_v15 = vmul.f32 %v378_v12, %v146_v4 }
 0x18b   :  { %381 = vrsqrt.f32 %v147_v13  ;;  %v380_v16 = vpop.eup %379  ;;  %vm198_vm9 = vcmp.eq.f32.partialorder %v147_v13, inf  ;;  %v201_v55 = vand.u32 2147483648, %v147_v13  ;;  %vm200_vm10 = vcmp.eq.f32.partialorder %v147_v13, 0.0 }
 0x18c   :  { %v160_v17 = vmul.f32 %v376_v6, %v159_v14  ;;  %v181_v18 = vmul.f32 %v378_v12, %v180_v15  ;;  %v168_v19 = vmul.f32 %v380_v16, %v145_v8 }
 0x18e   :  { %v161_v20 = vmul.f32 %v160_v17, %v144_v0  ;;  %v182_v21 = vmul.f32 0.5, %v181_v18  ;;  %v169_v23 = vmul.f32 %v380_v16, %v168_v19 }
 0x190   :  { %v163_v24 = vsel %vm162_vm3, %v144_v0, %v161_v20  ;;  %v183_v25 = vsub.f32 1.5, %v182_v21  ;;  %v170_v27 = vmul.f32 0.5, %v169_v23 }
 0x191   :  { %v382_v26 = vpop.eup %381  ;;  %v166_v28 = vsel %vm164_vm4, %v165_v22, %v163_v24  ;;  %v153_v22 = vmul.f32 %v514_v59, %v487_v44 }
 0x192   :  { %v184_v29 = vmul.f32 %v378_v12, %v183_v25  ;;  %v192_v30 = vmul.f32 %v382_v26, %v147_v13  ;;  %v203_v31 = vadd.f32 1e-06, %v166_v28  ;;  %v171_v32 = vsub.f32 1.5, %v170_v27 }
 0x193   :  { %v152_v27 = vmul.f32 %v514_v59, %v489_v46 }
 0x194   :  { %v185_v33 = vmul.f32 %v184_v29, %v146_v4  ;;  %v193_v34 = vmul.f32 %v382_v26, %v192_v30  ;;  %383 = vrcp.f32 %v203_v31  ;;  %v172_v36 = vmul.f32 %v380_v16, %v171_v32 }
 0x195   :  { %v218_v58 = vand.u32 2147483648, %v203_v31  ;;  %v216_v61 = vand.u32 2147483647, %v203_v31  ;;  %vm212_vm12 = vweird.f32 %v203_v31 }
 0x196   :  { %v187_v37 = vsel %vm186_vm5, %v146_v4, %v185_v33  ;;  %v194_v39 = vmul.f32 0.5, %v193_v34  ;;  %v173_v40 = vmul.f32 %v172_v36, %v145_v8 }
 0x197   :  { %v190_v41 = vsel %vm188_vm6, %v189_v35, %v187_v37  ;;  %v219_v3 = vor.u32 1.1754944e-38, %v218_v58  ;;  %vm217_vm14 = vcmp.eq.f32.partialorder %v216_v61, 8.507059e+37 }
 0x198   :  { %v195_v43 = vsub.f32 1.5, %v194_v39  ;;  %v205_v45 = vadd.f32 1e-06, %v190_v41  ;;  %v175_v47 = vsel %vm174_vm7, %v145_v8, %v173_v40  ;;  %v154_v40 = vmul.f32 %v514_v59, %v497_v53  ;;  %v370_v53 = vld [vmem:[%s581_s7] ss:$0 sm:$0xff] }
 0x199   :  { %v178_v50 = vsel %vm176_vm8, %v177_v42, %v175_v47 }
 0x19a   :  { %v384_v48 = vpop.eup %383  ;;  %v196_v49 = vmul.f32 %v382_v26, %v195_v43  ;;  %385 = vrcp.f32 %v205_v45  ;;  %v508_v51 = vadd.f32 1e-06, %v178_v50  ;;  %v248_v11 = vand.u32 2147483648, %v205_v45 }
 0x19b   :  { %v208_v52 = vmul.f32 %v384_v48, %v203_v31  ;;  %vm213_vm11 = vweird.f32 %v384_v48  ;;  %v246_v14 = vand.u32 2147483647, %v205_v45  ;;  %vm242_vm1 = vweird.f32 %v205_v45 }
 0x19c   :  { %v197_v54 = vmul.f32 %v196_v49, %v147_v13  ;;  %387 = vrcp.f32 %v508_v51  ;;  %vm214_vm13 = vmor %vm212_vm12, %vm213_vm11  ;;  %v233_v16 = vand.u32 2147483648, %v508_v51  ;;  %v231_v20 = vand.u32 2147483647, %v508_v51 }
 0x19d   :  { %v209_v56 = vsub.f32 1.0, %v208_v52  ;;  %v249_v21 = vor.u32 1.1754944e-38, %v248_v11  ;;  %vm247_vm4 = vcmp.eq.f32.partialorder %v246_v14, 8.507059e+37  ;;  %vm227_vm5 = vweird.f32 %v508_v51 }
 0x19e   :  { %v199_v57 = vsel %vm198_vm9, %v147_v13, %v197_v54  ;;  %v234_v28 = vor.u32 1.1754944e-38, %v233_v16  ;;  %vm232_vm7 = vcmp.eq.f32.partialorder %v231_v20, 8.507059e+37 }
 0x19f   :  { %v210_v60 = vmul.f32 %v384_v48, %v209_v56  ;;  %v202_v62 = vsel %vm200_vm10, %v201_v55, %v199_v57 }
 0x1a0   :  { %v386_v63 = vpop.eup %385  ;;  %v516_v0 = vadd.f32 1e-06, %v202_v62 }
 0x1a1   :  { %v211_v1 = vadd.f32 %v384_v48, %v210_v60  ;;  %v238_v2 = vmul.f32 %v386_v63, %v205_v45  ;;  %vm243_vm15 = vweird.f32 %v386_v63 }
 0x1a2   :  { %389 = vrcp.f32 %v516_v0  ;;  %v388_v4 = vpop.eup %387  ;;  %vm244_vm3 = vmor %vm242_vm1, %vm243_vm15  ;;  %v261_v31 = vand.u32 2147483647, %v516_v0  ;;  %v263_v32 = vand.u32 2147483648, %v516_v0  ;;  %vm257_vm9 = vweird.f32 %v516_v0 }
 0x1a3   :  { %v215_v6 = vsel %vm214_vm13, %v384_v48, %v211_v1  ;;  %v239_v8 = vsub.f32 1.0, %v238_v2  ;;  %v223_v10 = vmul.f32 %v388_v4, %v508_v51  ;;  %vm228_vm2 = vweird.f32 %v388_v4 }
 0x1a4   :  { %v220_v9 = vsel %vm217_vm14, %v219_v3, %v215_v6  ;;  %vm229_vm6 = vmor %vm227_vm5, %vm228_vm2  ;;  %v264_v39 = vor.u32 1.1754944e-38, %v263_v32  ;;  %vm262_vm11 = vcmp.eq.f32.partialorder %v261_v31, 8.507059e+37 }
 0x1a5   :  { %v221_v12 = vmul.f32 %v220_v9, %v151_v5  ;;  %v240_v13 = vmul.f32 %v386_v63, %v239_v8  ;;  %v224_v15 = vsub.f32 1.0, %v223_v10 }
 0x1a7   :  { %v270_v17 = vadd.f32 %v369_v7, %v221_v12  ;;  %v241_v38 = vadd.f32 %v386_v63, %v240_v13  ;;  %v225_v19 = vmul.f32 %v388_v4, %v224_v15 }
 0x1a8   :  { %v390_v18 = vpop.eup %389 }
 0x1a9   :  { %274 = vst.msk [vmem:[%s583_s8] sm:$0xff] %vm58_vm0, %v270_v17  ;;  %v245_v23 = vsel %vm244_vm3, %v386_v63, %v241_v38  ;;  %v253_v24 = vmul.f32 %v390_v18, %v516_v0  ;;  %v226_v25 = vadd.f32 %v388_v4, %v225_v19  ;;  %vm258_vm8 = vweird.f32 %v390_v18 }
 0x1aa   :  { %v250_v26 = vsel %vm247_vm4, %v249_v21, %v245_v23  ;;  %vm259_vm10 = vmor %vm257_vm9, %vm258_vm8 }
 0x1ab   :  { %v251_v29 = vmul.f32 %v250_v26, %v153_v22  ;;  %v254_v44 = vsub.f32 1.0, %v253_v24  ;;  %v230_v30 = vsel %vm229_vm6, %v388_v4, %v226_v25 }
 0x1ac   :  { %v235_v33 = vsel %vm232_vm7, %v234_v28, %v230_v30 }
 0x1ad   :  { %v255_v34 = vmul.f32 %v390_v18, %v254_v44  ;;  %v272_v35 = vadd.f32 %v369_v7, %v251_v29  ;;  %v236_v36 = vmul.f32 %v235_v33, %v152_v27 }
 0x1af   :  { %v256_v37 = vadd.f32 %v390_v18, %v255_v34  ;;  %276 = vst.msk [vmem:[%s583_s8 + $0x10] sm:$0xff] %vm58_vm0, %v272_v35  ;;  %v271_v46 = vadd.f32 %v369_v7, %v236_v36 }
 0x1b1   :  { %v260_v41 = vsel %vm259_vm10, %v390_v18, %v256_v37  ;;  %275 = vst.msk [vmem:[%s583_s8 + $0x8] sm:$0xff] %vm58_vm0, %v271_v46  ;;  %v278_v42 = vpack.c.bf16 %v271_v46, %v270_v17 }
 0x1b2   :  { %v265_v43 = vsel %vm262_vm11, %v264_v39, %v260_v41 }
 0x1b3   :  { %v266_v45 = vmul.f32 %v265_v43, %v154_v40  ;;  %355 = vmatmul.msk.bf16.vlgmr.msra.gmra.mxu1 %vm58_vm0, %v278_v42 }
 0x1b5   :  { %v273_v47 = vadd.f32 %v369_v7, %v266_v45 }
 0x1b7   :  { %277 = vst.msk [vmem:[%s583_s8 + $0x18] sm:$0xff] %vm58_vm0, %v273_v47  ;;  %v279_v48 = vpack.c.bf16 %v273_v47, %v272_v35 }
 0x1b9   :  { %356 = vmatmul.msk.bf16.vlgmr.msra.gmra.mxu3 %vm58_vm0, %v279_v48 }
 0x230   :  { %v315_v49 = vpop.f32.mrf.mxu1 }
 0x231   :  { %v316_v50 = vadd.f32 %v370_v53, %v315_v49 }
 0x233   :  { %325 = vst.msk [vmem:[%s584_s9] sm:$0xff] %vm58_vm0, %v316_v50 }
 0x238   :  { %v317_v51 = vpop.f32.mrf.mxu1 }
 0x239   :  { %v318_v52 = vadd.f32 %v370_v53, %v317_v51 }
 0x23b   :  { %326 = vst.msk [vmem:[%s584_s9 + $0x8] sm:$0xff] %vm58_vm0, %v318_v52 }
 0x23c   :  { %v320_v54 = vpop.f32.mrf.mxu3 }
 0x23d   :  { %v321_v55 = vadd.f32 %v370_v53, %v320_v54 }
 0x23f   :  { %327 = vst.msk [vmem:[%s584_s9 + $0x10] sm:$0xff] %vm58_vm0, %v321_v55 }
 0x244   :  { %v322_v56 = vpop.f32.mrf.mxu3 }
 0x245   :  { %v323_v57 = vadd.f32 %v370_v53, %v322_v56 }
 0x247   :  { %328 = vst.msk [vmem:[%s584_s9 + $0x18] sm:$0xff] %vm58_vm0, %v323_v57 }

// kernel: trar_forward.9
= control target key start
LH: loop header
LB: loop body
LE: loop exit
PB: predicated region body
PF: predicated region fallthrough
CT: control target
= control target key end

     0   :  { %8 = vsyncpa [#allocation3], 0  ;;  %s880_s12 = smov 0   ;;  %s1045_s0 = inlined_call_operand.vmem [shape: f32[2,2], index: 0, kind: input, shape index: {}]   ;;  %s1046_s1 = inlined_call_operand.vmem [shape: f32[2,16,96], index: 1, kind: input, shape index: {}]   ;;  %s1047_s2 = inlined_call_operand.vmem [shape: f32[2,2,16,16], index: 2, kind: input, shape index: {}]   ;;  %s1048_s3 = inlined_call_operand.vmem [shape: f32[2,16,32], index: 3, kind: output, shape index: {}]  }
   0x1 LB: > { %s886_s13 = sadd.s32 4294967295, %s842_s12   ;;  %p708_p0 = scmp.ge.s32.totalorder %s842_s12, 1  ;;  %s842_s12 = sphi %s880_s12, %s14_s12  }
   0x2   : > { %p118_p1 = scmp.lt.s32.totalorder %s842_s12, 3  ;;  %s130_s16 = sshll.u32 %s1045_s0, 4  ;;  %s131_s16 = int_to_ptr.vmem [resolvable:$true] %s130_s16 }
   0x3   : > { %p743_p3 = scmp.eq.s32.totalorder %s886_s13, 0  ;;  %s844_s17 = smov [#allocation2]  }
   0x4   : > { %p119_p2 = pnand %p708_p0, %p118_p1 }
   0x6   : > { %p739_p4 = pneg %p119_p2  ;;  %159 = sbr.rel (%p119_p2) target bundleno = 1247 (0x4df), region = 32 }
   0x8   : > { %p740_p5 = pnand %p743_p3, %p739_p4 }
   0xa   : > { %742 = dma.vmem_to_smem (!%p740_p5), %s131_s16, 32, %s844_s17, [#allocation3]  }
   0xb   : > { %837 = dma.done.wait (%p743_p3), [#allocation3], 32  }
   0xc   : > { %839 = vsyncadd (%p743_p3), [#allocation3], 4294967264 }
   0xd   : > { %166 = sfence }
   0xe   : > { %p190_p6 = scmp.lt.s32.totalorder %s886_s13, 1  ;;  %s845_s23 = smov 96   ;;  %vm229_vm0 = vcmask 64512   ;;  %vm252_vm1 = vcmask 130048   ;;  %v851_v20 = vmov 1.0   ;;  %vm621_vm6 = vcmask 195584  }
   0xf   : > { %s846_s24 = smov 88   ;;  %s847_s25 = smov 64   ;;  %vm624_vm7 = vcmask 261120  }
  0x10   : > { %s896_s18 = scalar_select %p190_p6, %s886_s13, 1 }
  0x11   : > { %s848_s26 = smov 80   ;;  %s849_s27 = smov 120  }
  0x12   : > { %s732_s19 = sshll.u32 %s896_s18, 4  ;;  %s850_s28 = smov 112  }
  0x13   : > { %s194_s22 = scalar_lea.vmem %s1046_s1, %s732_s19  ;;  %s733_s29 = sshll.u32 %s896_s18, 5 }
  0x14   : > { %v206_v0 = vld [vmem:[%s194_s22] sm:$0xff]  ;;  %v207_v1 = vld [vmem:[%s194_s22 + $0x8] sm:$0xff]  ;;  %s199_s5 = scalar_lea.vmem %s1047_s2, %s733_s29  ;;  %s852_s6 = smov 104  }
  0x15   : > { %v904_v2 = vpack.c.bf16 %v207_v1, %v206_v0  ;;  %v719_v16 = vld [vmem:[%s199_s5 + $0x10] sm:$0xff]  ;;  %v208_v17 = vld [vmem:[%s199_s5] sm:$0xff]  ;;  %v720_v25 = vld [vmem:[%s199_s5 + $0x18] sm:$0xff]  ;;  %s853_s7 = smov 72   ;;  %s721_s8 = sshll.u32 %s886_s13, 7 }
  0x16   : > { %vm217_vm2 = vcmp.gt.f32.partialorder %v719_v16, 0.5  ;;  %vm210_vm3 = vcmp.gt.f32.partialorder %v208_v17, 0.5  ;;  %v209_v26 = vld [vmem:[%s199_s5 + $0x8] sm:$0xff]  ;;  %vm218_vm4 = vcmp.gt.f32.partialorder %v720_v25, 0.5  ;;  %s223_s9 = sadd.s32 1, %s721_s8  ;;  %s222_s10 = sld [smem:[#allocation2 + %s721_s8]] }
  0x17   : > { %227 = vrot.lane.b32.xlu0 %v904_v2, %s845_s23  ;;  %322 = vrot.lane.b32.xlu2 %v904_v2, %s846_s24  ;;  %v922_v21 = vsel %vm217_vm2, 0.0, %v851_v20  ;;  %v924_v22 = vsel %vm210_vm3, 0.0, %v851_v20  ;;  %vm211_vm5 = vcmp.gt.f32.partialorder %v209_v26, 0.5  ;;  %v930_v32 = vsel %vm218_vm4, 0.0, %v851_v20  ;;  %s224_s11 = sld [smem:[#allocation2 + %s223_s9]]  ;;  %s854_s13 = smov 56  }
  0x18   : > { %v932_v33 = vsel %vm211_vm5, 0.0, %v851_v20  ;;  %s855_s14 = smov 40   ;;  %s856_s15 = smov 48  }
  0x19   : > { %s857_s16 = smov 8   ;;  %s858_s17 = smov 24  }
  0x1a   : > { %s859_s20 = smov 16   ;;  %s204_s23 = scalar_lea.vmem %s1048_s3, %s732_s19 }
  0x1c   : > { %v943_v50 = vstv %s222_s10 }
  0x1d   : > { %v945_v51 = vstv %s224_s11 }
  0x1f   : > { %300 = vrot.lane.b32.xlu2 %v904_v2, %s847_s25 }
  0x27   : > { %413 = vrot.lane.b32.xlu2 %v904_v2, %s848_s26 }
  0x71   : > { %v323_v11 = vpop.permute.xlu2 %322 }
  0x72   : > { %v328_v12 = vsel %vm229_vm0, %v323_v11, 0 }
  0x73   : > { %337 = vmatpush.bf16.xpose.msra.mxu2 %v328_v12 }
  0x79   : > { %v301_v31 = vpop.permute.xlu2 %300 }
  0x7a   : > { %313 = vmatpush.bf16.msra.mxu1 %v301_v31 }
  0x81   : > { %v414_v39 = vpop.permute.xlu2 %413 }
  0x82   : > { %v419_v40 = vsel %vm229_vm0, %v414_v39, 0 }
  0x83   : > { %428 = vmatpush.bf16.xpose.msrb.mxu1 %v419_v40 }
  0x89   : > { %v228_v3 = vpop.permute.xlu0 %227 }
  0x8a   : > { %v234_v4 = vsel %vm229_vm0, %v228_v3, 0 }
  0x8b   : > { %243 = vmatpush.bf16.xpose.msra.mxu0 %v234_v4 }
  0x92   : > { %722 = vmatmul.msk.bf16.vlgmr.msra.gmra.mxu0 %vm229_vm0, %v904_v2 }
 0x10f   : > { %v245_v5 = vpop.f32.mrf.mxu0 }
 0x110   : > { %v250_v6 = vmul.f32 0.35355338, %v245_v5 }
 0x112   : > { %v253_v7 = vsel %vm252_vm1, %v250_v6, -inf }
 0x113   : > { %254 = vmax.xlane.f32.xlu0 %v253_v7 }
 0x117   : > { %v247_v8 = vpop.f32.mrf.mxu0 }
 0x118   : > { %v251_v9 = vmul.f32 0.35355338, %v247_v8 }
 0x11a   : > { %v256_v10 = vsel %vm252_vm1, %v251_v9, -inf }
 0x11b   : > { %257 = vmax.xlane.f32.xlu1 %v256_v10 }
 0x127   : > { %411 = vrot.lane.b32.xlu0 %v904_v2, %s850_s28 }
 0x134   : > { %320 = vrot.lane.b32.xlu1 %v904_v2, %s849_s27 }
 0x186   : > { %v255_v13 = vpop.xlane.xlu0 %254 }
 0x187   : > { %v259_v14 = vsub.f32 %v250_v6, %v255_v13 }
 0x189   : > { %v261_v15 = vmul.f32 1.442695, %v259_v14 }
 0x18b   : > { %769 = vpow2.f32 %v261_v15 }
 0x18e   : > { %v258_v18 = vpop.xlane.xlu1 %257 }
 0x18f   : > { %v260_v19 = vsub.f32 %v251_v9, %v258_v18 }
 0x191   : > { %v770_v23 = vpop.eup %769  ;;  %v263_v24 = vmul.f32 1.442695, %v260_v19 }
 0x192   : > { %v282_v27 = vmul.f32 %v770_v23, %v922_v21  ;;  %v265_v28 = vmul.f32 %v770_v23, %v924_v22 }
 0x193   : > { %771 = vpow2.f32 %v263_v24 }
 0x194   : > { %v284_v29 = vsel %vm252_vm1, %v282_v27, 0.0  ;;  %v267_v30 = vsel %vm252_vm1, %v265_v28, 0.0 }
 0x195   : > { %285 = vadd.xlane.f32.xlu2 %v284_v29  ;;  %268 = vadd.xlane.f32.xlu1 %v267_v30 }
 0x199   : > { %v772_v34 = vpop.eup %771  ;;  %v412_v6 = vpop.permute.xlu0 %411 }
 0x19a   : > { %v283_v35 = vmul.f32 %v772_v34, %v930_v32  ;;  %v266_v36 = vmul.f32 %v772_v34, %v932_v33 }
 0x19c   : > { %v287_v37 = vsel %vm252_vm1, %v283_v35, 0.0  ;;  %v270_v38 = vsel %vm252_vm1, %v266_v36, 0.0 }
 0x19d   : > { %288 = vadd.xlane.f32.xlu1 %v287_v37  ;;  %271 = vadd.xlane.f32.xlu2 %v270_v38 }
 0x1a6   : > { %v321_v41 = vpop.permute.xlu1 %320 }
 0x1a7   : > { %724 = vmatmul.msk.bf16.vlgmr.msra.gmra.mxu2 %vm229_vm0, %v321_v41 }
 0x1b5   : > { %502 = vrot.lane.b32.xlu2 %v904_v2, %s852_s6 }
 0x1b6   : > { %504 = vrot.lane.b32.xlu1 %v904_v2, %s853_s7 }
 0x208   : > { %v286_v42 = vpop.xlane.xlu2 %285  ;;  %v269_v43 = vpop.xlane.xlu1 %268 }
 0x209   : > { %773 = vrcp.f32 %v286_v42 }
 0x20a   : > { %775 = vrcp.f32 %v269_v43 }
 0x20f   : > { %v774_v46 = vpop.eup %773 }
 0x210   : > { %v272_v44 = vpop.xlane.xlu2 %271  ;;  %v289_v45 = vpop.xlane.xlu1 %288  ;;  %v292_v48 = vmul.f32 %v774_v46, %v282_v27 }
 0x211   : > { %777 = vrcp.f32 %v272_v44  ;;  %v776_v47 = vpop.eup %775 }
 0x212   : > { %779 = vrcp.f32 %v289_v45  ;;  %v275_v49 = vmul.f32 %v776_v47, %v265_v28  ;;  %v295_v57 = vmul.f32 %v945_v51, %v292_v48 }
 0x214   : > { %v278_v56 = vmul.f32 %v943_v50, %v275_v49 }
 0x216   : > { %v297_v60 = vadd.f32 %v295_v57, %v278_v56 }
 0x217   : > { %v778_v52 = vpop.eup %777 }
 0x218   : > { %v780_v53 = vpop.eup %779  ;;  %v276_v54 = vmul.f32 %v778_v52, %v266_v36  ;;  %v503_v5 = vpop.permute.xlu2 %502 }
 0x219   : > { %v293_v55 = vmul.f32 %v780_v53, %v283_v35 }
 0x21a   : > { %v279_v58 = vmul.f32 %v943_v50, %v276_v54 }
 0x21b   : > { %v296_v59 = vmul.f32 %v945_v51, %v293_v55 }
 0x21d   : > { %v298_v61 = vadd.f32 %v296_v59, %v279_v58 }
 0x21f   : > { %v299_v62 = vpack.c.bf16 %v298_v61, %v297_v60 }
 0x221   : > { %723 = vmatmul.msk.bf16.vlgmr.msra.gmra.mxu1 %vm252_vm1, %v299_v62 }
 0x228   : > { %v505_v63 = vpop.permute.xlu1 %504 }
 0x229   : > { %v510_v0 = vsel %vm229_vm0, %v505_v63, 0 }
 0x22a   : > { %v339_v1 = vpop.f32.mrf.mxu2  ;;  %519 = vmatpush.bf16.xpose.msrb.mxu0 %v510_v0 }
 0x22b   : > { %v344_v3 = vmul.f32 0.35355338, %v339_v1 }
 0x22d   : > { %v346_v4 = vsel %vm252_vm1, %v344_v3, -inf }
 0x22e   : > { %347 = vmax.xlane.f32.xlu1 %v346_v4 }
 0x231   : > { %728 = vmatmul.msk.bf16.vlgmr.msrb.gmra.mxu0 %vm229_vm0, %v503_v5  ;;  %726 = vmatmul.msk.bf16.vlgmr.msrb.gmra.mxu1 %vm229_vm0, %v412_v6 }
 0x232   : > { %v341_v7 = vpop.f32.mrf.mxu2 }
 0x233   : > { %v345_v8 = vmul.f32 0.35355338, %v341_v7 }
 0x235   : > { %v349_v9 = vsel %vm252_vm1, %v345_v8, -inf }
 0x236   : > { %350 = vmax.xlane.f32.xlu2 %v349_v9 }
 0x29e   : > { %v957_v10 = vpop.f32.mrf.mxu1 }
 0x2a1   : > { %v348_v11 = vpop.xlane.xlu1 %347 }
 0x2a2   : > { %v352_v12 = vsub.f32 %v344_v3, %v348_v11 }
 0x2a4   : > { %v354_v13 = vmul.f32 1.442695, %v352_v12 }
 0x2a6   : > { %781 = vpow2.f32 %v354_v13  ;;  %v959_v14 = vpop.f32.mrf.mxu1 }
 0x2a9   : > { %v351_v15 = vpop.xlane.xlu2 %350 }
 0x2aa   : > { %v353_v16 = vsub.f32 %v345_v8, %v351_v15 }
 0x2ac   : > { %v782_v17 = vpop.eup %781  ;;  %v356_v18 = vmul.f32 1.442695, %v353_v16 }
 0x2ad   : > { %v962_v19 = vmul.f32 %v782_v17, %v924_v22  ;;  %v374_v38 = vmul.f32 %v782_v17, %v922_v21 }
 0x2ae   : > { %783 = vpow2.f32 %v356_v18  ;;  %v521_v20 = vpop.f32.mrf.mxu0  ;;  %v430_v23 = vpop.f32.mrf.mxu1 }
 0x2af   : > { %v526_v24 = vmul.f32 0.35355338, %v521_v20  ;;  %v360_v25 = vsel %vm252_vm1, %v962_v19, 0.0  ;;  %v435_v27 = vmul.f32 0.35355338, %v430_v23  ;;  %v376_v40 = vsel %vm252_vm1, %v374_v38, 0.0 }
 0x2b0   : > { %361 = vadd.xlane.f32.xlu0 %v360_v25 }
 0x2b1   : > { %v528_v26 = vsel %vm252_vm1, %v526_v24, -inf  ;;  %v437_v29 = vsel %vm252_vm1, %v435_v27, -inf }
 0x2b2   : > { %529 = vmax.xlane.f32.xlu2 %v528_v26 }
 0x2b4   : > { %v784_v28 = vpop.eup %783 }
 0x2b5   : > { %v359_v30 = vmul.f32 %v784_v28, %v932_v33  ;;  %v375_v37 = vmul.f32 %v784_v28, %v930_v32 }
 0x2b6   : > { %v523_v31 = vpop.f32.mrf.mxu0  ;;  %v432_v41 = vpop.f32.mrf.mxu1 }
 0x2b7   : > { %v527_v34 = vmul.f32 0.35355338, %v523_v31  ;;  %v363_v35 = vsel %vm252_vm1, %v359_v30, 0.0  ;;  %v379_v39 = vsel %vm252_vm1, %v375_v37, 0.0  ;;  %v436_v42 = vmul.f32 0.35355338, %v432_v41 }
 0x2b8   : > { %438 = vmax.xlane.f32.xlu0 %v437_v29 }
 0x2b9   : > { %v531_v36 = vsel %vm252_vm1, %v527_v34, -inf  ;;  %v440_v43 = vsel %vm252_vm1, %v436_v42, -inf }
 0x2ba   : > { %364 = vadd.xlane.f32.xlu2 %v363_v35  ;;  %532 = vmax.xlane.f32.xlu1 %v531_v36 }
 0x2c0   : > { %380 = vadd.xlane.f32.xlu0 %v379_v39 }
 0x2c2   : > { %377 = vadd.xlane.f32.xlu1 %v376_v40 }
 0x2ca   : > { %441 = vmax.xlane.f32.xlu1 %v440_v43 }
 0x2d2   : > { %391 = vrot.lane.b32.xlu2 %v904_v2, %s854_s13 }
 0x323   : > { %v362_v44 = vpop.xlane.xlu0 %361 }
 0x325   : > { %v530_v45 = vpop.xlane.xlu2 %529 }
 0x326   : > { %v534_v46 = vsub.f32 %v526_v24, %v530_v45 }
 0x328   : > { %v536_v47 = vmul.f32 1.442695, %v534_v46 }
 0x32a   : > { %785 = vpow2.f32 %v536_v47 }
 0x32b   : > { %v439_v48 = vpop.xlane.xlu0 %438  ;;  %787 = vrcp.f32 %v362_v44 }
 0x32c   : > { %v443_v49 = vsub.f32 %v435_v27, %v439_v48 }
 0x32d   : > { %v365_v52 = vpop.xlane.xlu2 %364  ;;  %v533_v53 = vpop.xlane.xlu1 %532 }
 0x32e   : > { %v535_v54 = vsub.f32 %v527_v34, %v533_v53  ;;  %v445_v57 = vmul.f32 1.442695, %v443_v49  ;;  %789 = vrcp.f32 %v365_v52 }
 0x330   : > { %v786_v55 = vpop.eup %785  ;;  %v538_v56 = vmul.f32 1.442695, %v535_v54 }
 0x331   : > { %v978_v58 = vmul.f32 %v786_v55, %v922_v21  ;;  %v981_v59 = vmul.f32 %v786_v55, %v924_v22  ;;  %v788_v1 = vpop.eup %787 }
 0x332   : > { %791 = vpow2.f32 %v538_v56  ;;  %v368_v8 = vmul.f32 %v788_v1, %v962_v19 }
 0x333   : > { %v381_v60 = vpop.xlane.xlu0 %380  ;;  %v558_v61 = vsel %vm252_vm1, %v978_v58, 0.0  ;;  %v542_v62 = vsel %vm252_vm1, %v981_v59, 0.0 }
 0x334   : > { %793 = vrcp.f32 %v381_v60  ;;  %559 = vadd.xlane.f32.xlu2 %v558_v61  ;;  %543 = vadd.xlane.f32.xlu1 %v542_v62  ;;  %v790_v3 = vpop.eup %789  ;;  %v370_v19 = vmul.f32 %v368_v8, %v943_v50 }
 0x335   : > { %795 = vpow2.f32 %v445_v57  ;;  %v378_v63 = vpop.xlane.xlu1 %377  ;;  %v392_v0 = vpop.permute.xlu2 %391  ;;  %v369_v11 = vmul.f32 %v790_v3, %v359_v30 }
 0x336   : > { %797 = vrcp.f32 %v378_v63  ;;  %404 = vmatpush.bf16.msra.mxu3 %v392_v0 }
 0x337   : > { %v371_v25 = vmul.f32 %v369_v11, %v943_v50 }
 0x338   : > { %v792_v4 = vpop.eup %791 }
 0x339   : > { %v988_v5 = vmul.f32 %v792_v4, %v930_v32  ;;  %v991_v6 = vmul.f32 %v792_v4, %v932_v33 }
 0x33a   : > { %v794_v7 = vpop.eup %793 }
 0x33b   : > { %v796_v9 = vpop.eup %795  ;;  %v385_v12 = vmul.f32 %v794_v7, %v375_v37  ;;  %v561_v13 = vsel %vm252_vm1, %v988_v5, 0.0  ;;  %v545_v15 = vsel %vm252_vm1, %v991_v6, 0.0 }
 0x33c   : > { %v798_v16 = vpop.eup %797  ;;  %562 = vadd.xlane.f32.xlu1 %v561_v13  ;;  %546 = vadd.xlane.f32.xlu0 %v545_v15  ;;  %v1000_v24 = vmul.f32 %v796_v9, %v924_v22  ;;  %v465_v22 = vmul.f32 %v796_v9, %v922_v21 }
 0x33d   : > { %v384_v17 = vmul.f32 %v798_v16, %v374_v38  ;;  %v442_v18 = vpop.xlane.xlu1 %441  ;;  %v387_v20 = vmul.f32 %v385_v12, %v945_v51 }
 0x33e   : > { %v444_v23 = vsub.f32 %v436_v42, %v442_v18  ;;  %v451_v30 = vsel %vm252_vm1, %v1000_v24, 0.0  ;;  %v467_v36 = vsel %vm252_vm1, %v465_v22, 0.0 }
 0x33f   : > { %v386_v26 = vmul.f32 %v384_v17, %v945_v51  ;;  %v389_v29 = vadd.f32 %v387_v20, %v371_v25 }
 0x340   : > { %v447_v27 = vmul.f32 1.442695, %v444_v23 }
 0x341   : > { %v388_v28 = vadd.f32 %v386_v26, %v370_v19 }
 0x342   : > { %799 = vpow2.f32 %v447_v27 }
 0x343   : > { %v390_v31 = vpack.c.bf16 %v389_v29, %v388_v28 }
 0x344   : > { %452 = vadd.xlane.f32.xlu1 %v451_v30 }
 0x345   : > { %725 = vmatmul.msk.bf16.vlgmr.msra.gmra.mxu3 %vm252_vm1, %v390_v31 }
 0x348   : > { %v800_v34 = vpop.eup %799 }
 0x349   : > { %v450_v35 = vmul.f32 %v800_v34, %v932_v33  ;;  %v466_v38 = vmul.f32 %v800_v34, %v930_v32 }
 0x34b   : > { %v454_v37 = vsel %vm252_vm1, %v450_v35, 0.0  ;;  %v470_v39 = vsel %vm252_vm1, %v466_v38, 0.0 }
 0x34c   : > { %468 = vadd.xlane.f32.xlu1 %v467_v36  ;;  %455 = vadd.xlane.f32.xlu0 %v454_v37 }
 0x354   : > { %471 = vadd.xlane.f32.xlu0 %v470_v39 }
 0x365   : > { %573 = vrot.lane.b32.xlu1 %v904_v2, %s855_s14 }
 0x368   : > { %482 = vrot.lane.b32.xlu0 %v904_v2, %s856_s15 }
 0x3a7   : > { %v544_v21 = vpop.xlane.xlu1 %543  ;;  %v560_v43 = vpop.xlane.xlu2 %559 }
 0x3af   : > { %v563_v40 = vpop.xlane.xlu1 %562  ;;  %v547_v33 = vpop.xlane.xlu0 %546 }
 0x3b0   : > { %801 = vrcp.f32 %v547_v33 }
 0x3b1   : > { %803 = vrcp.f32 %v563_v40 }
 0x3b2   : > { %805 = vrcp.f32 %v560_v43 }
 0x3b3   : > { %807 = vrcp.f32 %v544_v21 }
 0x3b6   : > { %v802_v46 = vpop.eup %801 }
 0x3b7   : > { %v453_v41 = vpop.xlane.xlu1 %452  ;;  %v804_v2 = vpop.eup %803  ;;  %v551_v52 = vmul.f32 %v802_v46, %v991_v6 }
 0x3b8   : > { %v806_v47 = vpop.eup %805  ;;  %v567_v53 = vmul.f32 %v804_v2, %v988_v5 }
 0x3b9   : > { %v808_v48 = vpop.eup %807  ;;  %v566_v56 = vmul.f32 %v806_v47, %v978_v58  ;;  %v553_v63 = vmul.f32 %v551_v52, %v943_v50 }
 0x3ba   : > { %v550_v57 = vmul.f32 %v808_v48, %v981_v59  ;;  %v569_v0 = vmul.f32 %v567_v53, %v945_v51 }
 0x3bb   : > { %v568_v4 = vmul.f32 %v566_v56, %v945_v51 }
 0x3bc   : > { %v552_v5 = vmul.f32 %v550_v57, %v943_v50  ;;  %v571_v7 = vadd.f32 %v569_v0, %v553_v63 }
 0x3be   : > { %v570_v11 = vadd.f32 %v568_v4, %v552_v5 }
 0x3bf   : > { %v456_v42 = vpop.xlane.xlu0 %455  ;;  %v469_v32 = vpop.xlane.xlu1 %468 }
 0x3c0   : > { %809 = vrcp.f32 %v456_v42  ;;  %v572_v15 = vpack.c.bf16 %v571_v7, %v570_v11 }
 0x3c6   : > { %v810_v49 = vpop.eup %809 }
 0x3c7   : > { %v472_v44 = vpop.xlane.xlu0 %471  ;;  %v460_v1 = vmul.f32 %v810_v49, %v450_v35 }
 0x3c8   : > { %811 = vrcp.f32 %v472_v44  ;;  %v406_v45 = vpop.f32.mrf.mxu3 }
 0x3c9   : > { %813 = vrcp.f32 %v469_v32  ;;  %595 = vrot.lane.b32.xlu0 %v406_v45, %s857_s16  ;;  %v462_v59 = vmul.f32 %v460_v1, %v943_v50 }
 0x3ca   : > { %815 = vrcp.f32 %v453_v41 }
 0x3ce   : > { %v812_v54 = vpop.eup %811 }
 0x3cf   : > { %v814_v55 = vpop.eup %813  ;;  %v476_v60 = vmul.f32 %v812_v54, %v466_v38 }
 0x3d0   : > { %v408_v61 = vpop.f32.mrf.mxu3  ;;  %v816_v62 = vpop.eup %815  ;;  %v475_v3 = vmul.f32 %v814_v55, %v465_v22 }
 0x3d1   : > { %597 = vrot.lane.b32.xlu0 %v408_v61, %s857_s16  ;;  %v459_v6 = vmul.f32 %v816_v62, %v1000_v24  ;;  %v478_v58 = vmul.f32 %v476_v60, %v945_v51 }
 0x3d2   : > { %v477_v8 = vmul.f32 %v475_v3, %v945_v51 }
 0x3d3   : > { %v461_v12 = vmul.f32 %v459_v6, %v943_v50  ;;  %v480_v13 = vadd.f32 %v478_v58, %v462_v59 }
 0x3d5   : > { %v479_v17 = vadd.f32 %v477_v8, %v461_v12 }
 0x3d7   : > { %v574_v9 = vpop.permute.xlu1 %573  ;;  %v481_v18 = vpack.c.bf16 %v480_v13, %v479_v17 }
 0x3d8   : > { %586 = vmatpush.bf16.msrb.mxu2 %v574_v9 }
 0x3da   : > { %v483_v16 = vpop.permute.xlu0 %482 }
 0x3db   : > { %495 = vmatpush.bf16.msrb.mxu3 %v483_v16  ;;  %729 = vmatmul.msk.bf16.vlgmr.msrb.gmra.mxu2 %vm252_vm1, %v572_v15 }
 0x3de   : > { %727 = vmatmul.msk.bf16.vlgmr.msrb.gmra.mxu3 %vm252_vm1, %v481_v18 }
 0x43b   : > { %v596_v24 = vpop.permute.xlu0 %595 }
 0x43c   : > { %v617_v25 = vsel %vm229_vm0, %v957_v10, %v596_v24 }
 0x443   : > { %v598_v19 = vpop.permute.xlu0 %597 }
 0x444   : > { %v618_v31 = vsel %vm229_vm0, %v959_v14, %v598_v19 }
 0x45e   : > { %v588_v20 = vpop.f32.mrf.mxu2 }
 0x45f   : > { %611 = vrot.lane.b32.xlu0 %v588_v20, %s858_s17 }
 0x461   : > { %v497_v51 = vpop.f32.mrf.mxu3 }
 0x462   : > { %603 = vrot.lane.b32.xlu1 %v497_v51, %s859_s20 }
 0x466   : > { %v590_v23 = vpop.f32.mrf.mxu2 }
 0x469   : > { %v499_v50 = vpop.f32.mrf.mxu3 }
 0x46a   : > { %605 = vrot.lane.b32.xlu2 %v499_v50, %s859_s20  ;;  %613 = vrot.lane.b32.xlu1 %v590_v23, %s858_s17 }
 0x4c4   : > { %v606_v30 = vpop.permute.xlu2 %605 }
 0x4c5   : > { %v620_v22 = vsel %vm252_vm1, %v618_v31, %v606_v30 }
 0x4d1   : > { %v612_v27 = vpop.permute.xlu0 %611 }
 0x4d4   : > { %v604_v26 = vpop.permute.xlu1 %603 }
 0x4d5   : > { %v619_v28 = vsel %vm252_vm1, %v617_v25, %v604_v26 }
 0x4d6   : > { %v622_v29 = vsel %vm621_vm6, %v619_v28, %v612_v27 }
 0x4d7   : > { %625 = vst.msk [vmem:[%s204_s23] sm:$0xff] %vm624_vm7, %v622_v29 }
 0x4dc   : > { %v614_v34 = vpop.permute.xlu1 %613 }
 0x4dd   : > { %v623_v10 = vsel %vm621_vm6, %v620_v22, %v614_v34 }
 0x4de   : > { %626 = vst.msk [vmem:[%s204_s23 + $0x8] sm:$0xff] %vm624_vm7, %v623_v10 }
 0x4df PF: > { %s14_s12 = sadd.s32 1, %s842_s12  }
 0x4e0   : > { %p11_p7 = scmp.ge.s32.totalorder %s14_s12, 4  }
 0x4e2   :  { %13 = sbr.rel (!%p11_p7) target bundleno = 1 (0x1), region = 71 }
 0x4e7   :  { %648 = vsyncpa [#allocation3], 1 }
 0x4e8   :  { %650 = vsyncpa [#allocation3 + $0x1], 1 }

// kernel: trar_forward.11
= control target key start
LH: loop header
LB: loop body
LE: loop exit
PB: predicated region body
PF: predicated region fallthrough
CT: control target
= control target key end

     0   :  { %vm38_vm0 = vcmask 261120   ;;  %vm56_vm1 = vcmask 523264   ;;  %s116_s1 = inlined_call_operand.vmem [shape: bf16[32,64], index: 1, kind: input, shape index: {}]   ;;  %s117_s0 = inlined_call_operand.vmem [shape: f32[16,32], index: 0, kind: input, shape index: {}]   ;;  %s118_s2 = inlined_call_operand.vmem [shape: f32[1,64], index: 2, kind: input, shape index: {}]   ;;  %s119_s3 = inlined_call_operand.vmem [shape: f32[16,64], index: 3, kind: output, shape index: {}]  }
   0x1   :  { %v73_v0 = vld [vmem:[%s116_s1 + $0x8] sm:$0xff]  ;;  %v72_v1 = vld [vmem:[%s116_s1] sm:$0xff] }
   0x2   :  { %48 = vmatpush.bf16.msra.mxu0 %v73_v0  ;;  %v15_v2 = vld [vmem:[%s117_s0] sm:$0xff]  ;;  %v16_v3 = vld [vmem:[%s117_s0 + $0x8] sm:$0xff] }
   0x3   :  { %v17_v4 = vpack.c.bf16 %v16_v3, %v15_v2  ;;  %v74_v5 = vld [vmem:[%s118_s2] ss:$0 sm:$0xff] }
   0x6   :  { %49 = vmatpush.bf16.msra.mxu0 %v72_v1 }
   0x9   :  { %71 = vmatmul.msk.bf16.vlgmr.msra.gmra.mxu0 %vm38_vm0, %v17_v4 }
  0x86   :  { %v51_v6 = vpop.f32.mrf.mxu0 }
  0x87   :  { %v52_v7 = vadd.f32 %v74_v5, %v51_v6 }
  0x89   :  { %57 = vst.msk [vmem:[%s119_s3] sm:$0xff] %vm56_vm1, %v52_v7 }
  0x8e   :  { %v53_v8 = vpop.f32.mrf.mxu0 }
  0x8f   :  { %v54_v9 = vadd.f32 %v74_v5, %v53_v8 }
  0x91   :  { %58 = vst.msk [vmem:[%s119_s3 + $0x8] sm:$0xff] %vm56_vm1, %v54_v9 }

// kernel: trar_forward.12
= control target key start
LH: loop header
LB: loop body
LE: loop exit
PB: predicated region body
PF: predicated region fallthrough
CT: control target
= control target key end

     0   :  { %s729_s12 = smov 0   ;;  %s833_s0 = inlined_call_operand.vmem [shape: f32[2,16,32], index: 0, kind: input, shape index: {}]   ;;  %s834_s1 = inlined_call_operand.vmem [shape: f32[2,8,64], index: 1, kind: input, shape index: {}]   ;;  %s835_s2 = inlined_call_operand.vmem [shape: f32[2,1,1,8], index: 2, kind: input, shape index: {}]   ;;  %s836_s3 = inlined_call_operand.vmem [shape: f32[2,16,32], index: 3, kind: output, shape index: {}]  }
   0x1 LB: > { %s617_s13 = sadd.s32 4294967295, %s696_s12   ;;  %p621_p0 = scmp.ge.s32.totalorder %s696_s12, 1  ;;  %s696_s12 = sphi %s729_s12, %s13_s12  }
   0x2   : > { %p154_p1 = scmp.lt.s32.totalorder %s696_s12, 3 }
   0x4   : > { %p155_p2 = pnand %p621_p0, %p154_p1 }
   0x5   : > { %p185_p3 = scmp.lt.s32.totalorder (!%p155_p2), %s617_s13, 1  ;;  %s698_s22 = smov (!%p155_p2), 120  }
   0x6   : > { %158 = sbr.rel (%p155_p2) target bundleno = 1091 (0x443), region = 32  ;;  %s699_s23 = smov (!%p155_p2), 112  }
   0x7   : > { %s701_s27 = smov (!%p155_p2), 96   ;;  %s702_s28 = smov (!%p155_p2), 104  }
   0x8   : > { %s703_s29 = smov (!%p155_p2), 88   ;;  %s704_s30 = smov (!%p155_p2), 80  }
   0x9   : > { %s705_s4 = smov (!%p155_p2), 72   ;;  %s706_s5 = smov (!%p155_p2), 8  }
   0xa   : > { %s707_s6 = smov (!%p155_p2), 24   ;;  %s708_s7 = smov (!%p155_p2), 16  }
   0xb   : > { %s838_s13 = smov (!%p185_p3, %s617_s13), 1  ;;  %vm211_vm0 = vcmask 64512   ;;  %v700_v10 = vmov 0.0   ;;  %vm268_vm2 = vcmask 1043456   ;;  %vm532_vm3 = vcmask 130048  }
   0xc   : > { %s624_s14 = sshll.u32 %s838_s13, 3  ;;  %s637_s15 = sshll.u32 %s838_s13, 4  ;;  %vm535_vm4 = vcmask 195584   ;;  %vm538_vm5 = vcmask 261120  }
   0xd   : > { %s193_s18 = scalar_lea.vmem %s834_s1, %s624_s14  ;;  %s189_s21 = scalar_lea.vmem %s833_s0, %s637_s15 }
   0xe   : > { %v205_v0 = vld [vmem:[%s193_s18] sm:$0xff]  ;;  %v204_v2 = vld [vmem:[%s189_s21 + $0x8] sm:$0xff]  ;;  %s196_s26 = scalar_lea.vmem %s835_s2, %s838_s13  ;;  %s201_s10 = scalar_lea.vmem %s836_s3, %s637_s15 }
   0xf   : > { %v203_v1 = vld [vmem:[%s189_s21] sm:$0xff]  ;;  %v749_v3 = vpack.c.bf16 %v205_v0, %v205_v0 }
  0x10   : > { %v751_v4 = vpack.c.bf16 %v204_v2, %v203_v1  ;;  %v206_v9 = vld [vmem:[%s196_s26] sm:$0x1] }
  0x11   : > { %v216_v5 = vsel %vm211_vm0, %v749_v3, 0  ;;  %289 = vrot.lane.b32.xlu1 %v749_v3, %s698_s22  ;;  %vm207_vm1 = vcmp.gt.f32.partialorder %v206_v9, 0.5 }
  0x12   : > { %287 = vrot.lane.b32.xlu2 %v751_v4, %s698_s22  ;;  %225 = vmatpush.bf16.xpose.msra.mxu0 %v216_v5  ;;  %v208_v11 = vsel %vm207_vm1, -1e+09, %v700_v10 }
  0x13   : > { %v767_v12 = vperm.slane %v208_v11, 0 }
  0x19   : > { %627 = vmatmul.msk.bf16.vlgmr.msra.gmra.mxu0 %vm211_vm0, %v751_v4 }
  0x1a   : > { %362 = vrot.lane.b32.xlu2 %v749_v3, %s699_s23 }
  0x6c   : > { %v288_v8 = vpop.permute.xlu2 %287 }
  0x74   : > { %v363_v36 = vpop.permute.xlu2 %362 }
  0x75   : > { %v368_v38 = vsel %vm211_vm0, %v363_v36, 0 }
  0x83   : > { %v290_v6 = vpop.permute.xlu1 %289 }
  0x84   : > { %v295_v7 = vsel %vm211_vm0, %v290_v6, 0 }
  0x85   : > { %304 = vmatpush.bf16.xpose.msra.mxu2 %v295_v7 }
  0x8c   : > { %629 = vmatmul.msk.bf16.vlgmr.msra.gmra.mxu2 %vm211_vm0, %v288_v8 }
  0x96   : > { %v227_v13 = vpop.f32.mrf.mxu0 }
  0x97   : > { %v232_v14 = vmul.f32 0.35355338, %v227_v13 }
  0x99   : > { %v237_v15 = vadd.f32 %v767_v12, %v232_v14 }
  0x9b   : > { %v239_v16 = vsel %vm211_vm0, %v237_v15, -inf }
  0x9c   : > { %240 = vmax.xlane.f32.xlu0 %v239_v16 }
  0x9e   : > { %v229_v17 = vpop.f32.mrf.mxu0 }
  0x9f   : > { %v233_v18 = vmul.f32 0.35355338, %v229_v17 }
  0xa1   : > { %v238_v19 = vadd.f32 %v767_v12, %v233_v18 }
  0xa3   : > { %v242_v20 = vsel %vm211_vm0, %v238_v19, -inf }
  0xa4   : > { %243 = vmax.xlane.f32.xlu0 %v242_v20 }
  0xb8   : > { %263 = vrot.lane.b32.xlu0 %v749_v3, %s701_s27 }
  0xc0   : > { %435 = vrot.lane.b32.xlu0 %v749_v3, %s702_s28 }
  0xc8   : > { %433 = vrot.lane.b32.xlu0 %v751_v4, %s702_s28 }
 0x10f   : > { %v241_v21 = vpop.xlane.xlu0 %240  ;;  %v306_v22 = vpop.f32.mrf.mxu2 }
 0x110   : > { %v245_v23 = vsub.f32 %v237_v15, %v241_v21  ;;  %v311_v43 = vmul.f32 0.35355338, %v306_v22 }
 0x112   : > { %v247_v24 = vmul.f32 1.442695, %v245_v23  ;;  %v313_v44 = vadd.f32 %v311_v43, %v767_v12 }
 0x114   : > { %658 = vpow2.f32 %v247_v24  ;;  %v315_v45 = vsel %vm211_vm0, %v313_v44, -inf }
 0x117   : > { %v244_v25 = vpop.xlane.xlu0 %243  ;;  %v308_v26 = vpop.f32.mrf.mxu2 }
 0x118   : > { %v246_v27 = vsub.f32 %v238_v19, %v244_v25  ;;  %v312_v28 = vmul.f32 0.35355338, %v308_v26 }
 0x11a   : > { %v659_v29 = vpop.eup %658  ;;  %v249_v30 = vmul.f32 1.442695, %v246_v27  ;;  %v314_v32 = vadd.f32 %v312_v28, %v767_v12 }
 0x11b   : > { %v251_v31 = vsel %vm211_vm0, %v659_v29, 0.0 }
 0x11c   : > { %660 = vpow2.f32 %v249_v30  ;;  %252 = vadd.xlane.f32.xlu1 %v251_v31  ;;  %v318_v33 = vsel %vm211_vm0, %v314_v32, -inf }
 0x122   : > { %v661_v34 = vpop.eup %660 }
 0x123   : > { %v254_v35 = vsel %vm211_vm0, %v661_v34, 0.0 }
 0x124   : > { %319 = vmax.xlane.f32.xlu1 %v318_v33  ;;  %255 = vadd.xlane.f32.xlu2 %v254_v35 }
 0x12a   : > { %v264_v37 = vpop.permute.xlu0 %263 }
 0x12b   : > { %v270_v39 = vsel %vm268_vm2, %v264_v37, 0 }
 0x12c   : > { %279 = vmatpush.bf16.msra.mxu1 %v270_v39 }
 0x130   : > { %377 = vmatpush.bf16.xpose.msrb.mxu1 %v368_v38 }
 0x132   : > { %v436_v40 = vpop.permute.xlu0 %435 }
 0x133   : > { %v441_v41 = vsel %vm211_vm0, %v436_v40, 0 }
 0x134   : > { %450 = vmatpush.bf16.xpose.msrb.mxu0 %v441_v41 }
 0x13a   : > { %v434_v42 = vpop.permute.xlu0 %433 }
 0x13b   : > { %633 = vmatmul.msk.bf16.vlgmr.msrb.gmra.mxu0 %vm211_vm0, %v434_v42 }
 0x13c   : > { %360 = vrot.lane.b32.xlu2 %v751_v4, %s699_s23 }
 0x165   : > { %316 = vmax.xlane.f32.xlu2 %v315_v45 }
 0x18f   : > { %v253_v46 = vpop.xlane.xlu1 %252 }
 0x190   : > { %662 = vrcp.f32 %v253_v46 }
 0x196   : > { %v663_v51 = vpop.eup %662 }
 0x197   : > { %v320_v47 = vpop.xlane.xlu1 %319  ;;  %v256_v48 = vpop.xlane.xlu2 %255  ;;  %v259_v53 = vmul.f32 %v663_v51, %v659_v29 }
 0x198   : > { %v322_v49 = vsub.f32 %v314_v32, %v320_v47  ;;  %664 = vrcp.f32 %v256_v48 }
 0x19a   : > { %v325_v50 = vmul.f32 1.442695, %v322_v49 }
 0x19c   : > { %666 = vpow2.f32 %v325_v50 }
 0x19e   : > { %v665_v52 = vpop.eup %664 }
 0x19f   : > { %v260_v54 = vmul.f32 %v665_v52, %v661_v34  ;;  %v361_v58 = vpop.permute.xlu2 %360 }
 0x1a1   : > { %v261_v55 = vpack.c.bf16 %v260_v54, %v259_v53 }
 0x1a2   : > { %v788_v56 = vpop.eup %666 }
 0x1a3   : > { %628 = vmatmul.msk.bf16.vlgmr.msra.gmra.mxu1 %vm211_vm0, %v261_v55  ;;  %v330_v57 = vsel %vm211_vm0, %v788_v56, 0.0 }
 0x1a4   : > { %331 = vadd.xlane.f32.xlu2 %v330_v57 }
 0x1b3   : > { %631 = vmatmul.msk.bf16.vlgmr.msrb.gmra.mxu1 %vm211_vm0, %v361_v58 }
 0x1b8   : > { %v452_v59 = vpop.f32.mrf.mxu0 }
 0x1b9   : > { %v457_v60 = vmul.f32 0.35355338, %v452_v59 }
 0x1bb   : > { %v459_v61 = vadd.f32 %v457_v60, %v767_v12 }
 0x1bd   : > { %v461_v62 = vsel %vm211_vm0, %v459_v61, -inf }
 0x1be   : > { %462 = vmax.xlane.f32.xlu1 %v461_v62 }
 0x1c0   : > { %v454_v63 = vpop.f32.mrf.mxu0 }
 0x1c1   : > { %v458_v0 = vmul.f32 0.35355338, %v454_v63 }
 0x1c3   : > { %v460_v1 = vadd.f32 %v458_v0, %v767_v12 }
 0x1c5   : > { %v464_v2 = vsel %vm211_vm0, %v460_v1, -inf }
 0x1c6   : > { %465 = vmax.xlane.f32.xlu1 %v464_v2 }
 0x1d8   : > { %v317_v7 = vpop.xlane.xlu2 %316 }
 0x1d9   : > { %v321_v13 = vsub.f32 %v313_v44, %v317_v7 }
 0x1db   : > { %v323_v16 = vmul.f32 1.442695, %v321_v13 }
 0x217   : > { %v332_v40 = vpop.xlane.xlu2 %331 }
 0x220   : > { %v798_v4 = vpop.f32.mrf.mxu1 }
 0x228   : > { %v800_v5 = vpop.f32.mrf.mxu1 }
 0x230   : > { %v379_v6 = vpop.f32.mrf.mxu1 }
 0x231   : > { %v384_v8 = vmul.f32 0.35355338, %v379_v6  ;;  %v463_v9 = vpop.xlane.xlu1 %462 }
 0x232   : > { %v467_v10 = vsub.f32 %v459_v61, %v463_v9 }
 0x233   : > { %v386_v11 = vadd.f32 %v384_v8, %v767_v12 }
 0x234   : > { %v469_v14 = vmul.f32 1.442695, %v467_v10 }
 0x235   : > { %v388_v15 = vsel %vm211_vm0, %v386_v11, -inf }
 0x236   : > { %668 = vpow2.f32 %v469_v14  ;;  %389 = vmax.xlane.f32.xlu0 %v388_v15 }
 0x237   : > { %670 = vpow2.f32 %v323_v16 }
 0x238   : > { %v381_v17 = vpop.f32.mrf.mxu1 }
 0x239   : > { %v385_v18 = vmul.f32 0.35355338, %v381_v17  ;;  %v466_v19 = vpop.xlane.xlu1 %465 }
 0x23a   : > { %v468_v20 = vsub.f32 %v460_v1, %v466_v19 }
 0x23b   : > { %v387_v21 = vadd.f32 %v385_v18, %v767_v12 }
 0x23c   : > { %v669_v22 = vpop.eup %668  ;;  %v471_v23 = vmul.f32 1.442695, %v468_v20 }
 0x23d   : > { %v473_v24 = vsel %vm211_vm0, %v669_v22, 0.0  ;;  %v391_v25 = vsel %vm211_vm0, %v387_v21, -inf  ;;  %v671_v26 = vpop.eup %670 }
 0x23e   : > { %672 = vpow2.f32 %v471_v23  ;;  %474 = vadd.xlane.f32.xlu0 %v473_v24  ;;  %392 = vmax.xlane.f32.xlu1 %v391_v25  ;;  %v327_v28 = vsel %vm211_vm0, %v671_v26, 0.0 }
 0x244   : > { %v673_v27 = vpop.eup %672 }
 0x245   : > { %v476_v29 = vsel %vm211_vm0, %v673_v27, 0.0 }
 0x246   : > { %328 = vadd.xlane.f32.xlu1 %v327_v28  ;;  %477 = vadd.xlane.f32.xlu2 %v476_v29 }
 0x25f   : > { %338 = vrot.lane.b32.xlu1 %v749_v3, %s703_s29 }
 0x2a9   : > { %v390_v12 = vpop.xlane.xlu0 %389 }
 0x2aa   : > { %v394_v30 = vsub.f32 %v386_v11, %v390_v12 }
 0x2ac   : > { %v396_v31 = vmul.f32 1.442695, %v394_v30 }
 0x2ae   : > { %674 = vpow2.f32 %v396_v31 }
 0x2b1   : > { %v393_v32 = vpop.xlane.xlu1 %392  ;;  %v475_v48 = vpop.xlane.xlu0 %474 }
 0x2b2   : > { %v395_v33 = vsub.f32 %v387_v21, %v393_v32 }
 0x2b4   : > { %v675_v34 = vpop.eup %674  ;;  %v398_v35 = vmul.f32 1.442695, %v395_v33 }
 0x2b5   : > { %v400_v36 = vsel %vm211_vm0, %v675_v34, 0.0 }
 0x2b6   : > { %676 = vpow2.f32 %v398_v35  ;;  %401 = vadd.xlane.f32.xlu0 %v400_v36 }
 0x2b9   : > { %v329_v39 = vpop.xlane.xlu1 %328  ;;  %v478_v49 = vpop.xlane.xlu2 %477 }
 0x2ba   : > { %678 = vrcp.f32 %v329_v39 }
 0x2bb   : > { %680 = vrcp.f32 %v332_v40 }
 0x2bc   : > { %v677_v37 = vpop.eup %676  ;;  %682 = vrcp.f32 %v478_v49 }
 0x2bd   : > { %v403_v38 = vsel %vm211_vm0, %v677_v37, 0.0  ;;  %684 = vrcp.f32 %v475_v48 }
 0x2be   : > { %404 = vadd.xlane.f32.xlu2 %v403_v38 }
 0x2c0   : > { %v679_v41 = vpop.eup %678 }
 0x2c1   : > { %v681_v42 = vpop.eup %680  ;;  %v335_v43 = vmul.f32 %v679_v41, %v671_v26 }
 0x2c2   : > { %v336_v46 = vmul.f32 %v681_v42, %v788_v56  ;;  %v683_v52 = vpop.eup %682 }
 0x2c3   : > { %v685_v53 = vpop.eup %684  ;;  %v482_v55 = vmul.f32 %v683_v52, %v673_v27 }
 0x2c4   : > { %v337_v47 = vpack.c.bf16 %v336_v46, %v335_v43  ;;  %v481_v58 = vmul.f32 %v685_v53, %v669_v22 }
 0x2c6   : > { %v483_v61 = vpack.c.bf16 %v482_v55, %v481_v58 }
 0x2ca   : > { %411 = vrot.lane.b32.xlu0 %v749_v3, %s704_s30 }
 0x2d1   : > { %v339_v44 = vpop.permute.xlu1 %338 }
 0x2d2   : > { %v344_v45 = vsel %vm268_vm2, %v339_v44, 0 }
 0x2d3   : > { %353 = vmatpush.bf16.msra.mxu3 %v344_v45 }
 0x2d6   : > { %630 = vmatmul.msk.bf16.vlgmr.msra.gmra.mxu3 %vm211_vm0, %v337_v47  ;;  %484 = vrot.lane.b32.xlu2 %v749_v3, %s705_s4 }
 0x329   : > { %v402_v50 = vpop.xlane.xlu0 %401 }
 0x331   : > { %v405_v51 = vpop.xlane.xlu2 %404 }
 0x332   : > { %686 = vrcp.f32 %v405_v51 }
 0x333   : > { %688 = vrcp.f32 %v402_v50 }
 0x338   : > { %v687_v54 = vpop.eup %686 }
 0x339   : > { %v485_v56 = vpop.permute.xlu2 %484  ;;  %v689_v57 = vpop.eup %688  ;;  %v409_v60 = vmul.f32 %v687_v54, %v677_v37 }
 0x33a   : > { %v490_v59 = vsel %vm268_vm2, %v485_v56, 0  ;;  %v408_v62 = vmul.f32 %v689_v57, %v675_v34 }
 0x33b   : > { %499 = vmatpush.bf16.msrb.mxu2 %v490_v59 }
 0x33c   : > { %v412_v3 = vpop.permute.xlu0 %411  ;;  %v410_v0 = vpack.c.bf16 %v409_v60, %v408_v62 }
 0x33d   : > { %v417_v63 = vsel %vm268_vm2, %v412_v3, 0 }
 0x33e   : > { %426 = vmatpush.bf16.msrb.mxu3 %v417_v63  ;;  %634 = vmatmul.msk.bf16.vlgmr.msrb.gmra.mxu2 %vm211_vm0, %v483_v61 }
 0x341   : > { %632 = vmatmul.msk.bf16.vlgmr.msrb.gmra.mxu3 %vm211_vm0, %v410_v0 }
 0x359   : > { %v355_v1 = vpop.f32.mrf.mxu3 }
 0x35a   : > { %508 = vrot.lane.b32.xlu1 %v355_v1, %s706_s5 }
 0x361   : > { %v357_v2 = vpop.f32.mrf.mxu3 }
 0x362   : > { %510 = vrot.lane.b32.xlu1 %v357_v2, %s706_s5 }
 0x3c1   : > { %v501_v6 = vpop.f32.mrf.mxu2 }
 0x3c2   : > { %524 = vrot.lane.b32.xlu2 %v501_v6, %s707_s6 }
 0x3c4   : > { %v428_v7 = vpop.f32.mrf.mxu3 }
 0x3c5   : > { %516 = vrot.lane.b32.xlu0 %v428_v7, %s708_s7 }
 0x3c9   : > { %v503_v8 = vpop.f32.mrf.mxu2 }
 0x3cc   : > { %v430_v9 = vpop.f32.mrf.mxu3  ;;  %v509_v10 = vpop.permute.xlu1 %508 }
 0x3cd   : > { %526 = vrot.lane.b32.xlu0 %v503_v8, %s707_s6  ;;  %518 = vrot.lane.b32.xlu1 %v430_v9, %s708_s7  ;;  %v530_v11 = vsel %vm211_vm0, %v798_v4, %v509_v10 }
 0x3d4   : > { %v511_v13 = vpop.permute.xlu1 %510 }
 0x3d5   : > { %v531_v18 = vsel %vm211_vm0, %v800_v5, %v511_v13 }
 0x41c   : > { %v525_v15 = vpop.permute.xlu2 %524 }
 0x437   : > { %v517_v14 = vpop.permute.xlu0 %516 }
 0x438   : > { %v533_v16 = vsel %vm532_vm3, %v530_v11, %v517_v14 }
 0x439   : > { %v536_v17 = vsel %vm535_vm4, %v533_v16, %v525_v15 }
 0x43a   : > { %539 = vst.msk [vmem:[%s201_s10] sm:$0xff] %vm538_vm5, %v536_v17 }
 0x43f   : > { %v527_v19 = vpop.permute.xlu0 %526  ;;  %v519_v20 = vpop.permute.xlu1 %518 }
 0x440   : > { %v534_v21 = vsel %vm532_vm3, %v531_v18, %v519_v20 }
 0x441   : > { %v537_v22 = vsel %vm535_vm4, %v534_v21, %v527_v19 }
 0x442   : > { %540 = vst.msk [vmem:[%s201_s10 + $0x8] sm:$0xff] %vm538_vm5, %v537_v22 }
 0x443 PF: > { %s13_s12 = sadd.s32 1, %s696_s12  }
 0x444   : > { %p10_p4 = scmp.ge.s32.totalorder %s13_s12, 4  }
 0x446   :  { %12 = sbr.rel (!%p10_p4) target bundleno = 1 (0x1), region = 68 }

// kernel: trar_forward.13
= control target key start
LH: loop header
LB: loop body
LE: loop exit
PB: predicated region body
PF: predicated region fallthrough
CT: control target
= control target key end

     0   :  { %s988_s0 = inlined_call_operand.vmem [shape: f32[32,32], index: 0, kind: input, shape index: {}]   ;;  %s989_s1 = inlined_call_operand.vmem [shape: f32[32,32], index: 1, kind: input, shape index: {}]   ;;  %s990_s2 = inlined_call_operand.vmem [shape: bf16[32,32], index: 2, kind: input, shape index: {}]   ;;  %s991_s3 = inlined_call_operand.vmem [shape: f32[1,32], index: 3, kind: input, shape index: {}]   ;;  %s992_s4 = inlined_call_operand.vmem [shape: f32[1,32], index: 4, kind: input, shape index: {}]   ;;  %s993_s5 = inlined_call_operand.vmem [shape: f32[1,32], index: 5, kind: input, shape index: {}]   ;;  %s994_s6 = inlined_call_operand.vmem [shape: bf16[32,64], index: 6, kind: input, shape index: {}]   ;;  %s995_s7 = inlined_call_operand.vmem [shape: f32[1,64], index: 7, kind: input, shape index: {}]   ;;  %s996_s8 = inlined_call_operand.vmem [shape: bf16[64,32], index: 8, kind: input, shape index: {}]   ;;  %s997_s9 = inlined_call_operand.vmem [shape: f32[1,32], index: 9, kind: input, shape index: {}]   ;;  %s998_s10 = inlined_call_operand.vmem [shape: f32[1,32], index: 10, kind: input, shape index: {}]   ;;  %s999_s11 = inlined_call_operand.vmem [shape: f32[1,32], index: 11, kind: input, shape index: {}]   ;;  %s1000_s12 = inlined_call_operand.hbm [shape: f32[32,32], index: 12, kind: output, shape index: {}]  }
   0x1   :  { %v633_v0 = vld [vmem:[%s990_s2 + $0x8] sm:$0xff]  ;;  %v632_v1 = vld [vmem:[%s990_s2] sm:$0xff] }
   0x2   :  { %v43_v2 = vld [vmem:[%s988_s0] sm:$0xff]  ;;  %82 = vmatpush.bf16.msra.mxu0 %v633_v0  ;;  %v44_v3 = vld [vmem:[%s988_s0 + $0x8] sm:$0xff] }
   0x3   :  { %17 = vsyncpa [#allocation3], 0  ;;  %v47_v4 = vpack.c.bf16 %v44_v3, %v43_v2  ;;  %vm69_vm0 = vcmask 261120   ;;  %v45_v5 = vld [vmem:[%s988_s0 + $0x10] sm:$0xff]  ;;  %v46_v6 = vld [vmem:[%s988_s0 + $0x18] sm:$0xff]  ;;  %v718_v29 = vmov 32.0  }
   0x4   :  { %v48_v7 = vpack.c.bf16 %v46_v6, %v45_v5  ;;  %v649_v8 = vld [vmem:[%s991_s3] ss:$0 sm:$0xff]  ;;  %v96_v15 = vld [vmem:[%s989_s1 + $0x8] sm:$0xff]  ;;  %v97_v20 = vld [vmem:[%s989_s1 + $0x10] sm:$0xff]  ;;  %656 = vrcp.f32 %v718_v29  ;;  %v719_v56 = vmov 31.0   ;;  %s582_s20 = sshll.u32 %s1000_s12, 4  ;;  %s583_s20 = int_to_ptr.hbm [resolvable:$true] %s582_s20 }
   0x5   :  { %v95_v10 = vld [vmem:[%s989_s1] sm:$0xff]  ;;  %v98_v25 = vld [vmem:[%s989_s1 + $0x18] sm:$0xff]  ;;  %658 = vrcp.f32 %v719_v56  ;;  %s721_s21 = smov 128   ;;  %s722_s1 = smov 8  }
   0x6   :  { %83 = vmatpush.bf16.msra.mxu0 %v632_v1 }
   0x9   :  { %602 = vmatmul.msk.bf16.vlgmr.msra.gmra.mxu0 %vm69_vm0, %v47_v4 }
   0xa   :  { %v657_v30 = vpop.eup %656 }
   0xb   :  { %v118_v31 = vmul.f32 32.0, %v657_v30  ;;  %vm122_vm1 = vweird.f32 %v657_v30  ;;  %v659_v57 = vpop.eup %658 }
   0xc   :  { %v149_v58 = vmul.f32 31.0, %v659_v57  ;;  %vm153_vm2 = vweird.f32 %v659_v57 }
   0xd   :  { %v119_v32 = vsub.f32 1.0, %v118_v31 }
   0xe   :  { %v150_v59 = vsub.f32 1.0, %v149_v58 }
   0xf   :  { %v120_v33 = vmul.f32 %v657_v30, %v119_v32 }
  0x10   :  { %v151_v60 = vmul.f32 %v659_v57, %v150_v59 }
  0x11   :  { %v121_v34 = vadd.f32 %v657_v30, %v120_v33 }
  0x12   :  { %v152_v61 = vadd.f32 %v659_v57, %v151_v60 }
  0x13   :  { %v827_v35 = vsel %vm122_vm1, %v657_v30, %v121_v34 }
  0x14   :  { %v853_v62 = vsel %vm153_vm2, %v659_v57, %v152_v61 }
  0x19   :  { %603 = vmatmul.msk.bf16.gmra.mxu0 %vm69_vm0, %v48_v7  ;;  %v635_v7 = vld [vmem:[%s994_s6 + $0x8] sm:$0xff] }
  0x1a   :  { %319 = vmatpush.bf16.msra.mxu1 %v635_v7 }
  0x86   :  { %v85_v9 = vpop.f32.mrf.mxu0 }
  0x87   :  { %v86_v11 = vadd.f32 %v649_v8, %v85_v9 }
  0x89   :  { %v99_v12 = vadd.f32 %v95_v10, %v86_v11  ;;  %v634_v10 = vld [vmem:[%s994_s6] sm:$0xff] }
  0x8a   :  { %320 = vmatpush.bf16.msra.mxu1 %v634_v10 }
  0x8b   :  { %v105_v13 = vsel %vm69_vm0, %v99_v12, 0.0 }
  0x8c   :  { %106 = vadd.xlane.f32.xlu0 %v105_v13 }
  0x8e   :  { %v87_v14 = vpop.f32.mrf.mxu0 }
  0x8f   :  { %v88_v16 = vadd.f32 %v649_v8, %v87_v14 }
  0x91   :  { %v100_v17 = vadd.f32 %v96_v15, %v88_v16 }
  0x93   :  { %v108_v18 = vsel %vm69_vm0, %v100_v17, 0.0 }
  0x94   :  { %109 = vadd.xlane.f32.xlu0 %v108_v18 }
  0x96   :  { %v90_v19 = vpop.f32.mrf.mxu0 }
  0x97   :  { %v91_v21 = vadd.f32 %v649_v8, %v90_v19 }
  0x99   :  { %v101_v22 = vadd.f32 %v97_v20, %v91_v21 }
  0x9b   :  { %v111_v23 = vsel %vm69_vm0, %v101_v22, 0.0 }
  0x9c   :  { %112 = vadd.xlane.f32.xlu1 %v111_v23 }
  0x9e   :  { %v92_v24 = vpop.f32.mrf.mxu0 }
  0x9f   :  { %v93_v26 = vadd.f32 %v649_v8, %v92_v24 }
  0xa1   :  { %v102_v27 = vadd.f32 %v98_v25, %v93_v26 }
  0xa3   :  { %v114_v28 = vsel %vm69_vm0, %v102_v27, 0.0 }
  0xa4   :  { %115 = vadd.xlane.f32.xlu1 %v114_v28 }
  0xff   :  { %v107_v36 = vpop.xlane.xlu0 %106 }
 0x100   :  { %v124_v37 = vmul.f32 %v827_v35, %v107_v36 }
 0x102   :  { %v830_v38 = vsub.f32 %v99_v12, %v124_v37 }
 0x104   :  { %v132_v39 = vmul.f32 %v830_v38, %v830_v38 }
 0x106   :  { %v136_v40 = vsel %vm69_vm0, %v132_v39, 0.0 }
 0x107   :  { %137 = vadd.xlane.f32.xlu2 %v136_v40  ;;  %v110_v41 = vpop.xlane.xlu0 %109 }
 0x108   :  { %v125_v42 = vmul.f32 %v827_v35, %v110_v41 }
 0x10a   :  { %v836_v43 = vsub.f32 %v100_v17, %v125_v42 }
 0x10c   :  { %v133_v44 = vmul.f32 %v836_v43, %v836_v43 }
 0x10e   :  { %v139_v45 = vsel %vm69_vm0, %v133_v44, 0.0 }
 0x10f   :  { %v113_v46 = vpop.xlane.xlu1 %112  ;;  %140 = vadd.xlane.f32.xlu2 %v139_v45 }
 0x110   :  { %v126_v47 = vmul.f32 %v827_v35, %v113_v46 }
 0x112   :  { %v842_v48 = vsub.f32 %v101_v22, %v126_v47 }
 0x114   :  { %v134_v49 = vmul.f32 %v842_v48, %v842_v48 }
 0x116   :  { %v142_v50 = vsel %vm69_vm0, %v134_v49, 0.0 }
 0x117   :  { %v116_v51 = vpop.xlane.xlu1 %115  ;;  %143 = vadd.xlane.f32.xlu0 %v142_v50 }
 0x118   :  { %v127_v52 = vmul.f32 %v827_v35, %v116_v51 }
 0x11a   :  { %v848_v53 = vsub.f32 %v102_v27, %v127_v52 }
 0x11c   :  { %v135_v54 = vmul.f32 %v848_v53, %v848_v53 }
 0x11e   :  { %v145_v55 = vsel %vm69_vm0, %v135_v54, 0.0 }
 0x11f   :  { %146 = vadd.xlane.f32.xlu1 %v145_v55 }
 0x17a   :  { %v138_v63 = vpop.xlane.xlu2 %137 }
 0x17b   :  { %v155_v0 = vmul.f32 %v853_v62, %v138_v63 }
 0x17d   :  { %660 = vrsqrt.f32 %v155_v0  ;;  %vm173_vm3 = vcmp.eq.f32.partialorder %v155_v0, inf  ;;  %v176_v17 = vand.u32 2147483648, %v155_v0  ;;  %vm175_vm4 = vcmp.eq.f32.partialorder %v155_v0, 0.0 }
 0x182   :  { %v141_v1 = vpop.xlane.xlu2 %140 }
 0x183   :  { %v661_v2 = vpop.eup %660  ;;  %v156_v3 = vmul.f32 %v853_v62, %v141_v1 }
 0x184   :  { %v167_v4 = vmul.f32 %v661_v2, %v155_v0 }
 0x185   :  { %662 = vrsqrt.f32 %v156_v3  ;;  %vm185_vm5 = vcmp.eq.f32.partialorder %v156_v3, inf  ;;  %v188_v30 = vand.u32 2147483648, %v156_v3  ;;  %vm187_vm6 = vcmp.eq.f32.partialorder %v156_v3, 0.0 }
 0x186   :  { %v168_v5 = vmul.f32 %v661_v2, %v167_v4 }
 0x188   :  { %v169_v6 = vmul.f32 0.5, %v168_v5 }
 0x18a   :  { %v170_v8 = vsub.f32 1.5, %v169_v6  ;;  %v144_v9 = vpop.xlane.xlu0 %143 }
 0x18b   :  { %v663_v11 = vpop.eup %662  ;;  %v157_v12 = vmul.f32 %v853_v62, %v144_v9 }
 0x18c   :  { %v171_v13 = vmul.f32 %v661_v2, %v170_v8  ;;  %v179_v14 = vmul.f32 %v663_v11, %v156_v3 }
 0x18d   :  { %664 = vrsqrt.f32 %v157_v12  ;;  %vm197_vm7 = vcmp.eq.f32.partialorder %v157_v12, inf  ;;  %v200_v47 = vand.u32 2147483648, %v157_v12  ;;  %vm199_vm8 = vcmp.eq.f32.partialorder %v157_v12, 0.0 }
 0x18e   :  { %v172_v15 = vmul.f32 %v171_v13, %v155_v0  ;;  %v180_v16 = vmul.f32 %v663_v11, %v179_v14 }
 0x190   :  { %v174_v18 = vsel %vm173_vm3, %v155_v0, %v172_v15  ;;  %v181_v19 = vmul.f32 0.5, %v180_v16  ;;  %v650_v0 = vld [vmem:[%s992_s4] ss:$0 sm:$0xff] }
 0x191   :  { %v177_v20 = vsel %vm175_vm4, %v176_v17, %v174_v18  ;;  %v163_v15 = vmul.f32 %v650_v0, %v836_v43 }
 0x192   :  { %v182_v21 = vsub.f32 1.5, %v181_v19  ;;  %v147_v22 = vpop.xlane.xlu1 %146  ;;  %v214_v23 = vadd.f32 1e-06, %v177_v20  ;;  %v651_v20 = vld [vmem:[%s993_s5] ss:$0 sm:$0xff] }
 0x193   :  { %v665_v24 = vpop.eup %664  ;;  %v865_v25 = vmul.f32 %v853_v62, %v147_v22 }
 0x194   :  { %v183_v26 = vmul.f32 %v663_v11, %v182_v21  ;;  %v191_v27 = vmul.f32 %v665_v24, %v157_v12  ;;  %666 = vrcp.f32 %v214_v23  ;;  %v229_v57 = vand.u32 2147483648, %v214_v23 }
 0x195   :  { %668 = vrsqrt.f32 %v865_v25  ;;  %vm223_vm10 = vweird.f32 %v214_v23  ;;  %v227_v59 = vand.u32 2147483647, %v214_v23  ;;  %vm209_vm12 = vcmp.eq.f32.partialorder %v865_v25, inf }
 0x196   :  { %v184_v28 = vmul.f32 %v183_v26, %v156_v3  ;;  %v192_v29 = vmul.f32 %v665_v24, %v191_v27  ;;  %v212_v4 = vand.u32 2147483648, %v865_v25  ;;  %v230_v5 = vor.u32 1.1754944e-38, %v229_v57 }
 0x197   :  { %vm228_vm13 = vcmp.eq.f32.partialorder %v227_v59, 8.507059e+37  ;;  %vm211_vm15 = vcmp.eq.f32.partialorder %v865_v25, 0.0  ;;  %v162_v11 = vmul.f32 %v650_v0, %v830_v38 }
 0x198   :  { %v186_v31 = vsel %vm185_vm5, %v156_v3, %v184_v28  ;;  %v193_v32 = vmul.f32 0.5, %v192_v29 }
 0x199   :  { %v189_v33 = vsel %vm187_vm6, %v188_v30, %v186_v31 }
 0x19a   :  { %v667_v34 = vpop.eup %666  ;;  %v194_v36 = vsub.f32 1.5, %v193_v32  ;;  %v215_v37 = vadd.f32 1e-06, %v189_v33 }
 0x19b   :  { %v669_v39 = vpop.eup %668  ;;  %v219_v40 = vmul.f32 %v667_v34, %v214_v23  ;;  %vm224_vm9 = vweird.f32 %v667_v34 }
 0x19c   :  { %v195_v41 = vmul.f32 %v665_v24, %v194_v36  ;;  %v203_v42 = vmul.f32 %v669_v39, %v865_v25  ;;  %670 = vrcp.f32 %v215_v37  ;;  %vm869_vm11 = vmor %vm223_vm10, %vm224_vm9  ;;  %v244_v6 = vand.u32 2147483648, %v215_v37 }
 0x19d   :  { %v220_v44 = vsub.f32 1.0, %v219_v40  ;;  %v242_v8 = vand.u32 2147483647, %v215_v37  ;;  %vm238_vm1 = vweird.f32 %v215_v37 }
 0x19e   :  { %v196_v45 = vmul.f32 %v195_v41, %v157_v12  ;;  %v204_v46 = vmul.f32 %v669_v39, %v203_v42  ;;  %v245_v16 = vor.u32 1.1754944e-38, %v244_v6  ;;  %v164_v41 = vmul.f32 %v650_v0, %v842_v48  ;;  %v639_v48 = vld [vmem:[%s996_s8 + $0x18] sm:$0xff] }
 0x19f   :  { %v221_v49 = vmul.f32 %v667_v34, %v220_v44  ;;  %vm243_vm3 = vcmp.eq.f32.partialorder %v242_v8, 8.507059e+37  ;;  %385 = vmatpush.bf16.msra.mxu2 %v639_v48  ;;  %640 = vmatpush.bf16.msra.mxu3 %v639_v48 }
 0x1a0   :  { %v198_v50 = vsel %vm197_vm7, %v157_v12, %v196_v45  ;;  %v205_v51 = vmul.f32 0.5, %v204_v46  ;;  %v165_v45 = vmul.f32 %v650_v0, %v848_v53  ;;  %v638_v53 = vld [vmem:[%s996_s8 + $0x10] sm:$0xff] }
 0x1a1   :  { %v222_v52 = vadd.f32 %v667_v34, %v221_v49  ;;  %v201_v54 = vsel %vm199_vm8, %v200_v47, %v198_v50 }
 0x1a2   :  { %v671_v55 = vpop.eup %670  ;;  %v206_v56 = vsub.f32 1.5, %v205_v51  ;;  %v216_v58 = vadd.f32 1e-06, %v201_v54 }
 0x1a3   :  { %v234_v60 = vmul.f32 %v671_v55, %v215_v37  ;;  %v226_v1 = vsel %vm869_vm11, %v667_v34, %v222_v52  ;;  %vm239_vm14 = vweird.f32 %v671_v55  ;;  %386 = vmatpush.bf16.msra.mxu2 %v638_v53  ;;  %641 = vmatpush.bf16.msra.mxu3 %v638_v53 }
 0x1a4   :  { %v207_v61 = vmul.f32 %v669_v39, %v206_v56  ;;  %672 = vrcp.f32 %v216_v58  ;;  %v231_v10 = vsel %vm228_vm13, %v230_v5, %v226_v1  ;;  %vm240_vm2 = vmor %vm238_vm1, %vm239_vm14  ;;  %v259_v29 = vand.u32 2147483648, %v216_v58  ;;  %v636_v56 = vld [vmem:[%s996_s8] sm:$0xff] }
 0x1a5   :  { %v235_v2 = vsub.f32 1.0, %v234_v60  ;;  %v232_v18 = vmul.f32 %v231_v10, %v162_v11  ;;  %vm253_vm5 = vweird.f32 %v216_v58  ;;  %v257_v30 = vand.u32 2147483647, %v216_v58 }
 0x1a6   :  { %v208_v3 = vmul.f32 %v207_v61, %v865_v25  ;;  %v260_v34 = vor.u32 1.1754944e-38, %v259_v29 }
 0x1a7   :  { %v236_v7 = vmul.f32 %v671_v55, %v235_v2  ;;  %v888_v24 = vadd.f32 %v651_v20, %v232_v18  ;;  %vm258_vm7 = vcmp.eq.f32.partialorder %v257_v30, 8.507059e+37 }
 0x1a8   :  { %v210_v9 = vsel %vm209_vm12, %v865_v25, %v208_v3  ;;  %vm374_vm12 = vcmask 523264  }
 0x1a9   :  { %v237_v12 = vadd.f32 %v671_v55, %v236_v7  ;;  %v213_v13 = vsel %vm211_vm15, %v212_v4, %v210_v9  ;;  %v653_v9 = vld [vmem:[%s997_s9] ss:$0 sm:$0xff] }
 0x1aa   :  { %v673_v14 = vpop.eup %672  ;;  %v217_v17 = vadd.f32 1e-06, %v213_v13 }
 0x1ab   :  { %v241_v19 = vsel %vm240_vm2, %v671_v55, %v237_v12  ;;  %v249_v21 = vmul.f32 %v673_v14, %v216_v58  ;;  %vm254_vm4 = vweird.f32 %v673_v14  ;;  %v637_v55 = vld [vmem:[%s996_s8 + $0x8] sm:$0xff]  ;;  %v652_v58 = vld [vmem:[%s995_s7] ss:$0 sm:$0xff] }
 0x1ac   :  { %v246_v22 = vsel %vm243_vm3, %v245_v16, %v241_v19  ;;  %674 = vrcp.f32 %v217_v17  ;;  %vm255_vm6 = vmor %vm253_vm5, %vm254_vm4  ;;  %v274_v36 = vand.u32 2147483648, %v217_v17  ;;  %v272_v39 = vand.u32 2147483647, %v217_v17  ;;  %387 = vmatpush.bf16.msra.mxu2 %v637_v55  ;;  %642 = vmatpush.bf16.msra.mxu3 %v637_v55 }
 0x1ad   :  { %v247_v38 = vmul.f32 %v246_v22, %v163_v15  ;;  %v250_v23 = vsub.f32 1.0, %v249_v21  ;;  %vm268_vm9 = vweird.f32 %v217_v17 }
 0x1ae   :  { %v275_v44 = vor.u32 1.1754944e-38, %v274_v36  ;;  %vm273_vm11 = vcmp.eq.f32.partialorder %v272_v39, 8.507059e+37 }
 0x1af   :  { %v890_v25 = vadd.f32 %v651_v20, %v247_v38  ;;  %v251_v43 = vmul.f32 %v673_v14, %v250_v23 }
 0x1b0   :  { %388 = vmatpush.bf16.msra.mxu2 %v636_v56  ;;  %643 = vmatpush.bf16.msra.mxu3 %v636_v56 }
 0x1b1   :  { %v285_v26 = vpack.c.bf16 %v890_v25, %v888_v24  ;;  %v252_v27 = vadd.f32 %v673_v14, %v251_v43 }
 0x1b2   :  { %v675_v28 = vpop.eup %674 }
 0x1b3   :  { %612 = vmatmul.msk.bf16.vlgmr.msra.gmra.mxu1 %vm69_vm0, %v285_v26  ;;  %v264_v31 = vmul.f32 %v675_v28, %v217_v17  ;;  %v256_v32 = vsel %vm255_vm6, %v673_v14, %v252_v27  ;;  %vm269_vm8 = vweird.f32 %v675_v28 }
 0x1b4   :  { %v261_v40 = vsel %vm258_vm7, %v260_v34, %v256_v32  ;;  %vm270_vm10 = vmor %vm268_vm9, %vm269_vm8 }
 0x1b5   :  { %v265_v33 = vsub.f32 1.0, %v264_v31  ;;  %v262_v46 = vmul.f32 %v261_v40, %v164_v41 }
 0x1b7   :  { %v266_v37 = vmul.f32 %v675_v28, %v265_v33  ;;  %v283_v51 = vadd.f32 %v651_v20, %v262_v46 }
 0x1b9   :  { %v267_v42 = vadd.f32 %v675_v28, %v266_v37 }
 0x1bb   :  { %v271_v47 = vsel %vm270_vm10, %v675_v28, %v267_v42 }
 0x1bc   :  { %v276_v49 = vsel %vm273_vm11, %v275_v44, %v271_v47 }
 0x1bd   :  { %v277_v50 = vmul.f32 %v276_v49, %v165_v45 }
 0x1bf   :  { %v284_v52 = vadd.f32 %v651_v20, %v277_v50 }
 0x1c1   :  { %v286_v54 = vpack.c.bf16 %v284_v52, %v283_v51 }
 0x1c3   :  { %613 = vmatmul.msk.bf16.gmra.mxu1 %vm69_vm0, %v286_v54 }
 0x230   :  { %v322_v57 = vpop.f32.mrf.mxu1 }
 0x231   :  { %v323_v59 = vadd.f32 %v652_v58, %v322_v57 }
 0x233   :  { %v332_v63 = vmax.f32 %v323_v59, 0.0 }
 0x238   :  { %v324_v60 = vpop.f32.mrf.mxu1 }
 0x239   :  { %v325_v61 = vadd.f32 %v652_v58, %v324_v60 }
 0x23b   :  { %v333_v0 = vmax.f32 %v325_v61, 0.0 }
 0x23d   :  { %v336_v1 = vpack.c.bf16 %v333_v0, %v332_v63 }
 0x23f   :  { %630 = vmatmul.msk.bf16.vlgmr.msra.gmra.mxu2 %vm374_vm12, %v336_v1 }
 0x240   :  { %v327_v2 = vpop.f32.mrf.mxu1 }
 0x241   :  { %v328_v3 = vadd.f32 %v652_v58, %v327_v2 }
 0x243   :  { %v334_v6 = vmax.f32 %v328_v3, 0.0 }
 0x248   :  { %v329_v4 = vpop.f32.mrf.mxu1 }
 0x249   :  { %v330_v5 = vadd.f32 %v652_v58, %v329_v4 }
 0x24b   :  { %v335_v7 = vmax.f32 %v330_v5, 0.0 }
 0x24d   :  { %v337_v8 = vpack.c.bf16 %v335_v7, %v334_v6 }
 0x24f   :  { %631 = vmatmul.msk.bf16.vlgmr.msra.gmra.mxu3 %vm374_vm12, %v337_v8 }
 0x2c2   :  { %v390_v10 = vpop.f32.mrf.mxu2 }
 0x2c3   :  { %v391_v11 = vadd.f32 %v653_v9, %v390_v10 }
 0x2c5   :  { %v400_v12 = vadd.f32 %v391_v11, %v888_v24 }
 0x2c7   :  { %v406_v13 = vsel %vm69_vm0, %v400_v12, 0.0 }
 0x2c8   :  { %407 = vadd.xlane.f32.xlu2 %v406_v13 }
 0x2ca   :  { %v392_v14 = vpop.f32.mrf.mxu2 }
 0x2cb   :  { %v393_v15 = vadd.f32 %v653_v9, %v392_v14 }
 0x2cd   :  { %v401_v16 = vadd.f32 %v393_v15, %v890_v25 }
 0x2cf   :  { %v409_v17 = vsel %vm69_vm0, %v401_v16, 0.0 }
 0x2d0   :  { %410 = vadd.xlane.f32.xlu0 %v409_v17 }
 0x2d2   :  { %v395_v18 = vpop.f32.mrf.mxu3 }
 0x2d3   :  { %v396_v19 = vadd.f32 %v653_v9, %v395_v18 }
 0x2d5   :  { %v402_v20 = vadd.f32 %v396_v19, %v283_v51 }
 0x2d7   :  { %v412_v21 = vsel %vm69_vm0, %v402_v20, 0.0 }
 0x2d8   :  { %413 = vadd.xlane.f32.xlu1 %v412_v21 }
 0x2da   :  { %v397_v22 = vpop.f32.mrf.mxu3 }
 0x2db   :  { %v398_v38 = vadd.f32 %v653_v9, %v397_v22 }
 0x2dd   :  { %v403_v23 = vadd.f32 %v398_v38, %v284_v52 }
 0x2df   :  { %v415_v24 = vsel %vm69_vm0, %v403_v23, 0.0 }
 0x2e0   :  { %416 = vadd.xlane.f32.xlu2 %v415_v24 }
 0x33b   :  { %v408_v43 = vpop.xlane.xlu2 %407 }
 0x33c   :  { %v418_v26 = vmul.f32 %v408_v43, %v827_v35  ;;  %v957_v43 = vld [vmem:[%s998_s10] ss:$0 sm:$0xff] }
 0x33e   :  { %v923_v27 = vsub.f32 %v400_v12, %v418_v26 }
 0x340   :  { %v426_v25 = vmul.f32 %v923_v27, %v923_v27 }
 0x342   :  { %v430_v28 = vsel %vm69_vm0, %v426_v25, 0.0 }
 0x343   :  { %431 = vadd.xlane.f32.xlu0 %v430_v28  ;;  %v411_v29 = vpop.xlane.xlu0 %410 }
 0x344   :  { %v419_v30 = vmul.f32 %v411_v29, %v827_v35 }
 0x346   :  { %v929_v31 = vsub.f32 %v401_v16, %v419_v30 }
 0x348   :  { %v427_v32 = vmul.f32 %v929_v31, %v929_v31 }
 0x34a   :  { %v433_v33 = vsel %vm69_vm0, %v427_v32, 0.0 }
 0x34b   :  { %v414_v34 = vpop.xlane.xlu1 %413  ;;  %434 = vadd.xlane.f32.xlu1 %v433_v33 }
 0x34c   :  { %v420_v36 = vmul.f32 %v414_v34, %v827_v35 }
 0x34e   :  { %v935_v37 = vsub.f32 %v402_v20, %v420_v36 }
 0x350   :  { %v428_v39 = vmul.f32 %v935_v37, %v935_v37 }
 0x352   :  { %v436_v40 = vsel %vm69_vm0, %v428_v39, 0.0 }
 0x353   :  { %v417_v41 = vpop.xlane.xlu2 %416  ;;  %437 = vadd.xlane.f32.xlu2 %v436_v40 }
 0x354   :  { %v421_v42 = vmul.f32 %v417_v41, %v827_v35  ;;  %v449_v41 = vmul.f32 %v957_v43, %v923_v27 }
 0x356   :  { %v941_v44 = vsub.f32 %v403_v23, %v421_v42 }
 0x358   :  { %v429_v45 = vmul.f32 %v941_v44, %v941_v44 }
 0x35a   :  { %v439_v46 = vsel %vm69_vm0, %v429_v45, 0.0 }
 0x35b   :  { %440 = vadd.xlane.f32.xlu0 %v439_v46  ;;  %v964_v46 = vld [vmem:[%s999_s11] ss:$0 sm:$0xff]  ;;  %s720_s11 = smov [#allocation2]  }
 0x35c   :  { %s580_s0 = sshll.u32 %s720_s11, 4  ;;  %s581_s0 = int_to_ptr.vmem [resolvable:$true] %s580_s0 }
 0x3b6   :  { %v432_v47 = vpop.xlane.xlu0 %431 }
 0x3b7   :  { %v442_v49 = vmul.f32 %v432_v47, %v853_v62 }
 0x3b9   :  { %676 = vrsqrt.f32 %v442_v49  ;;  %vm460_vm13 = vcmp.eq.f32.partialorder %v442_v49, inf  ;;  %v463_v63 = vand.u32 2147483648, %v442_v49  ;;  %vm462_vm14 = vcmp.eq.f32.partialorder %v442_v49, 0.0 }
 0x3be   :  { %v435_v50 = vpop.xlane.xlu1 %434 }
 0x3bf   :  { %v677_v51 = vpop.eup %676  ;;  %v443_v52 = vmul.f32 %v435_v50, %v853_v62 }
 0x3c0   :  { %v454_v54 = vmul.f32 %v677_v51, %v442_v49 }
 0x3c1   :  { %678 = vrsqrt.f32 %v443_v52  ;;  %vm472_vm15 = vcmp.eq.f32.partialorder %v443_v52, inf  ;;  %v475_v12 = vand.u32 2147483648, %v443_v52  ;;  %vm474_vm1 = vcmp.eq.f32.partialorder %v443_v52, 0.0 }
 0x3c2   :  { %v455_v48 = vmul.f32 %v677_v51, %v454_v54 }
 0x3c4   :  { %v456_v35 = vmul.f32 0.5, %v455_v48 }
 0x3c6   :  { %v457_v53 = vsub.f32 1.5, %v456_v35  ;;  %v438_v55 = vpop.xlane.xlu2 %437 }
 0x3c7   :  { %v679_v56 = vpop.eup %678  ;;  %v444_v57 = vmul.f32 %v438_v55, %v853_v62 }
 0x3c8   :  { %v458_v58 = vmul.f32 %v677_v51, %v457_v53  ;;  %v466_v59 = vmul.f32 %v679_v56, %v443_v52 }
 0x3c9   :  { %680 = vrsqrt.f32 %v444_v57  ;;  %vm484_vm2 = vcmp.eq.f32.partialorder %v444_v57, inf  ;;  %v487_v26 = vand.u32 2147483648, %v444_v57  ;;  %vm486_vm4 = vcmp.eq.f32.partialorder %v444_v57, 0.0 }
 0x3ca   :  { %v459_v60 = vmul.f32 %v458_v58, %v442_v49  ;;  %v467_v61 = vmul.f32 %v679_v56, %v466_v59 }
 0x3cc   :  { %v461_v0 = vsel %vm460_vm13, %v442_v49, %v459_v60  ;;  %v468_v1 = vmul.f32 0.5, %v467_v61  ;;  %v450_v61 = vmul.f32 %v957_v43, %v929_v31 }
 0x3cd   :  { %v464_v2 = vsel %vm462_vm14, %v463_v63, %v461_v0 }
 0x3ce   :  { %v501_v3 = vadd.f32 1e-06, %v464_v2  ;;  %v469_v4 = vsub.f32 1.5, %v468_v1  ;;  %v441_v5 = vpop.xlane.xlu0 %440 }
 0x3cf   :  { %v681_v6 = vpop.eup %680  ;;  %v950_v7 = vmul.f32 %v441_v5, %v853_v62 }
 0x3d0   :  { %682 = vrcp.f32 %v501_v3  ;;  %v470_v8 = vmul.f32 %v679_v56, %v469_v4  ;;  %v478_v9 = vmul.f32 %v681_v6, %v444_v57  ;;  %v516_v24 = vand.u32 2147483648, %v501_v3 }
 0x3d1   :  { %684 = vrsqrt.f32 %v950_v7  ;;  %v514_v28 = vand.u32 2147483647, %v501_v3  ;;  %vm510_vm5 = vweird.f32 %v501_v3  ;;  %vm496_vm8 = vcmp.eq.f32.partialorder %v950_v7, inf }
 0x3d2   :  { %v471_v10 = vmul.f32 %v470_v8, %v443_v52  ;;  %v479_v11 = vmul.f32 %v681_v6, %v478_v9  ;;  %v517_v40 = vor.u32 1.1754944e-38, %v516_v24  ;;  %v499_v54 = vand.u32 2147483648, %v950_v7 }
 0x3d3   :  { %vm515_vm7 = vcmp.eq.f32.partialorder %v514_v28, 8.507059e+37  ;;  %vm498_vm10 = vcmp.eq.f32.partialorder %v950_v7, 0.0 }
 0x3d4   :  { %v473_v13 = vsel %vm472_vm15, %v443_v52, %v471_v10  ;;  %v480_v14 = vmul.f32 0.5, %v479_v11  ;;  %v451_v10 = vmul.f32 %v957_v43, %v935_v37  ;;  %v452_v37 = vmul.f32 %v957_v43, %v941_v44 }
 0x3d5   :  { %v476_v15 = vsel %vm474_vm1, %v475_v12, %v473_v13 }
 0x3d6   :  { %v683_v16 = vpop.eup %682  ;;  %v502_v17 = vadd.f32 1e-06, %v476_v15  ;;  %v481_v18 = vsub.f32 1.5, %v480_v14 }
 0x3d7   :  { %v685_v19 = vpop.eup %684  ;;  %v506_v20 = vmul.f32 %v683_v16, %v501_v3  ;;  %vm511_vm3 = vweird.f32 %v683_v16 }
 0x3d8   :  { %686 = vrcp.f32 %v502_v17  ;;  %v482_v62 = vmul.f32 %v681_v6, %v481_v18  ;;  %v490_v21 = vmul.f32 %v685_v19, %v950_v7  ;;  %vm512_vm6 = vmor %vm510_vm5, %vm511_vm3  ;;  %v531_v27 = vand.u32 2147483648, %v502_v17 }
 0x3d9   :  { %v507_v22 = vsub.f32 1.0, %v506_v20  ;;  %v529_v35 = vand.u32 2147483647, %v502_v17  ;;  %vm525_vm11 = vweird.f32 %v502_v17 }
 0x3da   :  { %v483_v38 = vmul.f32 %v482_v62, %v444_v57  ;;  %v491_v23 = vmul.f32 %v685_v19, %v490_v21  ;;  %v532_v60 = vor.u32 1.1754944e-38, %v531_v27 }
 0x3db   :  { %v508_v25 = vmul.f32 %v683_v16, %v507_v22  ;;  %vm530_vm13 = vcmp.eq.f32.partialorder %v529_v35, 8.507059e+37 }
 0x3dc   :  { %v485_v29 = vsel %vm484_vm2, %v444_v57, %v483_v38  ;;  %v492_v30 = vmul.f32 0.5, %v491_v23 }
 0x3dd   :  { %v488_v32 = vsel %vm486_vm4, %v487_v26, %v485_v29  ;;  %v509_v33 = vadd.f32 %v683_v16, %v508_v25 }
 0x3de   :  { %v687_v34 = vpop.eup %686  ;;  %v503_v36 = vadd.f32 1e-06, %v488_v32  ;;  %v493_v39 = vsub.f32 1.5, %v492_v30 }
 0x3df   :  { %v513_v42 = vsel %vm512_vm6, %v683_v16, %v509_v33  ;;  %v521_v45 = vmul.f32 %v687_v34, %v502_v17  ;;  %vm526_vm9 = vweird.f32 %v687_v34 }
 0x3e0   :  { %688 = vrcp.f32 %v503_v36  ;;  %v494_v47 = vmul.f32 %v685_v19, %v493_v39  ;;  %v518_v49 = vsel %vm515_vm7, %v517_v40, %v513_v42  ;;  %vm527_vm12 = vmor %vm525_vm11, %vm526_vm9  ;;  %v546_v4 = vand.u32 2147483648, %v503_v36 }
 0x3e1   :  { %v519_v50 = vmul.f32 %v518_v49, %v449_v41  ;;  %v522_v51 = vsub.f32 1.0, %v521_v45  ;;  %v544_v6 = vand.u32 2147483647, %v503_v36  ;;  %vm540_vm15 = vweird.f32 %v503_v36 }
 0x3e2   :  { %v495_v52 = vmul.f32 %v494_v47, %v950_v7  ;;  %v547_v31 = vor.u32 1.1754944e-38, %v546_v4 }
 0x3e3   :  { %v523_v48 = vmul.f32 %v687_v34, %v522_v51  ;;  %v568_v53 = vadd.f32 %v964_v46, %v519_v50  ;;  %vm545_vm2 = vcmp.eq.f32.partialorder %v544_v6, 8.507059e+37 }
 0x3e4   :  { %v497_v55 = vsel %vm496_vm8, %v950_v7, %v495_v52 }
 0x3e5   :  { %v500_v56 = vsel %vm498_vm10, %v499_v54, %v497_v55  ;;  %v524_v57 = vadd.f32 %v687_v34, %v523_v48  ;;  %572 = vst.msk [vmem:[#allocation2] sm:$0xff] %vm69_vm0, %v568_v53 }
 0x3e6   :  { %v689_v58 = vpop.eup %688  ;;  %v504_v59 = vadd.f32 1e-06, %v500_v56 }
 0x3e7   :  { %v528_v63 = vsel %vm527_vm12, %v687_v34, %v524_v57  ;;  %v536_v0 = vmul.f32 %v689_v58, %v503_v36  ;;  %vm541_vm14 = vweird.f32 %v689_v58 }
 0x3e8   :  { %690 = vrcp.f32 %v504_v59  ;;  %v533_v1 = vsel %vm530_vm13, %v532_v60, %v528_v63  ;;  %vm542_vm1 = vmor %vm540_vm15, %vm541_vm14  ;;  %v561_v16 = vand.u32 2147483648, %v504_v59  ;;  %v559_v18 = vand.u32 2147483647, %v504_v59 }
 0x3e9   :  { %v534_v2 = vmul.f32 %v533_v1, %v450_v61  ;;  %v537_v3 = vsub.f32 1.0, %v536_v0  ;;  %vm555_vm4 = vweird.f32 %v504_v59 }
 0x3ea   :  { %v562_v62 = vor.u32 1.1754944e-38, %v561_v16  ;;  %vm560_vm6 = vcmp.eq.f32.partialorder %v559_v18, 8.507059e+37 }
 0x3eb   :  { %v538_v5 = vmul.f32 %v689_v58, %v537_v3  ;;  %v569_v7 = vadd.f32 %v964_v46, %v534_v2 }
 0x3ed   :  { %v539_v8 = vadd.f32 %v689_v58, %v538_v5  ;;  %573 = vst.msk [vmem:[#allocation2 + $0x8] sm:$0xff] %vm69_vm0, %v569_v7 }
 0x3ee   :  { %v691_v9 = vpop.eup %690 }
 0x3ef   :  { %v543_v11 = vsel %vm542_vm1, %v689_v58, %v539_v8  ;;  %v551_v12 = vmul.f32 %v691_v9, %v504_v59  ;;  %vm556_vm3 = vweird.f32 %v691_v9 }
 0x3f0   :  { %v548_v13 = vsel %vm545_vm2, %v547_v31, %v543_v11  ;;  %vm557_vm5 = vmor %vm555_vm4, %vm556_vm3 }
 0x3f1   :  { %v549_v14 = vmul.f32 %v548_v13, %v451_v10  ;;  %v552_v15 = vsub.f32 1.0, %v551_v12 }
 0x3f3   :  { %v553_v17 = vmul.f32 %v691_v9, %v552_v15  ;;  %v570_v19 = vadd.f32 %v964_v46, %v549_v14 }
 0x3f5   :  { %v554_v20 = vadd.f32 %v691_v9, %v553_v17  ;;  %574 = vst.msk [vmem:[#allocation2 + $0x10] sm:$0xff] %vm69_vm0, %v570_v19 }
 0x3f7   :  { %v558_v21 = vsel %vm557_vm5, %v691_v9, %v554_v20 }
 0x3f8   :  { %v563_v22 = vsel %vm560_vm6, %v562_v62, %v558_v21 }
 0x3f9   :  { %v564_v38 = vmul.f32 %v563_v22, %v452_v37 }
 0x3fb   :  { %v571_v23 = vadd.f32 %v964_v46, %v564_v38 }
 0x3fd   :  { %575 = vst.msk [vmem:[#allocation2 + $0x18] sm:$0xff] %vm69_vm0, %v571_v23 }
 0x3fe   :  { %588 = dma.vmem_to_hbm [thread:$0]  %s581_s0, 512, %s583_s20, [#allocation3], %s721_s21, %s721_s21, %s722_s1  }
 0x3ff   :  { %716 = dma.done.wait [#allocation3], 512  }
 0x400   :  { %717 = vsyncadd [#allocation3], 4294966784 }
 0x401   :  { %593 = vsyncpa [#allocation3], 1 }

</bundles_post_ra>
